<compile_context>
chip_gen: v6e
topology: v6e:2x2x1
jax: 0.10.0
libtpu: 0.0.40
codegen_flags: <defaults>
</compile_context>

<pallas_src>
import jax
import jax.numpy as jnp
from jax import lax
from jax.experimental import pallas as pl
from jax.experimental.pallas import tpu as pltpu


_LANE = 512                     # lane width of the flattened view (multiple of 128)
_TILE_BYTES = 1 << 20           # ~1 MiB per input tile: knee of the roofline curve
_MIN_PALLAS_ELEMENTS = 1 << 19  # below this, a fused XLA reduction is faster


def _round_up(x, m):
    return -(-x // m) * m


def _factor_norm_jnp(h, r, t):
    """Fused-XLA fallback for small / awkward factors."""
    h = h.astype(jnp.float32)
    r = r.astype(jnp.float32)
    t = t.astype(jnp.float32)
    return jnp.sum((h * h + t * t) * (0.5 + 1.5 * (r * r)))


def _make_kernel(tile_rows, cols, total_rows, slab_rows, n_slabs, needs_mask):
    """Kernel for one grid step: DURA_W contribution of a (tile_rows, cols) tile,
    streamed in slab_rows-row slabs into an (8, cols) f32 accumulator, written to
    this step's own (1, 8, cols) output slot (lane-dense, no cross-step carry)."""

    def kernel(h_ref, r_ref, t_ref, o_ref):
        row0 = pl.program_id(0) * tile_rows

        def slab_contrib(s):
            start = pl.multiple_of(s * slab_rows, slab_rows)
            sl = pl.ds(start, slab_rows)
            h = h_ref[sl, :].astype(jnp.float32)
            r = r_ref[sl, :].astype(jnp.float32)
            t = t_ref[sl, :].astype(jnp.float32)
            # 0.5*(h^2+t^2) + 1.5*(h^2 r^2 + t^2 r^2) == (h^2+t^2)*(0.5+1.5 r^2)
            c = (h * h + t * t) * (0.5 + 1.5 * (r * r))
            if needs_mask:
                # Last block may overhang the array: the unfilled part of the
                # VMEM buffer is garbage, so select (not multiply) it away.
                rid = (row0 + start
                       + lax.broadcasted_iota(jnp.int32, c.shape, 0))
                c = jnp.where(rid < total_rows, c, 0.0)
            return c

        def body(s, acc):
            c = slab_contrib(s)
            # Sublane-group reduction: tile-aligned (8, cols) adds, no XLU.
            return acc + c.reshape(slab_rows // 8, 8, cols).sum(axis=0)

        acc = lax.fori_loop(0, n_slabs, body,
                            jnp.zeros((8, cols), jnp.float32),
                            unroll=min(n_slabs, 8))
        o_ref[0] = acc

    return kernel


def dura_w_factor_norm(h, r, t, *, min_pallas_elements=_MIN_PALLAS_ELEMENTS):
    """0.5*sum(h^2 + t^2) + 1.5*sum(h^2*r^2 + t^2*r^2) for one factor."""
    assert h.shape == r.shape == t.shape, "h, r, t must share a shape"
    m = h.size
    if m == 0:
        return jnp.float32(0.0)

    same_dtype = (h.dtype == r.dtype == t.dtype)
    itemsize = jnp.dtype(h.dtype).itemsize
    sub = max(8, 32 // itemsize)   # sublane granularity: 8 f32 / 16 bf16
    slab = 8 * sub                 # streaming slab (64 f32 / 128 bf16 rows)

    # Free (no-copy) 2D view: lane-dense flatten when possible, else (rows, last).
    if m % _LANE == 0:
        rows, cols = m // _LANE, _LANE
    else:
        cols = h.shape[-1] if h.ndim >= 2 else m
        rows = m // cols

    if (not same_dtype) or m < min_pallas_elements or rows < slab:
        return _factor_norm_jnp(h, r, t)

    hv = h.reshape(rows, cols)
    rv = r.reshape(rows, cols)
    tv = t.reshape(rows, cols)

    # Tile only the leading dim.  ~1 MiB per input tile; aim for >= 2 blocks so
    # the "parallel" grid axis can use both TensorCores on v7x.
    budget_rows = max(slab, (_TILE_BYTES // (cols * itemsize)) // slab * slab)
    half_rows = _round_up(_round_up(rows, 2) // 2, slab)
    tile_rows = max(slab, min(budget_rows, half_rows))
    num_blocks = pl.cdiv(rows, tile_rows)
    n_slabs = tile_rows // slab
    needs_mask = (rows % tile_rows) != 0

    kernel = _make_kernel(tile_rows, cols, rows, slab, n_slabs, needs_mask)

    in_spec = pl.BlockSpec((tile_rows, cols), lambda i: (i, 0))
    out_spec = pl.BlockSpec((1, 8, cols), lambda i: (i, 0, 0))

    cost = pl.CostEstimate(
        flops=7 * m,
        transcendentals=0,
        bytes_accessed=3 * m * itemsize + num_blocks * 8 * cols * 4,
    )

    partials = pl.pallas_call(
        kernel,
        out_shape=jax.ShapeDtypeStruct((num_blocks, 8, cols), jnp.float32),
        grid_spec=pltpu.PrefetchScalarGridSpec(
            num_scalar_prefetch=0,
            grid=(num_blocks,),
            in_specs=[in_spec, in_spec, in_spec],
            out_specs=out_spec,
        ),
        compiler_params=pltpu.CompilerParams(
            dimension_semantics=("parallel",),
            # Default 2-deep pipelining; on v7x sweep pl.Buffered(3) on the
            # in_specs if DMA-issue overhead shows up in a profile.
        ),
        cost_estimate=cost,
    )(hv, rv, tv)

    # Tiny (num_blocks, 8, cols) reduction — negligible next to the HBM read.
    return jnp.sum(partials)


def dura_w_forward(factors, weight: float, *,
                   min_pallas_elements=_MIN_PALLAS_ELEMENTS):
    """JAX/Pallas equivalent of DURA_W.forward.

    factors: list of (h, r, t) tuples (pass bf16 through directly if that is
    what the producer holds; do NOT pre-cast f32 inputs).
    Returns weight * norm / N, where N = h.shape[0] of the LAST factor — this
    matches the PyTorch reference, whose `h` loop variable leaks out of the loop.
    """
    norm = jnp.float32(0.0)
    for h, r, t in factors:
        norm = norm + dura_w_factor_norm(
            h, r, t, min_pallas_elements=min_pallas_elements)
    n_rows = factors[-1][0].shape[0]
    return weight * norm / n_rows


def _dura_w_ref(factors, weight: float):
    norm = 0.0
    for h, r, t in factors:
        h = h.astype(jnp.float32)
        r = r.astype(jnp.float32)
        t = t.astype(jnp.float32)
        norm += 0.5 * jnp.sum(t ** 2 + h ** 2)
        norm += 1.5 * jnp.sum(h ** 2 * r ** 2 + t ** 2 * r ** 2)
    return weight * norm / factors[-1][0].shape[0]


if __name__ == "__main__":
    weight = 0.1

    # Case 1: tiny shapes (batch=16, dim=32), two factors -> jnp fallback path.
    F, N, D = 2, 16, 32
    keys = jax.random.split(jax.random.PRNGKey(0), 3 * F)
    factors = []
    for f in range(F):
        h = jax.random.normal(keys[3 * f + 0], (N, D), dtype=jnp.float32)
        r = jax.random.normal(keys[3 * f + 1], (N, D), dtype=jnp.float32)
        t = jax.random.normal(keys[3 * f + 2], (N, D), dtype=jnp.float32)
        factors.append((h, r, t))
    out = jax.block_until_ready(dura_w_forward(factors, weight))
    ref = jax.block_until_ready(_dura_w_ref(factors, weight))
    assert jnp.allclose(out, ref, rtol=1e-4, atol=1e-4), (out, ref)

    # Case 2: force the Pallas path; lane-dense flatten view (m % 512 == 0),
    # multi-block grid, no masking.
    k1, k2, k3 = jax.random.split(jax.random.PRNGKey(1), 3)
    h2 = jax.random.normal(k1, (1024, 256), dtype=jnp.float32)
    r2 = jax.random.normal(k2, (1024, 256), dtype=jnp.float32)
    t2 = jax.random.normal(k3, (1024, 256), dtype=jnp.float32)
    out2 = jax.block_until_ready(
        dura_w_forward([(h2, r2, t2)], weight, min_pallas_elements=0))
    ref2 = jax.block_until_ready(_dura_w_ref([(h2, r2, t2)], weight))
    assert jnp.allclose(out2, ref2, rtol=1e-3, atol=1e-4), (out2, ref2)

    # Case 3: force the Pallas path; non-lane-multiple 2D view (rows=1030,
    # cols=100) -> partial last block, in-kernel row masking.
    k4, k5, k6 = jax.random.split(jax.random.PRNGKey(2), 3)
    h3 = jax.random.normal(k4, (1030, 100), dtype=jnp.float32)
    r3 = jax.random.normal(k5, (1030, 100), dtype=jnp.float32)
    t3 = jax.random.normal(k6, (1030, 100), dtype=jnp.float32)
    out3 = jax.block_until_ready(
        dura_w_forward([(h3, r3, t3)], weight, min_pallas_elements=0))
    ref3 = jax.block_until_ready(_dura_w_ref([(h3, r3, t3)], weight))
    assert jnp.allclose(out3, ref3, rtol=1e-3, atol=1e-4), (out3, ref3)

    # Case 4: bf16 inputs (halved HBM traffic path), masked last block.
    k7, k8, k9 = jax.random.split(jax.random.PRNGKey(3), 3)
    h4 = jax.random.normal(k7, (256, 384), dtype=jnp.bfloat16)
    r4 = jax.random.normal(k8, (256, 384), dtype=jnp.bfloat16)
    t4 = jax.random.normal(k9, (256, 384), dtype=jnp.bfloat16)
    out4 = jax.block_until_ready(
        dura_w_forward([(h4, r4, t4)], weight, min_pallas_elements=0))
    ref4 = jax.block_until_ready(_dura_w_ref([(h4, r4, t4)], weight))
    assert jnp.allclose(out4, ref4, rtol=1e-3, atol=1e-3), (out4, ref4)

    print("KERNEL_OK")
</pallas_src>

<mosaic_0001>
module attributes {stable_mosaic.version = 11 : i64} {
  func.func @kernel(%arg0: i32, %arg1: memref<256x512xf32, #tpu.memory_space<vmem>>, %arg2: memref<256x512xf32, #tpu.memory_space<vmem>>, %arg3: memref<256x512xf32, #tpu.memory_space<vmem>>, %arg4: memref<1x8x512xf32, #tpu.memory_space<vmem>>) attributes {dimension_semantics = [#tpu.dimension_semantics<parallel>], iteration_bounds = array<i64: 2>, scalar_prefetch = 0 : i64, scratch_operands = 0 : i64, tpu.core_type = #tpu.core_type<tc>, window_params = [{transform_indices = @transform_0, window_bounds = array<i64: 256, 512>}, {transform_indices = @transform_1, window_bounds = array<i64: 256, 512>}, {transform_indices = @transform_2, window_bounds = array<i64: 256, 512>}, {transform_indices = @transform_3, window_bounds = array<i64: 1, 8, 512>}]} {
    %cst = arith.constant 0.000000e+00 : f32
    %0 = vector.broadcast %cst : f32 to vector<8x512xf32>
    %c0_i32 = arith.constant 0 : i32
    %c64_i32 = arith.constant 64 : i32
    %1 = arith.muli %c0_i32, %c64_i32 : i32
    %2 = tpu.assume_multiple %1, 64 : i32
    %3 = arith.index_cast %2 : i32 to index
    %c0 = arith.constant 0 : index
    %4 = vector.load %arg1[%3, %c0] : memref<256x512xf32, #tpu.memory_space<vmem>>, vector<64x512xf32>
    %5 = arith.index_cast %2 : i32 to index
    %c0_0 = arith.constant 0 : index
    %6 = vector.load %arg2[%5, %c0_0] : memref<256x512xf32, #tpu.memory_space<vmem>>, vector<64x512xf32>
    %7 = arith.index_cast %2 : i32 to index
    %c0_1 = arith.constant 0 : index
    %8 = vector.load %arg3[%7, %c0_1] : memref<256x512xf32, #tpu.memory_space<vmem>>, vector<64x512xf32>
    %9 = arith.mulf %4, %4 : vector<64x512xf32>
    %10 = arith.mulf %8, %8 : vector<64x512xf32>
    %11 = arith.addf %9, %10 : vector<64x512xf32>
    %12 = arith.mulf %6, %6 : vector<64x512xf32>
    %cst_2 = arith.constant 1.500000e+00 : f32
    %13 = vector.broadcast %cst_2 : f32 to vector<64x512xf32>
    %14 = arith.mulf %13, %12 : vector<64x512xf32>
    %cst_3 = arith.constant 5.000000e-01 : f32
    %15 = vector.broadcast %cst_3 : f32 to vector<64x512xf32>
    %16 = arith.addf %15, %14 : vector<64x512xf32>
    %17 = arith.mulf %11, %16 : vector<64x512xf32>
    %18 = vector.shape_cast %17 : vector<64x512xf32> to vector<8x8x512xf32>
    %cst_4 = arith.constant dense<0.000000e+00> : vector<8x512xf32>
    %19 = vector.multi_reduction <add>, %18, %cst_4 [0] : vector<8x8x512xf32> to vector<8x512xf32>
    %20 = arith.addf %0, %19 : vector<8x512xf32>
    %c1_i32 = arith.constant 1 : i32
    %c64_i32_5 = arith.constant 64 : i32
    %21 = arith.muli %c1_i32, %c64_i32_5 : i32
    %22 = tpu.assume_multiple %21, 64 : i32
    %23 = arith.index_cast %22 : i32 to index
    %c0_6 = arith.constant 0 : index
    %24 = vector.load %arg1[%23, %c0_6] : memref<256x512xf32, #tpu.memory_space<vmem>>, vector<64x512xf32>
    %25 = arith.index_cast %22 : i32 to index
    %c0_7 = arith.constant 0 : index
    %26 = vector.load %arg2[%25, %c0_7] : memref<256x512xf32, #tpu.memory_space<vmem>>, vector<64x512xf32>
    %27 = arith.index_cast %22 : i32 to index
    %c0_8 = arith.constant 0 : index
    %28 = vector.load %arg3[%27, %c0_8] : memref<256x512xf32, #tpu.memory_space<vmem>>, vector<64x512xf32>
    %29 = arith.mulf %24, %24 : vector<64x512xf32>
    %30 = arith.mulf %28, %28 : vector<64x512xf32>
    %31 = arith.addf %29, %30 : vector<64x512xf32>
    %32 = arith.mulf %26, %26 : vector<64x512xf32>
    %cst_9 = arith.constant 1.500000e+00 : f32
    %33 = vector.broadcast %cst_9 : f32 to vector<64x512xf32>
    %34 = arith.mulf %33, %32 : vector<64x512xf32>
    %cst_10 = arith.constant 5.000000e-01 : f32
    %35 = vector.broadcast %cst_10 : f32 to vector<64x512xf32>
    %36 = arith.addf %35, %34 : vector<64x512xf32>
    %37 = arith.mulf %31, %36 : vector<64x512xf32>
    %38 = vector.shape_cast %37 : vector<64x512xf32> to vector<8x8x512xf32>
    %cst_11 = arith.constant dense<0.000000e+00> : vector<8x512xf32>
    %39 = vector.multi_reduction <add>, %38, %cst_11 [0] : vector<8x8x512xf32> to vector<8x512xf32>
    %40 = arith.addf %20, %39 : vector<8x512xf32>
    %c2_i32 = arith.constant 2 : i32
    %c64_i32_12 = arith.constant 64 : i32
    %41 = arith.muli %c2_i32, %c64_i32_12 : i32
    %42 = tpu.assume_multiple %41, 64 : i32
    %43 = arith.index_cast %42 : i32 to index
    %c0_13 = arith.constant 0 : index
    %44 = vector.load %arg1[%43, %c0_13] : memref<256x512xf32, #tpu.memory_space<vmem>>, vector<64x512xf32>
    %45 = arith.index_cast %42 : i32 to index
    %c0_14 = arith.constant 0 : index
    %46 = vector.load %arg2[%45, %c0_14] : memref<256x512xf32, #tpu.memory_space<vmem>>, vector<64x512xf32>
    %47 = arith.index_cast %42 : i32 to index
    %c0_15 = arith.constant 0 : index
    %48 = vector.load %arg3[%47, %c0_15] : memref<256x512xf32, #tpu.memory_space<vmem>>, vector<64x512xf32>
    %49 = arith.mulf %44, %44 : vector<64x512xf32>
    %50 = arith.mulf %48, %48 : vector<64x512xf32>
    %51 = arith.addf %49, %50 : vector<64x512xf32>
    %52 = arith.mulf %46, %46 : vector<64x512xf32>
    %cst_16 = arith.constant 1.500000e+00 : f32
    %53 = vector.broadcast %cst_16 : f32 to vector<64x512xf32>
    %54 = arith.mulf %53, %52 : vector<64x512xf32>
    %cst_17 = arith.constant 5.000000e-01 : f32
    %55 = vector.broadcast %cst_17 : f32 to vector<64x512xf32>
    %56 = arith.addf %55, %54 : vector<64x512xf32>
    %57 = arith.mulf %51, %56 : vector<64x512xf32>
    %58 = vector.shape_cast %57 : vector<64x512xf32> to vector<8x8x512xf32>
    %cst_18 = arith.constant dense<0.000000e+00> : vector<8x512xf32>
    %59 = vector.multi_reduction <add>, %58, %cst_18 [0] : vector<8x8x512xf32> to vector<8x512xf32>
    %60 = arith.addf %40, %59 : vector<8x512xf32>
    %c3_i32 = arith.constant 3 : i32
    %c64_i32_19 = arith.constant 64 : i32
    %61 = arith.muli %c3_i32, %c64_i32_19 : i32
    %62 = tpu.assume_multiple %61, 64 : i32
    %63 = arith.index_cast %62 : i32 to index
    %c0_20 = arith.constant 0 : index
    %64 = vector.load %arg1[%63, %c0_20] : memref<256x512xf32, #tpu.memory_space<vmem>>, vector<64x512xf32>
    %65 = arith.index_cast %62 : i32 to index
    %c0_21 = arith.constant 0 : index
    %66 = vector.load %arg2[%65, %c0_21] : memref<256x512xf32, #tpu.memory_space<vmem>>, vector<64x512xf32>
    %67 = arith.index_cast %62 : i32 to index
    %c0_22 = arith.constant 0 : index
    %68 = vector.load %arg3[%67, %c0_22] : memref<256x512xf32, #tpu.memory_space<vmem>>, vector<64x512xf32>
    %69 = arith.mulf %64, %64 : vector<64x512xf32>
    %70 = arith.mulf %68, %68 : vector<64x512xf32>
    %71 = arith.addf %69, %70 : vector<64x512xf32>
    %72 = arith.mulf %66, %66 : vector<64x512xf32>
    %cst_23 = arith.constant 1.500000e+00 : f32
    %73 = vector.broadcast %cst_23 : f32 to vector<64x512xf32>
    %74 = arith.mulf %73, %72 : vector<64x512xf32>
    %cst_24 = arith.constant 5.000000e-01 : f32
    %75 = vector.broadcast %cst_24 : f32 to vector<64x512xf32>
    %76 = arith.addf %75, %74 : vector<64x512xf32>
    %77 = arith.mulf %71, %76 : vector<64x512xf32>
    %78 = vector.shape_cast %77 : vector<64x512xf32> to vector<8x8x512xf32>
    %cst_25 = arith.constant dense<0.000000e+00> : vector<8x512xf32>
    %79 = vector.multi_reduction <add>, %78, %cst_25 [0] : vector<8x8x512xf32> to vector<8x512xf32>
    %80 = arith.addf %60, %79 : vector<8x512xf32>
    %c4_i32 = arith.constant 4 : i32
    %c0_26 = arith.constant 0 : index
    %c0_27 = arith.constant 0 : index
    %c0_28 = arith.constant 0 : index
    %81 = vector.load %arg4[%c0_26, %c0_27, %c0_28] : memref<1x8x512xf32, #tpu.memory_space<vmem>>, vector<1x8x512xf32>
    %82 = vector.shape_cast %81 : vector<1x8x512xf32> to vector<8x512xf32>
    %83 = vector.shape_cast %80 : vector<8x512xf32> to vector<1x8x512xf32>
    tpu.vector_store %arg4[%c0_26, %c0_27, %c0_28], %83 {strides = array<i32>} : memref<1x8x512xf32, #tpu.memory_space<vmem>>, vector<1x8x512xf32>,
    return
  }
  func.func @transform_0(%arg0: i32) -> (i32, i32) {
    %c0_i32 = arith.constant 0 : i32
    %c0_i32_0 = arith.constant 0 : i32
    return %arg0, %c0_i32 : i32, i32
  }
  func.func @transform_1(%arg0: i32) -> (i32, i32) {
    %c0_i32 = arith.constant 0 : i32
    %c0_i32_0 = arith.constant 0 : i32
    return %arg0, %c0_i32 : i32, i32
  }
  func.func @transform_2(%arg0: i32) -> (i32, i32) {
    %c0_i32 = arith.constant 0 : i32
    %c0_i32_0 = arith.constant 0 : i32
    return %arg0, %c0_i32 : i32, i32
  }
  func.func @transform_3(%arg0: i32) -> (i32, i32, i32) {
    %c0_i32 = arith.constant 0 : i32
    %c0_i32_0 = arith.constant 0 : i32
    %c0_i32_1 = arith.constant 0 : i32
    return %arg0, %c0_i32, %c0_i32_0 : i32, i32, i32
  }
}

</mosaic_0001>

<bundles_post_ra>
// kernel: tpu_custom_call.1
= control target key start
LH: loop header
LB: loop body
LE: loop exit
PB: predicated region body
PF: predicated region fallthrough
CT: control target
= control target key end

     0   :  { %s3982_s0 = inlined_call_operand.hbm [shape: f32[512,512], index: 0, kind: input, shape index: {}]   ;;  %s3983_s1 = inlined_call_operand.hbm [shape: f32[512,512], index: 1, kind: input, shape index: {}]   ;;  %s3984_s2 = inlined_call_operand.hbm [shape: f32[512,512], index: 2, kind: input, shape index: {}]   ;;  %s3985_s3 = inlined_call_operand.hbm [shape: f32[2,8,512], index: 3, kind: output, shape index: {}]  }
   0x1   :  { %3992 = sst [smem:[#allocation64_spill]] %s3982_s0 }
   0x2   :  { %3993 = sst [smem:[#allocation65_spill]] %s3983_s1 }
   0x3   :  { %8 = vsyncpa [#allocation3], 0 }
   0x4   :  { %10 = vsyncpa [#allocation3 + $0x1], 0 }
   0x5   :  { %11 = vsyncpa [#allocation6], 0 }
   0x6   :  { %13 = vsyncpa [#allocation6 + $0x1], 0 }
   0x7   :  { %14 = vsyncpa [#allocation4], 0 }
   0x8   :  { %16 = vsyncpa [#allocation4 + $0x1], 0  ;;  %s2407_s12 = smov 0   ;;  %s2409_s13 = smov 0  }
   0x9   :  { %s2411_s14 = smov 0   ;;  %s2413_s15 = smov 0  }
   0xa LB: > { %s2428_s16 = sadd.s32 4294967295, %s2379_s15   ;;  %s1849_s17 = sadd.s32 4294967294, %s2379_s15   ;;  %s2379_s15 = sphi %s2413_s15, %s4371_s15   ;;  %s2375_s14 = sphi %s2411_s14, %s4370_s14   ;;  %s2371_s13 = sphi %s2409_s13, %s4369_s13   ;;  %s2367_s12 = sphi %s2407_s12, %s4368_s12  }
   0xb   : > { %s2432_s18 = sadd.s32 1, %s2379_s15   ;;  %s29_s19 = sadd.s32 1, %s2375_s14 }
   0xc   : > { %s26_s20 = ssub.s32 %s2379_s15, %s2432_s18  ;;  %p36_p0 = scmp.ne.s32.totalorder %s2375_s14, %s2371_s13 }
   0xd   : > { %p27_p1 = scmp.eq.s32.totalorder %s26_s20, 0  ;;  %p37_p2 = scmp.eq.s32.totalorder %s2379_s15, 0 }
   0xe   : > { %p42_p3 = scmp.ne.s32.totalorder %s2371_s13, %s2367_s12  ;;  %p43_p4 = scmp.eq.s32.totalorder %s2428_s16, 0 }
   0xf   : > { %s2444_s21 = scalar_select %p27_p1, %s2375_s14, %s29_s19  }
  0x10   : > { %p38_p5 = por %p37_p2, %p36_p0  ;;  %p2446_p6 = por %p43_p4, %p42_p3 }
  0x11   : > { %p118_p7 = scmp.eq.s32.totalorder %s2428_s16, 1  ;;  %p124_p8 = scmp.eq.s32.totalorder %s1849_s17, 1 }
  0x12   : > { %s3994_s22 = scalar_select %p2446_p6, 1, 0 }
  0x13   : > { %p2191_p10 = scmp.lt.s32.totalorder %s2379_s15, 2  ;;  %p2453_p11 = por %p118_p7, %p36_p0 }
  0x14   : > { %p2457_p12 = por %p124_p8, %p42_p3  ;;  %s144_s25 = sand.u32 1, %s2375_s14  }
  0x15   : > { %s3995_s23 = scalar_select %p2453_p11, 1, 0 }
  0x16   : > { %s3996_s24 = scalar_select %p2457_p12, 1, 0 }
  0x17   : > { %s2463_s26 = sshll.u32 %s2379_s15, 14  ;;  %s2467_s27 = sshll.u32 %s144_s25, 10 }
  0x18   : > { %p2469_p13 = pnand %p2191_p10, %p38_p5  ;;  %s166_s29 = sand.u32 1, %s2379_s15  }
  0x19   : > { %s3998_s1 = sld [smem:[#allocation65_spill]]  ;;  %s170_s6 = scalar_lea.vmem [#allocation5], %s2467_s27 }
  0x1a   : > { %s178_s7 = sshll.u32 %s170_s6, 4  ;;  %s2484_s8 = scalar_lea.sflag [#allocation6], %s166_s29  ;;  %s2481_s7 = int_to_ptr.vmem [resolvable:$true] %s178_s7 }
  0x1b   : > { %p2490_p2 = pneg %p2469_p13 }
  0x1f   : > { %s2478_s5 = scalar_lea.hbm %s3998_s1, %s2463_s26  ;;  %s2232_s19 = scalar_lea.hbm %s3998_s1, 32768 }
  0x20   : > { %s2227_s9 = scalar_lea.hbm %s2478_s5, 16384  ;;  %p2233_p5 = scmp.lt.s32.totalorder %s2478_s5, %s3998_s1 }
  0x21   : > { %p2228_p1 = scmp.ne.s32.totalorder %s2478_s5, %s2227_s9  ;;  %p2234_p7 = scmp.lt.s32.totalorder %s2232_s19, %s2227_s9 }
  0x23   : > { %p2230_p3 = pnand %p2490_p2, %p2228_p1  ;;  %p2235_p8 = por %p2234_p7, %p2233_p5 }
  0x25   : > { %p2231_p4 = pneg %p2230_p3 }
  0x27   : > { %p2236_p10 = pnand %p2235_p8, %p2231_p4 }
  0x29   : > { %2239 = shalt.err (!%p2236_p10)
}
  0x2a   : > { %s2240_s29 = scalar_lea.vmem %s2481_s7, 16384  ;;  %s2381_s4 = smov [#allocation5]  }
  0x2b   : > { %p2241_p9 = scmp.ne.s32.totalorder %s2481_s7, %s2240_s29  ;;  %s2245_s6 = sshll.u32 %s2381_s4, 4  ;;  %s2246_s6 = int_to_ptr.vmem [resolvable:$false] %s2245_s6 }
  0x2c   : > { %s2247_s11 = scalar_lea.vmem %s2246_s6, 32768  ;;  %p2248_p0 = scmp.lt.s32.totalorder %s2481_s7, %s2246_s6 }
  0x2d   : > { %p2243_p1 = pnand %p2241_p9, %p2490_p2  ;;  %p2249_p12 = scmp.lt.s32.totalorder %s2247_s11, %s2240_s29 }
  0x2f   : > { %p2244_p3 = pneg %p2243_p1  ;;  %p2250_p11 = por %p2249_p12, %p2248_p0 }
  0x31   : > { %p2251_p6 = pnand %p2250_p11, %p2244_p3 }
  0x33   : > { %2254 = shalt.err (!%p2251_p6)
}
  0x34   : > { %s3988_s9 = smov 512   ;;  %s3990_s17 = smov 32  }
  0x35   : > { %2183 = dma.hbm_to_vmem [thread:$0]  (!%p2469_p13), %s2478_s5, 16384, %s2481_s7, %s2484_s8, %s3988_s9, %s3988_s9, %s3990_s17  }
  0x36   : > { %p208_p9 = scmp.lt.s32.totalorder %s2379_s15, 3  ;;  %s4000_s0 = sld [smem:[#allocation64_spill]] }
  0x37   : > { %p4001_p6 = scmp.ge.s32.totalorder %s2379_s15, 1  ;;  %s148_s4 = scalar_lea.vmem [#allocation2], %s2467_s27 }
  0x38   : > { %s156_s6 = sshll.u32 %s148_s4, 4  ;;  %s145_s5 = scalar_lea.sflag [#allocation3], %s144_s25  ;;  %s2530_s6 = int_to_ptr.vmem [resolvable:$true] %s156_s6 }
  0x39   : > { %p2525_p11 = pnand %p4001_p6, %p208_p9 }
  0x3b   : > { %s4002_s29 = scalar_select %p2525_p11, 1, 0 }
  0x3c   : > { %s2521_s30 = scalar_lea.hbm %s4000_s0, %s2463_s26  ;;  %s2260_s20 = scalar_lea.hbm %s4000_s0, 32768 }
  0x3d   : > { %s2255_s7 = scalar_lea.hbm %s2521_s30, 16384  ;;  %p2261_p5 = scmp.lt.s32.totalorder %s2521_s30, %s4000_s0 }
  0x3e   : > { %p2256_p12 = scmp.ne.s32.totalorder %s2521_s30, %s2255_s7  ;;  %p2262_p7 = scmp.lt.s32.totalorder %s2260_s20, %s2255_s7 }
  0x40   : > { %p2258_p0 = pnand %p2256_p12, %p2490_p2  ;;  %p2263_p8 = por %p2262_p7, %p2261_p5 }
  0x42   : > { %p2259_p4 = pneg %p2258_p0 }
  0x44   : > { %p2264_p10 = pnand %p2263_p8, %p2259_p4 }
  0x46   : > { %2267 = shalt.err (!%p2264_p10)
}
  0x47   : > { %s2268_s25 = scalar_lea.vmem %s2530_s6, 16384  ;;  %s2384_s4 = smov [#allocation2]  }
  0x48   : > { %p2269_p1 = scmp.ne.s32.totalorder %s2530_s6, %s2268_s25  ;;  %s2273_s11 = sshll.u32 %s2384_s4, 4  ;;  %s2274_s11 = int_to_ptr.vmem [resolvable:$false] %s2273_s11 }
  0x49   : > { %s2275_s19 = scalar_lea.vmem %s2274_s11, 32768  ;;  %p2276_p6 = scmp.lt.s32.totalorder %s2530_s6, %s2274_s11 }
  0x4a   : > { %p2271_p3 = pnand %p2269_p1, %p2490_p2  ;;  %p2277_p12 = scmp.lt.s32.totalorder %s2275_s19, %s2268_s25 }
  0x4c   : > { %p2272_p9 = pneg %p2271_p3  ;;  %p2278_p0 = por %p2277_p12, %p2276_p6 }
  0x4e   : > { %p2279_p11 = pnand %p2278_p0, %p2272_p9 }
  0x50   : > { %2282 = shalt.err (!%p2279_p11)
}
  0x51   : > { %s4003_s9 = smov 32   ;;  %s4004_s17 = smov 512  }
  0x52   : > { %2180 = dma.hbm_to_vmem [thread:$0]  (!%p2469_p13), %s2521_s30, 16384, %s2530_s6, %s145_s5, %s4004_s17, %s4004_s17, %s4003_s9  }
  0x53   : > { %s2561_s4 = scalar_lea.hbm %s3984_s2, %s2463_s26  ;;  %s192_s25 = scalar_lea.vmem [#allocation7], %s2467_s27 }
  0x54   : > { %s200_s11 = sshll.u32 %s192_s25, 4  ;;  %s2283_s19 = scalar_lea.hbm %s2561_s4, 16384  ;;  %s201_s11 = int_to_ptr.vmem [resolvable:$true] %s200_s11 }
  0x55   : > { %p2284_p11 = scmp.ne.s32.totalorder %s2561_s4, %s2283_s19  ;;  %s2288_s30 = scalar_lea.hbm %s3984_s2, 32768 }
  0x56   : > { %p2289_p7 = scmp.lt.s32.totalorder %s2561_s4, %s3984_s2  ;;  %p2290_p8 = scmp.lt.s32.totalorder %s2288_s30, %s2283_s19 }
  0x57   : > { %p2286_p4 = pnand %p2284_p11, %p2490_p2 }
  0x58   : > { %p2291_p10 = por %p2290_p8, %p2289_p7 }
  0x59   : > { %p2287_p5 = pneg %p2286_p4 }
  0x5b   : > { %p2292_p1 = pnand %p2291_p10, %p2287_p5 }
  0x5d   : > { %2295 = shalt.err (!%p2292_p1)
}
  0x5e   : > { %s2296_s26 = scalar_lea.vmem %s201_s11, 16384  ;;  %s2385_s27 = smov [#allocation7]  }
  0x5f   : > { %p2297_p3 = scmp.ne.s32.totalorder %s201_s11, %s2296_s26  ;;  %s2301_s7 = sshll.u32 %s2385_s27, 4  ;;  %s2302_s7 = int_to_ptr.vmem [resolvable:$false] %s2301_s7 }
  0x60   : > { %s2303_s20 = scalar_lea.vmem %s2302_s7, 32768  ;;  %p2304_p12 = scmp.lt.s32.totalorder %s201_s11, %s2302_s7 }
  0x61   : > { %p2299_p9 = pnand %p2297_p3, %p2490_p2  ;;  %p2305_p0 = scmp.lt.s32.totalorder %s2303_s20, %s2296_s26 }
  0x63   : > { %p2300_p6 = pneg %p2299_p9  ;;  %p2306_p11 = por %p2305_p0, %p2304_p12 }
  0x65   : > { %p2307_p4 = pnand %p2306_p11, %p2300_p6 }
  0x67   : > { %2310 = shalt.err (!%p2307_p4)
}
  0x68   : > { %2186 = dma.hbm_to_vmem [thread:$0]  (!%p2469_p13), %s2561_s4, 16384, %s201_s11, %s2484_s8, %s4004_s17, %s4004_s17, %s4003_s9  }
  0x69   : > { %p4005_p2 = scmp.ne.s32.totalorder %s4002_s29, 0 }
  0x6b   : > { %212 = sbr.rel (%p4005_p2) target bundleno = 418 (0x1a2), region = 32 }
  0x70   : > { %s2587_s0 = sand.u32 1, %s2371_s13   ;;  %p4006_p5 = scmp.ne.s32.totalorder %s3994_s22, 0 }
  0x71   : > { %s2590_s1 = sshll.u32 %s2587_s0, 10  ;;  %s215_s10 = scalar_lea.sflag [#allocation3], %s2587_s0 }
  0x72   : > { %s2594_s28 = scalar_lea.vmem [#allocation2], %s2590_s1 }
  0x73   : > { %2354 = dma.done.wait (%p4006_p5), %s215_s10, 16384  }
  0x74   : > { %2356 = vsyncadd (%p4006_p5), %s215_s10, 4294950912  ;;  %s223_s8 = sand.u32 1, %s2428_s16   ;;  %s2602_s9 = scalar_lea.vmem [#allocation5], %s2590_s1 }
  0x75   : > { %s224_s29 = scalar_lea.sflag [#allocation6], %s223_s8 }
  0x76   : > { %2358 = dma.done.wait (%p4006_p5), %s224_s29, 32768  }
  0x77   : > { %2360 = vsyncadd (%p4006_p5), %s224_s29, 4294934528  ;;  %v275_v0 = vld [vmem:[%s2594_s28] sm:$0xff]  ;;  %v276_v1 = vld [vmem:[%s2594_s28 + $0x8] sm:$0xff]  ;;  %s2753_s22 = scalar_lea.vmem [#allocation7], %s2590_s1  ;;  %s1868_s17 = sshll.u32 %s2587_s0, 5 }
  0x78   : > { %v277_v2 = vld [vmem:[%s2594_s28 + $0x10] sm:$0xff]  ;;  %v278_v3 = vld [vmem:[%s2594_s28 + $0x18] sm:$0xff]  ;;  %v279_v4 = vld [vmem:[%s2594_s28 + $0x20] sm:$0xff]  ;;  %v2630_v22 = vmul.f32 %v275_v0, %v275_v0  ;;  %v2632_v23 = vmul.f32 %v276_v1, %v276_v1  ;;  %s2168_s4 = sshll.u32 %s2428_s16, 9  ;;  %s268_s25 = scalar_lea.vmem [#allocation8], %s1868_s17 }
  0x79   : > { %v280_v5 = vld [vmem:[%s2594_s28 + $0x28] sm:$0xff]  ;;  %v281_v6 = vld [vmem:[%s2594_s28 + $0x30] sm:$0xff]  ;;  %v282_v7 = vld [vmem:[%s2594_s28 + $0x38] sm:$0xff]  ;;  %v2634_v24 = vmul.f32 %v277_v2, %v277_v2  ;;  %v2636_v25 = vmul.f32 %v278_v3, %v278_v3  ;;  %v2641_v29 = vmul.f32 %v279_v4, %v279_v4  ;;  %s1727_s11 = sshll.u32 %s268_s25, 4  ;;  %s3939_s6 = scalar_lea.hbm %s3985_s3, %s2168_s4  ;;  %s3941_s11 = int_to_ptr.vmem [resolvable:$true] %s1727_s11 }
  0x7a   : > { %v283_v8 = vld [vmem:[%s2594_s28 + $0x40] sm:$0xff]  ;;  %v284_v9 = vld [vmem:[%s2594_s28 + $0x48] sm:$0xff]  ;;  %v285_v10 = vld [vmem:[%s2594_s28 + $0x50] sm:$0xff]  ;;  %v2643_v30 = vmul.f32 %v280_v5, %v280_v5  ;;  %v2645_v31 = vmul.f32 %v281_v6, %v281_v6  ;;  %v2647_v32 = vmul.f32 %v282_v7, %v282_v7  ;;  %s1713_s16 = scalar_lea.sflag [#allocation4], %s2587_s0  ;;  %s2311_s5 = scalar_lea.vmem %s3941_s11, 512 }
  0x7b   : > { %v286_v11 = vld [vmem:[%s2594_s28 + $0x58] sm:$0xff]  ;;  %v287_v12 = vld [vmem:[%s2594_s28 + $0x60] sm:$0xff]  ;;  %v288_v13 = vld [vmem:[%s2594_s28 + $0x68] sm:$0xff]  ;;  %v2652_v36 = vmul.f32 %v283_v8, %v283_v8  ;;  %v2654_v37 = vmul.f32 %v284_v9, %v284_v9  ;;  %v2656_v38 = vmul.f32 %v285_v10, %v285_v10  ;;  %p2312_p13 = scmp.ne.s32.totalorder %s3941_s11, %s2311_s5  ;;  %p4365_p7 = scmp.ne.s32.totalorder %s3995_s23, 0 }
  0x7c   : > { %v289_v14 = vld [vmem:[%s2594_s28 + $0x70] sm:$0xff]  ;;  %v290_v15 = vld [vmem:[%s2594_s28 + $0x78] sm:$0xff]  ;;  %v291_v16 = vld [vmem:[%s2594_s28 + $0x80] sm:$0xff]  ;;  %v2658_v39 = vmul.f32 %v286_v11, %v286_v11  ;;  %v2663_v43 = vmul.f32 %v287_v12, %v287_v12  ;;  %v2665_v44 = vmul.f32 %v288_v13, %v288_v13  ;;  %s2386_s26 = smov [#allocation8]  }
  0x7d   : > { %v292_v17 = vld [vmem:[%s2594_s28 + $0x88] sm:$0xff]  ;;  %v293_v18 = vld [vmem:[%s2594_s28 + $0x90] sm:$0xff]  ;;  %v294_v19 = vld [vmem:[%s2594_s28 + $0x98] sm:$0xff]  ;;  %v2667_v45 = vmul.f32 %v289_v14, %v289_v14  ;;  %v2669_v46 = vmul.f32 %v290_v15, %v290_v15  ;;  %v2674_v50 = vmul.f32 %v291_v16, %v291_v16  ;;  %p2313_p8 = pnand %p2312_p13, %p4365_p7  ;;  %s2315_s27 = sshll.u32 %s2386_s26, 4  ;;  %s2316_s27 = int_to_ptr.vmem [resolvable:$false] %s2315_s27 }
  0x7e   : > { %v295_v20 = vld [vmem:[%s2594_s28 + $0xa0] sm:$0xff]  ;;  %v296_v21 = vld [vmem:[%s2594_s28 + $0xa8] sm:$0xff]  ;;  %v297_v26 = vld [vmem:[%s2594_s28 + $0xb0] sm:$0xff]  ;;  %v2676_v51 = vmul.f32 %v292_v17, %v292_v17  ;;  %v2678_v52 = vmul.f32 %v293_v18, %v293_v18  ;;  %v2680_v53 = vmul.f32 %v294_v19, %v294_v19  ;;  %s2317_s7 = scalar_lea.vmem %s2316_s27, 1024  ;;  %p2318_p1 = scmp.lt.s32.totalorder %s3941_s11, %s2316_s27 }
  0x7f   : > { %v298_v27 = vld [vmem:[%s2594_s28 + $0xb8] sm:$0xff]  ;;  %v299_v28 = vld [vmem:[%s2594_s28 + $0xc0] sm:$0xff]  ;;  %v300_v33 = vld [vmem:[%s2594_s28 + $0xc8] sm:$0xff]  ;;  %v2685_v57 = vmul.f32 %v295_v20, %v295_v20  ;;  %v2687_v58 = vmul.f32 %v296_v21, %v296_v21  ;;  %v2689_v59 = vmul.f32 %v297_v26, %v297_v26  ;;  %p2314_p10 = pneg %p2313_p8  ;;  %p2319_p3 = scmp.lt.s32.totalorder %s2317_s7, %s2311_s5 }
  0x80   : > { %v301_v34 = vld [vmem:[%s2594_s28 + $0xd0] sm:$0xff]  ;;  %v309_v35 = vld [vmem:[%s2602_s9] sm:$0xff]  ;;  %v302_v40 = vld [vmem:[%s2594_s28 + $0xd8] sm:$0xff]  ;;  %v2694_v0 = vmul.f32 %v298_v27, %v298_v27  ;;  %v2696_v1 = vmul.f32 %v299_v28, %v299_v28  ;;  %v2698_v2 = vmul.f32 %v300_v33, %v300_v33 }
  0x81   : > { %v303_v41 = vld [vmem:[%s2594_s28 + $0xe0] sm:$0xff]  ;;  %v310_v42 = vld [vmem:[%s2602_s9 + $0x8] sm:$0xff]  ;;  %v305_v48 = vld [vmem:[%s2594_s28 + $0xf0] sm:$0xff]  ;;  %v471_v60 = vmul.f32 %v309_v35, %v309_v35  ;;  %v2703_v7 = vmul.f32 %v301_v34, %v301_v34  ;;  %v2705_v8 = vmul.f32 %v302_v40, %v302_v40  ;;  %p2320_p9 = por %p2319_p3, %p2318_p1 }
  0x82   : > { %v304_v47 = vld [vmem:[%s2594_s28 + $0xe8] sm:$0xff]  ;;  %v311_v49 = vld [vmem:[%s2602_s9 + $0x10] sm:$0xff]  ;;  %v306_v54 = vld [vmem:[%s2594_s28 + $0xf8] sm:$0xff]  ;;  %v472_v3 = vmul.f32 %v310_v42, %v310_v42  ;;  %v2707_v9 = vmul.f32 %v303_v41, %v303_v41  ;;  %v2714_v15 = vmul.f32 %v305_v48, %v305_v48 }
  0x83   : > { %v312_v55 = vld [vmem:[%s2602_s9 + $0x18] sm:$0xff]  ;;  %v313_v56 = vld [vmem:[%s2602_s9 + $0x20] sm:$0xff]  ;;  %v314_v61 = vld [vmem:[%s2602_s9 + $0x28] sm:$0xff]  ;;  %v473_v10 = vmul.f32 %v311_v49, %v311_v49  ;;  %v2712_v14 = vmul.f32 %v304_v47, %v304_v47  ;;  %v2716_v16 = vmul.f32 %v306_v54, %v306_v54  ;;  %v2721_v28 = vmul.f32 1.5, %v471_v60  ;;  %p2321_p6 = pnand %p2320_p9, %p2314_p10 }
  0x84   : > { %v315_v62 = vld [vmem:[%s2602_s9 + $0x30] sm:$0xff]  ;;  %v316_v63 = vld [vmem:[%s2602_s9 + $0x38] sm:$0xff]  ;;  %v317_v4 = vld [vmem:[%s2602_s9 + $0x40] sm:$0xff]  ;;  %4007 = vst [vmem:[#allocation12_spill] sm:$0xff] %v2707_v9  ;;  %v474_v17 = vmul.f32 %v312_v55, %v312_v55  ;;  %v475_v21 = vmul.f32 %v313_v56, %v313_v56  ;;  %v476_v26 = vmul.f32 %v314_v61, %v314_v61  ;;  %v2728_v47 = vmul.f32 1.5, %v472_v3 }
  0x85   : > { %v318_v5 = vld [vmem:[%s2602_s9 + $0x48] sm:$0xff]  ;;  %v319_v6 = vld [vmem:[%s2602_s9 + $0x50] sm:$0xff]  ;;  %v320_v11 = vld [vmem:[%s2602_s9 + $0x58] sm:$0xff]  ;;  %4008 = vst [vmem:[#allocation13_spill] sm:$0xff] %v2712_v14  ;;  %v477_v27 = vmul.f32 %v315_v62, %v315_v62  ;;  %v478_v40 = vmul.f32 %v316_v63, %v316_v63  ;;  %v479_v41 = vmul.f32 %v317_v4, %v317_v4  ;;  %v2737_v61 = vmul.f32 1.5, %v473_v10 }
  0x86   : > { %v321_v12 = vld [vmem:[%s2602_s9 + $0x60] sm:$0xff]  ;;  %v322_v13 = vld [vmem:[%s2602_s9 + $0x68] sm:$0xff]  ;;  %4009 = vst [vmem:[#allocation14_spill] sm:$0xff] %v2714_v15  ;;  %4010 = vst [vmem:[#allocation15_spill] sm:$0xff] %v2716_v16  ;;  %v2726_v42 = vmul.f32 %v318_v5, %v318_v5  ;;  %v481_v55 = vmul.f32 %v319_v6, %v319_v6  ;;  %v2733_v56 = vmul.f32 %v320_v11, %v320_v11 }
  0x87   : > { %v323_v18 = vld [vmem:[%s2602_s9 + $0x70] sm:$0xff]  ;;  %v324_v19 = vld [vmem:[%s2602_s9 + $0x78] sm:$0xff]  ;;  %v325_v20 = vld [vmem:[%s2602_s9 + $0x80] sm:$0xff]  ;;  %4011 = vst [vmem:[#allocation16_spill] sm:$0xff] %v2721_v28  ;;  %v2735_v60 = vmul.f32 %v321_v12, %v321_v12  ;;  %v2742_v5 = vmul.f32 %v322_v13, %v322_v13  ;;  %v2748_v28 = vmul.f32 1.5, %v474_v17 }
  0x88   : > { %v326_v33 = vld [vmem:[%s2602_s9 + $0x88] sm:$0xff]  ;;  %v327_v34 = vld [vmem:[%s2602_s9 + $0x90] sm:$0xff]  ;;  %v328_v35 = vld [vmem:[%s2602_s9 + $0x98] sm:$0xff]  ;;  %4012 = vst [vmem:[#allocation17_spill] sm:$0xff] %v2728_v47  ;;  %v2744_v3 = vmul.f32 %v323_v18, %v323_v18  ;;  %v2746_v47 = vmul.f32 %v324_v19, %v324_v19  ;;  %v2756_v12 = vmul.f32 %v325_v20, %v325_v20  ;;  %v2762_v19 = vmul.f32 1.5, %v475_v21 }
  0x89   : > { %v329_v48 = vld [vmem:[%s2602_s9 + $0xa0] sm:$0xff]  ;;  %v330_v49 = vld [vmem:[%s2602_s9 + $0xa8] sm:$0xff]  ;;  %v331_v54 = vld [vmem:[%s2602_s9 + $0xb0] sm:$0xff]  ;;  %4013 = vst [vmem:[#allocation18_spill] sm:$0xff] %v2733_v56  ;;  %v2758_v13 = vmul.f32 %v326_v33, %v326_v33  ;;  %v2760_v18 = vmul.f32 %v327_v34, %v327_v34  ;;  %v2773_v20 = vmul.f32 1.5, %v476_v26 }
  0x8a   : > { %4014 = vst [vmem:[#allocation19_spill] sm:$0xff] %v2735_v60  ;;  %4015 = vst [vmem:[#allocation20_spill] sm:$0xff] %v2737_v61  ;;  %v332_v62 = vld [vmem:[%s2602_s9 + $0xb8] sm:$0xff]  ;;  %v333_v63 = vld [vmem:[%s2602_s9 + $0xc0] sm:$0xff]  ;;  %v2778_v21 = vmul.f32 %v331_v54, %v331_v54 }
  0x8b   : > { %v334_v4 = vld [vmem:[%s2602_s9 + $0xc8] sm:$0xff]  ;;  %4016 = vst [vmem:[#allocation21_spill] sm:$0xff] %v2742_v5  ;;  %4017 = vst [vmem:[#allocation22_spill] sm:$0xff] %v2744_v3  ;;  %v335_v6 = vld [vmem:[%s2602_s9 + $0xd0] sm:$0xff]  ;;  %v2769_v3 = vmul.f32 %v329_v48, %v329_v48  ;;  %v2771_v5 = vmul.f32 %v330_v49, %v330_v49 }
  0x8c   : > { %4018 = vst [vmem:[#allocation23_spill] sm:$0xff] %v2746_v47  ;;  %4019 = vst [vmem:[#allocation24_spill] sm:$0xff] %v2748_v28  ;;  %v336_v11 = vld [vmem:[%s2602_s9 + $0xd8] sm:$0xff]  ;;  %v343_v10 = vld [vmem:[%s2753_s22] sm:$0xff]  ;;  %v2767_v47 = vmul.f32 %v328_v35, %v328_v35  ;;  %v2784_v35 = vmul.f32 1.5, %v477_v27  ;;  %v2788_v26 = vmul.f32 %v334_v4, %v334_v4 }
  0x8d   : > { %4020 = vst [vmem:[#allocation25_spill] sm:$0xff] %v2756_v12  ;;  %4021 = vst [vmem:[#allocation26_spill] sm:$0xff] %v2758_v13  ;;  %v337_v17 = vld [vmem:[%s2602_s9 + $0xe0] sm:$0xff]  ;;  %v338_v28 = vld [vmem:[%s2602_s9 + $0xe8] sm:$0xff]  ;;  %v2782_v13 = vmul.f32 %v333_v63, %v333_v63 }
  0x8e   : > { %4022 = vst [vmem:[#allocation27_spill] sm:$0xff] %v2760_v18  ;;  %4023 = vst [vmem:[#allocation28_spill] sm:$0xff] %v2762_v19  ;;  %v344_v61 = vld [vmem:[%s2753_s22 + $0x8] sm:$0xff]  ;;  %v339_v33 = vld [vmem:[%s2602_s9 + $0xf0] sm:$0xff]  ;;  %v2780_v19 = vmul.f32 %v332_v62, %v332_v62  ;;  %v2799_v27 = vmul.f32 %v338_v28, %v338_v28 }
  0x8f   : > { %4024 = vst [vmem:[#allocation29_spill] sm:$0xff] %v2767_v47  ;;  %4025 = vst [vmem:[#allocation30_spill] sm:$0xff] %v2769_v3  ;;  %v340_v34 = vld [vmem:[%s2602_s9 + $0xf8] sm:$0xff]  ;;  %v345_v18 = vld [vmem:[%s2753_s22 + $0x10] sm:$0xff]  ;;  %v2792_v3 = vmul.f32 %v336_v11, %v336_v11 }
  0x90   : > { %4026 = vst [vmem:[#allocation31_spill] sm:$0xff] %v2771_v5  ;;  %4027 = vst [vmem:[#allocation32_spill] sm:$0xff] %v2773_v20  ;;  %v346_v48 = vld [vmem:[%s2753_s22 + $0x18] sm:$0xff]  ;;  %v347_v49 = vld [vmem:[%s2753_s22 + $0x20] sm:$0xff]  ;;  %v407_v5 = vmul.f32 %v343_v10, %v343_v10  ;;  %v2790_v20 = vmul.f32 %v335_v6, %v335_v6  ;;  %v409_v11 = vmul.f32 %v345_v18, %v345_v18 }
  0x91   : > { %4028 = vst [vmem:[#allocation33_spill] sm:$0xff] %v2778_v21  ;;  %4029 = vst [vmem:[#allocation34_spill] sm:$0xff] %v2780_v19  ;;  %v348_v54 = vld [vmem:[%s2753_s22 + $0x28] sm:$0xff]  ;;  %v349_v62 = vld [vmem:[%s2753_s22 + $0x30] sm:$0xff]  ;;  %v2797_v19 = vmul.f32 %v337_v17, %v337_v17 }
  0x92   : > { %4030 = vst [vmem:[#allocation35_spill] sm:$0xff] %v2782_v13  ;;  %4031 = vst [vmem:[#allocation36_spill] sm:$0xff] %v2784_v35  ;;  %v350_v63 = vld [vmem:[%s2753_s22 + $0x38] sm:$0xff]  ;;  %v408_v13 = vmul.f32 %v344_v61, %v344_v61  ;;  %v2801_v35 = vmul.f32 1.5, %v478_v40  ;;  %v351_v4 = vld [vmem:[%s2753_s22 + $0x40] sm:$0xff]  ;;  %v410_v40 = vmul.f32 %v346_v48, %v346_v48 }
  0x93   : > { %4032 = vst [vmem:[#allocation37_spill] sm:$0xff] %v2788_v26  ;;  %4033 = vst [vmem:[#allocation38_spill] sm:$0xff] %v2790_v20  ;;  %v352_v6 = vld [vmem:[%s2753_s22 + $0x48] sm:$0xff]  ;;  %v353_v10 = vld [vmem:[%s2753_s22 + $0x50] sm:$0xff]  ;;  %v2808_v20 = vmul.f32 %v340_v34, %v340_v34  ;;  %v2810_v26 = vmul.f32 1.5, %v479_v41  ;;  %v412_v41 = vmul.f32 %v348_v54, %v348_v54 }
  0x94   : > { %4034 = vst [vmem:[#allocation39_spill] sm:$0xff] %v2792_v3  ;;  %4035 = vst [vmem:[#allocation40_spill] sm:$0xff] %v2797_v19  ;;  %v2806_v3 = vmul.f32 %v339_v33, %v339_v33  ;;  %v354_v61 = vld [vmem:[%s2753_s22 + $0x58] sm:$0xff]  ;;  %v355_v28 = vld [vmem:[%s2753_s22 + $0x60] sm:$0xff]  ;;  %v2818_v19 = vmul.f32 1.5, %v481_v55  ;;  %v416_v55 = vmul.f32 %v352_v6, %v352_v6  ;;  %v2830_v21 = vadd.f32 %v408_v13, %v2632_v23 }
  0x95   : > { %4036 = vst [vmem:[#allocation41_spill] sm:$0xff] %v2799_v27  ;;  %4037 = vst [vmem:[#allocation42_spill] sm:$0xff] %v2801_v35  ;;  %v356_v17 = vld [vmem:[%s2753_s22 + $0x68] sm:$0xff]  ;;  %v411_v35 = vmul.f32 %v347_v49, %v347_v49  ;;  %v2816_v27 = vmul.f32 1.5, %v2726_v42  ;;  %v357_v18 = vld [vmem:[%s2753_s22 + $0x70] sm:$0xff]  ;;  %v418_v47 = vmul.f32 %v354_v61, %v354_v61 }
  0x96   : > { %4038 = vst [vmem:[#allocation43_spill] sm:$0xff] %v2806_v3  ;;  %4039 = vst [vmem:[#allocation44_spill] sm:$0xff] %v2808_v20  ;;  %v358_v33 = vld [vmem:[%s2753_s22 + $0x78] sm:$0xff]  ;;  %v359_v34 = vld [vmem:[%s2753_s22 + $0x80] sm:$0xff]  ;;  %v414_v20 = vmul.f32 %v350_v63, %v350_v63  ;;  %v2824_v3 = vadd.f32 %v407_v5, %v2630_v22  ;;  %v419_v22 = vmul.f32 %v355_v28, %v355_v28 }
  0x97   : > { %4040 = vst [vmem:[#allocation45_spill] sm:$0xff] %v2810_v26  ;;  %4041 = vst [vmem:[#allocation46_spill] sm:$0xff] %v2816_v27  ;;  %v413_v26 = vmul.f32 %v349_v62, %v349_v62  ;;  %v360_v48 = vld [vmem:[%s2753_s22 + $0x88] sm:$0xff]  ;;  %v361_v42 = vld [vmem:[%s2753_s22 + $0x90] sm:$0xff]  ;;  %v415_v27 = vmul.f32 %v351_v4, %v351_v4  ;;  %v420_v5 = vmul.f32 %v356_v17, %v356_v17 }
  0x98   : > { %4042 = vst [vmem:[#allocation47_spill] sm:$0xff] %v2818_v19  ;;  %4043 = vst [vmem:[#allocation48_spill] sm:$0xff] %v2824_v3  ;;  %v362_v49 = vld [vmem:[%s2753_s22 + $0x98] sm:$0xff]  ;;  %v417_v19 = vmul.f32 %v353_v10, %v353_v10  ;;  %v363_v54 = vld [vmem:[%s2753_s22 + $0xa0] sm:$0xff]  ;;  %v2836_v3 = vadd.f32 %v409_v11, %v2634_v24  ;;  %v421_v12 = vmul.f32 %v357_v18, %v357_v18 }
  0x99   : > { %4044 = vst [vmem:[#allocation49_spill] sm:$0xff] %v2830_v21  ;;  %v364_v62 = vld [vmem:[%s2753_s22 + $0xa8] sm:$0xff]  ;;  %v365_v63 = vld [vmem:[%s2753_s22 + $0xb0] sm:$0xff]  ;;  %v366_v4 = vld [vmem:[%s2753_s22 + $0xb8] sm:$0xff]  ;;  %v422_v23 = vmul.f32 %v358_v33, %v358_v33  ;;  %v423_v13 = vmul.f32 %v359_v34, %v359_v34  ;;  %v2842_v21 = vadd.f32 %v410_v40, %v2636_v25  ;;  %v424_v28 = vmul.f32 %v360_v48, %v360_v48 }
  0x9a   : > { %4045 = vst [vmem:[#allocation50_spill] sm:$0xff] %v2836_v3  ;;  %v367_v6 = vld [vmem:[%s2753_s22 + $0xc0] sm:$0xff]  ;;  %v368_v10 = vld [vmem:[%s2753_s22 + $0xc8] sm:$0xff]  ;;  %v369_v60 = vld [vmem:[%s2753_s22 + $0xd0] sm:$0xff]  ;;  %v425_v17 = vmul.f32 %v361_v42, %v361_v42  ;;  %v426_v16 = vmul.f32 %v362_v49, %v362_v49  ;;  %v2848_v24 = vadd.f32 %v411_v35, %v2641_v29  ;;  %v427_v14 = vmul.f32 %v363_v54, %v363_v54 }
  0x9b   : > { %4046 = vst [vmem:[#allocation51_spill] sm:$0xff] %v2842_v21  ;;  %v370_v56 = vld [vmem:[%s2753_s22 + $0xd8] sm:$0xff]  ;;  %v371_v61 = vld [vmem:[%s2753_s22 + $0xe0] sm:$0xff]  ;;  %v372_v11 = vld [vmem:[%s2753_s22 + $0xe8] sm:$0xff]  ;;  %v428_v9 = vmul.f32 %v364_v62, %v364_v62  ;;  %v429_v18 = vmul.f32 %v365_v63, %v365_v63  ;;  %v2854_v33 = vadd.f32 %v412_v41, %v2643_v30  ;;  %v430_v25 = vmul.f32 %v366_v4, %v366_v4 }
  0x9c   : > { %4047 = vst [vmem:[#allocation52_spill] sm:$0xff] %v2848_v24  ;;  %v373_v3 = vld [vmem:[%s2753_s22 + $0xf0] sm:$0xff]  ;;  %v374_v15 = vld [vmem:[%s2753_s22 + $0xf8] sm:$0xff]  ;;  %v431_v40 = vmul.f32 %v367_v6, %v367_v6  ;;  %v432_v34 = vmul.f32 %v368_v10, %v368_v10  ;;  %v2857_v21 = vadd.f32 %v413_v26, %v2645_v31  ;;  %v433_v48 = vmul.f32 %v369_v60, %v369_v60  ;;  %v4075_v10 = vld [vmem:[#allocation29_spill] sm:$0xff] }
  0x9d   : > { %v434_v42 = vmul.f32 %v370_v56, %v370_v56  ;;  %v435_v49 = vmul.f32 %v371_v61, %v371_v61  ;;  %v2860_v29 = vadd.f32 %v414_v20, %v2647_v32  ;;  %v436_v35 = vmul.f32 %v372_v11, %v372_v11  ;;  %v4071_v26 = vld [vmem:[#allocation23_spill] sm:$0xff] }
  0x9e   : > { %v437_v24 = vmul.f32 %v373_v3, %v373_v3  ;;  %v438_v54 = vmul.f32 %v374_v15, %v374_v15  ;;  %v2863_v62 = vadd.f32 %v415_v27, %v2652_v36  ;;  %v2866_v30 = vadd.f32 %v416_v55, %v2654_v37  ;;  %v4068_v3 = vld [vmem:[#allocation19_spill] sm:$0xff]  ;;  %v4072_v55 = vld [vmem:[#allocation25_spill] sm:$0xff] }
  0x9f   : > { %v2869_v41 = vadd.f32 %v417_v19, %v2656_v38  ;;  %v2872_v31 = vadd.f32 %v418_v47, %v2658_v39  ;;  %v2875_v56 = vadd.f32 %v419_v22, %v2663_v43  ;;  %v2878_v32 = vadd.f32 %v420_v5, %v2665_v44  ;;  %v4073_v22 = vld [vmem:[#allocation26_spill] sm:$0xff]  ;;  %v4074_v4 = vld [vmem:[#allocation27_spill] sm:$0xff] }
  0xa0   : > { %v2881_v15 = vadd.f32 %v421_v12, %v2667_v45  ;;  %v2884_v36 = vadd.f32 %v422_v23, %v2669_v46  ;;  %v2887_v37 = vadd.f32 %v423_v13, %v2674_v50  ;;  %v2890_v38 = vadd.f32 %v424_v28, %v2676_v51  ;;  %v4069_v12 = vld [vmem:[#allocation21_spill] sm:$0xff]  ;;  %v4076_v13 = vld [vmem:[#allocation30_spill] sm:$0xff]  ;;  %v4077_v28 = vld [vmem:[#allocation31_spill] sm:$0xff] }
  0xa1   : > { %v2893_v39 = vadd.f32 %v425_v17, %v2678_v52  ;;  %v2896_v43 = vadd.f32 %v426_v16, %v2680_v53  ;;  %v2899_v44 = vadd.f32 %v427_v14, %v2685_v57  ;;  %v2902_v45 = vadd.f32 %v428_v9, %v2687_v58  ;;  %v4059_v58 = vld [vmem:[#allocation12_spill] sm:$0xff] }
  0xa2   : > { %4048 = vst [vmem:[#allocation53_spill] sm:$0xff] %v2890_v38  ;;  %v2905_v46 = vadd.f32 %v429_v18, %v2689_v59  ;;  %v2908_v50 = vadd.f32 %v430_v25, %v2694_v0  ;;  %v2911_v51 = vadd.f32 %v431_v40, %v2696_v1  ;;  %v2914_v52 = vadd.f32 %v432_v34, %v2698_v2  ;;  %v4061_v59 = vld [vmem:[#allocation13_spill] sm:$0xff]  ;;  %v4063_v0 = vld [vmem:[#allocation14_spill] sm:$0xff]  ;;  %v4065_v1 = vld [vmem:[#allocation15_spill] sm:$0xff] }
  0xa3   : > { %4049 = vst [vmem:[#allocation54_spill] sm:$0xff] %v2893_v39  ;;  %4050 = vst [vmem:[#allocation55_spill] sm:$0xff] %v2896_v43  ;;  %v2917_v53 = vadd.f32 %v433_v48, %v2703_v7  ;;  %v2920_v57 = vadd.f32 %v434_v42, %v2705_v8  ;;  %v2923_v9 = vadd.f32 %v435_v49, %v4059_v58  ;;  %v4067_v2 = vld [vmem:[#allocation18_spill] sm:$0xff]  ;;  %v515_v7 = vmul.f32 1.5, %v4068_v3  ;;  %v4080_v40 = vld [vmem:[#allocation35_spill] sm:$0xff] }
  0xa4   : > { %4051 = vst [vmem:[#allocation56_spill] sm:$0xff] %v2899_v44  ;;  %4052 = vst [vmem:[#allocation57_spill] sm:$0xff] %v2902_v45  ;;  %v2926_v14 = vadd.f32 %v436_v35, %v4061_v59  ;;  %v2929_v16 = vadd.f32 %v437_v24, %v4063_v0  ;;  %v2932_v47 = vadd.f32 %v438_v54, %v4065_v1  ;;  %v514_v60 = vmul.f32 1.5, %v4067_v2  ;;  %v4070_v8 = vld [vmem:[#allocation22_spill] sm:$0xff]  ;;  %v4078_v24 = vld [vmem:[#allocation33_spill] sm:$0xff] }
  0xa5   : > { %4053 = vst [vmem:[#allocation58_spill] sm:$0xff] %v2905_v46  ;;  %4054 = vst [vmem:[#allocation59_spill] sm:$0xff] %v2908_v50  ;;  %v516_v19 = vmul.f32 1.5, %v4069_v12  ;;  %v517_v20 = vmul.f32 1.5, %v4070_v8  ;;  %v518_v27 = vmul.f32 1.5, %v4071_v26  ;;  %v519_v63 = vmul.f32 1.5, %v4072_v55 }
  0xa6   : > { %4055 = vst [vmem:[#allocation60_spill] sm:$0xff] %v2911_v51  ;;  %4056 = vst [vmem:[#allocation61_spill] sm:$0xff] %v2914_v52  ;;  %v520_v5 = vmul.f32 1.5, %v4073_v22  ;;  %v521_v6 = vmul.f32 1.5, %v4074_v4  ;;  %v522_v23 = vmul.f32 1.5, %v4075_v10  ;;  %v523_v61 = vmul.f32 1.5, %v4076_v13 }
  0xa7   : > { %4057 = vst [vmem:[#allocation62_spill] sm:$0xff] %v2917_v53  ;;  %4058 = vst [vmem:[#allocation63_spill] sm:$0xff] %v2920_v57  ;;  %v524_v17 = vmul.f32 1.5, %v4077_v28  ;;  %v525_v11 = vmul.f32 1.5, %v4078_v24  ;;  %v4079_v18 = vld [vmem:[#allocation34_spill] sm:$0xff]  ;;  %v527_v34 = vmul.f32 1.5, %v4080_v40 }
  0xa8   : > { %4060 = vst [vmem:[#allocation12_spill] sm:$0xff] %v2923_v9  ;;  %4062 = vst [vmem:[#allocation13_spill] sm:$0xff] %v2926_v14  ;;  %v526_v25 = vmul.f32 1.5, %v4079_v18  ;;  %v4081_v48 = vld [vmem:[#allocation37_spill] sm:$0xff]  ;;  %v4082_v49 = vld [vmem:[#allocation38_spill] sm:$0xff]  ;;  %v546_v53 = vadd.f32 0.5, %v514_v60 }
  0xa9   : > { %4064 = vst [vmem:[#allocation14_spill] sm:$0xff] %v2929_v16  ;;  %4066 = vst [vmem:[#allocation15_spill] sm:$0xff] %v2932_v47  ;;  %v528_v42 = vmul.f32 1.5, %v4081_v48  ;;  %v529_v35 = vmul.f32 1.5, %v4082_v49  ;;  %v4083_v54 = vld [vmem:[#allocation39_spill] sm:$0xff]  ;;  %v4084_v59 = vld [vmem:[#allocation40_spill] sm:$0xff] }
  0xaa   : > { %v530_v58 = vmul.f32 1.5, %v4083_v54  ;;  %v531_v0 = vmul.f32 1.5, %v4084_v59  ;;  %v4085_v1 = vld [vmem:[#allocation41_spill] sm:$0xff]  ;;  %v4086_v3 = vld [vmem:[#allocation43_spill] sm:$0xff]  ;;  %v4087_v8 = vld [vmem:[#allocation44_spill] sm:$0xff]  ;;  %v548_v52 = vadd.f32 0.5, %v516_v19 }
  0xab   : > { %v532_v2 = vmul.f32 1.5, %v4085_v1  ;;  %v533_v12 = vmul.f32 1.5, %v4086_v3  ;;  %v534_v26 = vmul.f32 1.5, %v4087_v8  ;;  %v4088_v55 = vld [vmem:[#allocation16_spill] sm:$0xff]  ;;  %v4089_v4 = vld [vmem:[#allocation17_spill] sm:$0xff]  ;;  %v4095_v16 = vld [vmem:[#allocation42_spill] sm:$0xff] }
  0xac   : > { %v535_v22 = vadd.f32 0.5, %v4088_v55  ;;  %v536_v10 = vadd.f32 0.5, %v4089_v4  ;;  %v4090_v13 = vld [vmem:[#allocation20_spill] sm:$0xff]  ;;  %v542_v1 = vadd.f32 0.5, %v4095_v16  ;;  %v4096_v14 = vld [vmem:[#allocation45_spill] sm:$0xff]  ;;  %v4097_v9 = vld [vmem:[#allocation46_spill] sm:$0xff] }
  0xad   : > { %v537_v28 = vadd.f32 0.5, %v4090_v13  ;;  %v4091_v24 = vld [vmem:[#allocation24_spill] sm:$0xff]  ;;  %v543_v3 = vadd.f32 0.5, %v4096_v14  ;;  %v544_v8 = vadd.f32 0.5, %v4097_v9  ;;  %v4098_v57 = vld [vmem:[#allocation47_spill] sm:$0xff]  ;;  %v547_v4 = vadd.f32 0.5, %v515_v7 }
  0xae   : > { %v538_v18 = vadd.f32 0.5, %v4091_v24  ;;  %v4092_v40 = vld [vmem:[#allocation28_spill] sm:$0xff]  ;;  %v545_v55 = vadd.f32 0.5, %v4098_v57  ;;  %v549_v13 = vadd.f32 0.5, %v517_v20  ;;  %v550_v51 = vadd.f32 0.5, %v518_v27  ;;  %v4100_v14 = vld [vmem:[#allocation49_spill] sm:$0xff] }
  0xaf   : > { %v539_v48 = vadd.f32 0.5, %v4092_v40  ;;  %v4093_v49 = vld [vmem:[#allocation32_spill] sm:$0xff]  ;;  %v551_v24 = vadd.f32 0.5, %v519_v63  ;;  %v552_v50 = vadd.f32 0.5, %v520_v5  ;;  %v553_v40 = vadd.f32 0.5, %v521_v6  ;;  %v4101_v9 = vld [vmem:[#allocation50_spill] sm:$0xff] }
  0xb0   : > { %v540_v54 = vadd.f32 0.5, %v4093_v49  ;;  %v4094_v47 = vld [vmem:[#allocation36_spill] sm:$0xff]  ;;  %v554_v46 = vadd.f32 0.5, %v522_v23  ;;  %v555_v49 = vadd.f32 0.5, %v523_v61  ;;  %v556_v45 = vadd.f32 0.5, %v524_v17  ;;  %v4102_v57 = vld [vmem:[#allocation51_spill] sm:$0xff] }
  0xb1   : > { %v541_v59 = vadd.f32 0.5, %v4094_v47  ;;  %v557_v47 = vadd.f32 0.5, %v525_v11  ;;  %v558_v44 = vadd.f32 0.5, %v526_v25  ;;  %v4099_v16 = vld [vmem:[#allocation48_spill] sm:$0xff]  ;;  %v568_v39 = vmul.f32 %v536_v10, %v4100_v14 }
  0xb2   : > { %v567_v43 = vmul.f32 %v535_v22, %v4099_v16  ;;  %v569_v38 = vmul.f32 %v537_v28, %v4101_v9  ;;  %v570_v60 = vmul.f32 %v538_v18, %v4102_v57  ;;  %v4103_v7 = vld [vmem:[#allocation52_spill] sm:$0xff]  ;;  %v572_v20 = vmul.f32 %v540_v54, %v2854_v33  ;;  %v4104_v28 = vld [vmem:[#allocation53_spill] sm:$0xff]  ;;  %v4105_v18 = vld [vmem:[#allocation54_spill] sm:$0xff] }
  0xb3   : > { %v571_v19 = vmul.f32 %v539_v48, %v4103_v7  ;;  %v573_v27 = vmul.f32 %v541_v59, %v2857_v21  ;;  %v574_v63 = vmul.f32 %v542_v1, %v2860_v29  ;;  %v559_v5 = vadd.f32 0.5, %v527_v34  ;;  %v4106_v48 = vld [vmem:[#allocation55_spill] sm:$0xff]  ;;  %v4107_v54 = vld [vmem:[#allocation56_spill] sm:$0xff]  ;;  %v4108_v59 = vld [vmem:[#allocation57_spill] sm:$0xff] }
  0xb4   : > { %v560_v6 = vadd.f32 0.5, %v528_v42  ;;  %v561_v23 = vadd.f32 0.5, %v529_v35  ;;  %v562_v61 = vadd.f32 0.5, %v530_v58  ;;  %v575_v17 = vmul.f32 %v543_v3, %v2863_v62  ;;  %v4109_v3 = vld [vmem:[#allocation58_spill] sm:$0xff]  ;;  %v1872_v16 = vld [vmem:[%s2594_s28 + $0x118] sm:$0xff]  ;;  %v4111_v14 = vld [vmem:[#allocation60_spill] sm:$0xff] }
  0xb5   : > { %v576_v11 = vmul.f32 %v544_v8, %v2866_v30  ;;  %v577_v25 = vmul.f32 %v545_v55, %v2869_v41  ;;  %v578_v22 = vmul.f32 %v546_v53, %v2872_v31  ;;  %v579_v10 = vmul.f32 %v547_v4, %v2875_v56  ;;  %v4110_v55 = vld [vmem:[#allocation59_spill] sm:$0xff]  ;;  %v4112_v9 = vld [vmem:[#allocation61_spill] sm:$0xff] }
  0xb6   : > { %v580_v33 = vmul.f32 %v548_v52, %v2878_v32  ;;  %v581_v21 = vmul.f32 %v549_v13, %v2881_v15  ;;  %v582_v29 = vmul.f32 %v550_v51, %v2884_v36  ;;  %v599_v34 = vadd.f32 %v571_v19, %v567_v43  ;;  %v4114_v7 = vld [vmem:[#allocation63_spill] sm:$0xff] }
  0xb7   : > { %v606_v42 = vadd.f32 %v572_v20, %v568_v39  ;;  %v613_v35 = vadd.f32 %v573_v27, %v569_v38  ;;  %v620_v58 = vadd.f32 %v574_v63, %v570_v60  ;;  %v583_v62 = vmul.f32 %v551_v24, %v2887_v37  ;;  %v1875_v20 = vld [vmem:[%s2594_s28 + $0x130] sm:$0xff]  ;;  %v1876_v27 = vld [vmem:[%s2594_s28 + $0x138] sm:$0xff]  ;;  %v1877_v63 = vld [vmem:[%s2594_s28 + $0x140] sm:$0xff] }
  0xb8   : > { %v584_v30 = vmul.f32 %v552_v50, %v4104_v28  ;;  %v585_v41 = vmul.f32 %v553_v40, %v4105_v18  ;;  %v586_v31 = vmul.f32 %v554_v46, %v4106_v48  ;;  %v600_v53 = vadd.f32 %v599_v34, %v575_v17  ;;  %v4115_v17 = vld [vmem:[#allocation12_spill] sm:$0xff]  ;;  %v1883_v28 = vld [vmem:[%s2594_s28 + $0x170] sm:$0xff] }
  0xb9   : > { %v607_v56 = vadd.f32 %v606_v42, %v576_v11  ;;  %v614_v32 = vadd.f32 %v613_v35, %v577_v25  ;;  %v621_v15 = vadd.f32 %v620_v58, %v578_v22  ;;  %v563_v36 = vadd.f32 0.5, %v531_v0  ;;  %v1869_v0 = vld [vmem:[%s2594_s28 + $0x100] sm:$0xff]  ;;  %v4116_v25 = vld [vmem:[#allocation13_spill] sm:$0xff] }
  0xba   : > { %v564_v43 = vadd.f32 0.5, %v532_v2  ;;  %v565_v39 = vadd.f32 0.5, %v533_v12  ;;  %v566_v38 = vadd.f32 0.5, %v534_v26  ;;  %v601_v51 = vadd.f32 %v600_v53, %v579_v10  ;;  %v1870_v2 = vld [vmem:[%s2594_s28 + $0x108] sm:$0xff]  ;;  %v1871_v12 = vld [vmem:[%s2594_s28 + $0x110] sm:$0xff]  ;;  %v1881_v58 = vld [vmem:[%s2594_s28 + $0x160] sm:$0xff] }
  0xbb   : > { %v608_v37 = vadd.f32 %v607_v56, %v580_v33  ;;  %v615_v50 = vadd.f32 %v614_v32, %v581_v21  ;;  %v622_v52 = vadd.f32 %v621_v15, %v582_v29  ;;  %v587_v46 = vmul.f32 %v555_v49, %v4107_v54  ;;  %v1873_v49 = vld [vmem:[%s2594_s28 + $0x120] sm:$0xff]  ;;  %v1879_v33 = vld [vmem:[%s2594_s28 + $0x150] sm:$0xff]  ;;  %v1880_v21 = vld [vmem:[%s2594_s28 + $0x158] sm:$0xff] }
  0xbc   : > { %v588_v1 = vmul.f32 %v556_v45, %v4108_v59  ;;  %v589_v8 = vmul.f32 %v557_v47, %v4109_v3  ;;  %v590_v4 = vmul.f32 %v558_v44, %v4110_v55  ;;  %v602_v26 = vadd.f32 %v601_v51, %v583_v62  ;;  %v1874_v45 = vld [vmem:[%s2594_s28 + $0x128] sm:$0xff]  ;;  %v4113_v44 = vld [vmem:[#allocation62_spill] sm:$0xff]  ;;  %v1885_v18 = vld [vmem:[%s2594_s28 + $0x180] sm:$0xff] }
  0xbd   : > { %v609_v13 = vadd.f32 %v608_v37, %v584_v30  ;;  %v616_v24 = vadd.f32 %v615_v50, %v585_v41  ;;  %v623_v40 = vadd.f32 %v622_v52, %v586_v31  ;;  %v591_v47 = vmul.f32 %v559_v5, %v4111_v14  ;;  %v1882_v62 = vld [vmem:[%s2594_s28 + $0x168] sm:$0xff]  ;;  %v1884_v30 = vld [vmem:[%s2594_s28 + $0x178] sm:$0xff]  ;;  %v1887_v32 = vld [vmem:[%s2594_s28 + $0x190] sm:$0xff] }
  0xbe   : > { %v592_v57 = vmul.f32 %v560_v6, %v4112_v9  ;;  %v593_v60 = vmul.f32 %v561_v23, %v4113_v44  ;;  %v594_v19 = vmul.f32 %v562_v61, %v4114_v7  ;;  %v3004_v11 = vmul.f32 %v563_v36, %v4115_v17  ;;  %v4117_v6 = vld [vmem:[#allocation14_spill] sm:$0xff]  ;;  %v4118_v23 = vld [vmem:[#allocation15_spill] sm:$0xff]  ;;  %v1878_v61 = vld [vmem:[%s2594_s28 + $0x148] sm:$0xff] }
  0xbf   : > { %v3007_v5 = vmul.f32 %v564_v43, %v4116_v25  ;;  %v3010_v22 = vmul.f32 %v565_v39, %v4117_v6  ;;  %v3013_v10 = vmul.f32 %v566_v38, %v4118_v23  ;;  %v603_v29 = vadd.f32 %v602_v26, %v587_v46  ;;  %v1886_v41 = vld [vmem:[%s2594_s28 + $0x188] sm:$0xff]  ;;  %v1888_v15 = vld [vmem:[%s2594_s28 + $0x198] sm:$0xff]  ;;  %v1889_v36 = vld [vmem:[%s2594_s28 + $0x1a0] sm:$0xff] }
  0xc0   : > { %v610_v34 = vadd.f32 %v609_v13, %v588_v1  ;;  %v617_v42 = vadd.f32 %v616_v24, %v589_v8  ;;  %v624_v35 = vadd.f32 %v623_v40, %v590_v4  ;;  %v3024_v48 = vmul.f32 %v1869_v0, %v1869_v0  ;;  %v1890_v37 = vld [vmem:[%s2594_s28 + $0x1a8] sm:$0xff]  ;;  %v1891_v50 = vld [vmem:[%s2594_s28 + $0x1b0] sm:$0xff]  ;;  %v1892_v52 = vld [vmem:[%s2594_s28 + $0x1b8] sm:$0xff] }
  0xc1   : > { %v3026_v31 = vmul.f32 %v1870_v2, %v1870_v2  ;;  %v3028_v53 = vmul.f32 %v1871_v12, %v1871_v12  ;;  %v3030_v56 = vmul.f32 %v1872_v16, %v1872_v16  ;;  %v3035_v43 = vmul.f32 %v1873_v49, %v1873_v49  ;;  %v1893_v0 = vld [vmem:[%s2594_s28 + $0x1c0] sm:$0xff]  ;;  %v1894_v2 = vld [vmem:[%s2594_s28 + $0x1c8] sm:$0xff]  ;;  %v1895_v12 = vld [vmem:[%s2594_s28 + $0x1d0] sm:$0xff] }
  0xc2   : > { %v3037_v39 = vmul.f32 %v1874_v45, %v1874_v45  ;;  %v3039_v38 = vmul.f32 %v1875_v20, %v1875_v20  ;;  %v3041_v51 = vmul.f32 %v1876_v27, %v1876_v27  ;;  %v3046_v54 = vmul.f32 %v1877_v63, %v1877_v63  ;;  %v1896_v26 = vld [vmem:[%s2594_s28 + $0x1d8] sm:$0xff]  ;;  %v1897_v13 = vld [vmem:[%s2594_s28 + $0x1e0] sm:$0xff]  ;;  %v1898_v24 = vld [vmem:[%s2594_s28 + $0x1e8] sm:$0xff] }
  0xc3   : > { %v3048_v46 = vmul.f32 %v1878_v61, %v1878_v61  ;;  %v3050_v59 = vmul.f32 %v1879_v33, %v1879_v33  ;;  %v3052_v1 = vmul.f32 %v1880_v21, %v1880_v21  ;;  %v604_v3 = vadd.f32 %v603_v29, %v591_v47  ;;  %v1899_v40 = vld [vmem:[%s2594_s28 + $0x1f0] sm:$0xff]  ;;  %v1900_v16 = vld [vmem:[%s2594_s28 + $0x1f8] sm:$0xff]  ;;  %v1933_v9 = vld [vmem:[%s2753_s22 + $0x100] sm:$0xff] }
  0xc4   : > { %v611_v8 = vadd.f32 %v610_v34, %v592_v57  ;;  %v618_v55 = vadd.f32 %v617_v42, %v593_v60  ;;  %v625_v4 = vadd.f32 %v624_v35, %v594_v19  ;;  %v3062_v49 = vmul.f32 %v1881_v58, %v1881_v58  ;;  %v1934_v57 = vld [vmem:[%s2753_s22 + $0x108] sm:$0xff]  ;;  %v1935_v44 = vld [vmem:[%s2753_s22 + $0x110] sm:$0xff]  ;;  %v1936_v60 = vld [vmem:[%s2753_s22 + $0x118] sm:$0xff] }
  0xc5   : > { %v3064_v45 = vmul.f32 %v1882_v62, %v1882_v62  ;;  %v3066_v14 = vmul.f32 %v1883_v28, %v1883_v28  ;;  %v3068_v47 = vmul.f32 %v1884_v30, %v1884_v30  ;;  %v3074_v7 = vmul.f32 %v1885_v18, %v1885_v18  ;;  %v1937_v63 = vld [vmem:[%s2753_s22 + $0x120] sm:$0xff]  ;;  %v1938_v17 = vld [vmem:[%s2753_s22 + $0x128] sm:$0xff]  ;;  %v1939_v25 = vld [vmem:[%s2753_s22 + $0x130] sm:$0xff] }
  0xc6   : > { %v3076_v19 = vmul.f32 %v1886_v41, %v1886_v41  ;;  %v3078_v20 = vmul.f32 %v1887_v32, %v1887_v32  ;;  %v3080_v27 = vmul.f32 %v1888_v15, %v1888_v15  ;;  %v1940_v6 = vld [vmem:[%s2753_s22 + $0x138] sm:$0xff]  ;;  %v3086_v23 = vmul.f32 %v1889_v36, %v1889_v36  ;;  %v1941_v58 = vld [vmem:[%s2753_s22 + $0x140] sm:$0xff]  ;;  %v1942_v62 = vld [vmem:[%s2753_s22 + $0x148] sm:$0xff] }
  0xc7   : > { %4119 = vst [vmem:[#allocation18_spill] sm:$0xff] %v3068_v47  ;;  %4120 = vst [vmem:[#allocation19_spill] sm:$0xff] %v3074_v7  ;;  %v3088_v61 = vmul.f32 %v1890_v37, %v1890_v37  ;;  %v3090_v33 = vmul.f32 %v1891_v50, %v1891_v50  ;;  %v3092_v21 = vmul.f32 %v1892_v52, %v1892_v52  ;;  %v1943_v28 = vld [vmem:[%s2753_s22 + $0x150] sm:$0xff]  ;;  %v1944_v30 = vld [vmem:[%s2753_s22 + $0x158] sm:$0xff] }
  0xc8   : > { %4121 = vst [vmem:[#allocation21_spill] sm:$0xff] %v3076_v19  ;;  %4122 = vst [vmem:[#allocation22_spill] sm:$0xff] %v3078_v20  ;;  %v3095_v29 = vadd.f32 %v604_v3, %v3004_v11  ;;  %v3098_v34 = vadd.f32 %v611_v8, %v3007_v5  ;;  %v3101_v42 = vadd.f32 %v618_v55, %v3010_v22  ;;  %v1945_v18 = vld [vmem:[%s2753_s22 + $0x160] sm:$0xff]  ;;  %v1946_v11 = vld [vmem:[%s2753_s22 + $0x168] sm:$0xff] }
  0xc9   : > { %4123 = vst [vmem:[#allocation23_spill] sm:$0xff] %v3080_v27  ;;  %4124 = vst [vmem:[#allocation25_spill] sm:$0xff] %v3086_v23  ;;  %v3104_v35 = vadd.f32 %v625_v4, %v3013_v10  ;;  %v3112_v41 = vmul.f32 %v1893_v0, %v1893_v0  ;;  %v3114_v32 = vmul.f32 %v1894_v2, %v1894_v2  ;;  %v1947_v10 = vld [vmem:[%s2753_s22 + $0x170] sm:$0xff]  ;;  %v1948_v15 = vld [vmem:[%s2753_s22 + $0x178] sm:$0xff] }
  0xca   : > { %4125 = vst [vmem:[#allocation26_spill] sm:$0xff] %v3088_v61  ;;  %4126 = vst [vmem:[#allocation27_spill] sm:$0xff] %v3090_v33  ;;  %v3116_v5 = vmul.f32 %v1895_v12, %v1895_v12  ;;  %v3118_v22 = vmul.f32 %v1896_v26, %v1896_v26  ;;  %v1949_v36 = vld [vmem:[%s2753_s22 + $0x180] sm:$0xff]  ;;  %v3123_v37 = vmul.f32 %v1897_v13, %v1897_v13  ;;  %v1950_v8 = vld [vmem:[%s2753_s22 + $0x188] sm:$0xff] }
  0xcb   : > { %4127 = vst [vmem:[#allocation29_spill] sm:$0xff] %v3092_v21  ;;  %4128 = vst [vmem:[#allocation30_spill] sm:$0xff] %v3095_v29  ;;  %v3125_v50 = vmul.f32 %v1898_v24, %v1898_v24  ;;  %v3127_v52 = vmul.f32 %v1899_v40, %v1899_v40  ;;  %v3129_v3 = vmul.f32 %v1900_v16, %v1900_v16  ;;  %v1951_v55 = vld [vmem:[%s2753_s22 + $0x190] sm:$0xff]  ;;  %v1952_v4 = vld [vmem:[%s2753_s22 + $0x198] sm:$0xff] }
  0xcc   : > { %4129 = vst [vmem:[#allocation31_spill] sm:$0xff] %v3098_v34  ;;  %4130 = vst [vmem:[#allocation33_spill] sm:$0xff] %v3101_v42  ;;  %v766_v0 = vmul.f32 %v1933_v9, %v1933_v9  ;;  %v767_v2 = vmul.f32 %v1934_v57, %v1934_v57  ;;  %v768_v12 = vmul.f32 %v1935_v44, %v1935_v44  ;;  %v1953_v13 = vld [vmem:[%s2753_s22 + $0x1a0] sm:$0xff]  ;;  %v1954_v24 = vld [vmem:[%s2753_s22 + $0x1a8] sm:$0xff] }
  0xcd   : > { %4131 = vst [vmem:[#allocation34_spill] sm:$0xff] %v3104_v35  ;;  %4132 = vst [vmem:[#allocation35_spill] sm:$0xff] %v3112_v41  ;;  %v769_v26 = vmul.f32 %v1936_v60, %v1936_v60  ;;  %v1955_v35 = vld [vmem:[%s2753_s22 + $0x1b0] sm:$0xff]  ;;  %v770_v40 = vmul.f32 %v1937_v63, %v1937_v63  ;;  %v771_v42 = vmul.f32 %v1938_v17, %v1938_v17  ;;  %v1956_v29 = vld [vmem:[%s2753_s22 + $0x1b8] sm:$0xff] }
  0xce   : > { %4133 = vst [vmem:[#allocation37_spill] sm:$0xff] %v3114_v32  ;;  %4134 = vst [vmem:[#allocation38_spill] sm:$0xff] %v3116_v5  ;;  %v772_v34 = vmul.f32 %v1939_v25, %v1939_v25  ;;  %v773_v16 = vmul.f32 %v1940_v6, %v1940_v6  ;;  %v774_v9 = vmul.f32 %v1941_v58, %v1941_v58  ;;  %v1959_v60 = vld [vmem:[%s2753_s22 + $0x1d0] sm:$0xff]  ;;  %v1962_v17 = vld [vmem:[%s2753_s22 + $0x1e8] sm:$0xff] }
  0xcf   : > { %4135 = vst [vmem:[#allocation39_spill] sm:$0xff] %v3118_v22  ;;  %4136 = vst [vmem:[#allocation40_spill] sm:$0xff] %v3123_v37  ;;  %v775_v57 = vmul.f32 %v1942_v62, %v1942_v62  ;;  %v776_v44 = vmul.f32 %v1943_v28, %v1943_v28  ;;  %v1960_v37 = vld [vmem:[%s2753_s22 + $0x1d8] sm:$0xff]  ;;  %v1961_v22 = vld [vmem:[%s2753_s22 + $0x1e0] sm:$0xff]  ;;  %v778_v5 = vmul.f32 %v1945_v18, %v1945_v18 }
  0xd0   : > { %4137 = vst [vmem:[#allocation41_spill] sm:$0xff] %v3125_v50  ;;  %4138 = vst [vmem:[#allocation43_spill] sm:$0xff] %v3127_v52  ;;  %v1958_v52 = vld [vmem:[%s2753_s22 + $0x1c8] sm:$0xff]  ;;  %v777_v50 = vmul.f32 %v1944_v30, %v1944_v30  ;;  %v779_v32 = vmul.f32 %v1946_v11, %v1946_v11  ;;  %v780_v41 = vmul.f32 %v1947_v10, %v1947_v10  ;;  %v1963_v25 = vld [vmem:[%s2753_s22 + $0x1f0] sm:$0xff] }
  0xd1   : > { %4139 = vst [vmem:[#allocation44_spill] sm:$0xff] %v3129_v3  ;;  %v1957_v3 = vld [vmem:[%s2753_s22 + $0x1c0] sm:$0xff]  ;;  %v781_v63 = vmul.f32 %v1948_v15, %v1948_v15  ;;  %v1964_v21 = vld [vmem:[%s2753_s22 + $0x1f8] sm:$0xff]  ;;  %v782_v6 = vmul.f32 %v1949_v36, %v1949_v36  ;;  %v783_v33 = vmul.f32 %v1950_v8, %v1950_v8  ;;  %v784_v61 = vmul.f32 %v1951_v55, %v1951_v55 }
  0xd2   : > { %v785_v23 = vmul.f32 %v1952_v4, %v1952_v4  ;;  %v786_v27 = vmul.f32 %v1953_v13, %v1953_v13  ;;  %v787_v20 = vmul.f32 %v1954_v24, %v1954_v24  ;;  %v788_v58 = vmul.f32 %v1955_v35, %v1955_v35  ;;  %v1908_v8 = vld [vmem:[%s2602_s9 + $0x138] sm:$0xff]  ;;  %v4155_v24 = vld [vmem:[#allocation26_spill] sm:$0xff] }
  0xd3   : > { %v789_v62 = vmul.f32 %v1956_v29, %v1956_v29  ;;  %v790_v28 = vmul.f32 %v1957_v3, %v1957_v3  ;;  %v791_v30 = vmul.f32 %v1958_v52, %v1958_v52  ;;  %v792_v19 = vmul.f32 %v1959_v60, %v1959_v60  ;;  %v1907_v3 = vld [vmem:[%s2602_s9 + $0x130] sm:$0xff]  ;;  %v4145_v55 = vld [vmem:[#allocation19_spill] sm:$0xff] }
  0xd4   : > { %v793_v7 = vmul.f32 %v1960_v37, %v1960_v37  ;;  %v794_v47 = vmul.f32 %v1961_v22, %v1961_v22  ;;  %v795_v18 = vmul.f32 %v1962_v17, %v1962_v17  ;;  %v796_v11 = vmul.f32 %v1963_v25, %v1963_v25  ;;  %v4161_v60 = vld [vmem:[#allocation35_spill] sm:$0xff] }
  0xd5   : > { %v797_v10 = vmul.f32 %v1964_v21, %v1964_v21  ;;  %v3147_v15 = vadd.f32 %v766_v0, %v3024_v48  ;;  %v3150_v36 = vadd.f32 %v767_v2, %v3026_v31  ;;  %v3153_v29 = vadd.f32 %v768_v12, %v3028_v53  ;;  %v1901_v21 = vld [vmem:[%s2602_s9 + $0x100] sm:$0xff]  ;;  %v1910_v2 = vld [vmem:[%s2602_s9 + $0x148] sm:$0xff]  ;;  %v1911_v12 = vld [vmem:[%s2602_s9 + $0x150] sm:$0xff] }
  0xd6   : > { %v3156_v35 = vadd.f32 %v769_v26, %v3030_v56  ;;  %v3159_v22 = vadd.f32 %v770_v40, %v3035_v43  ;;  %v3162_v37 = vadd.f32 %v771_v42, %v3037_v39  ;;  %v3165_v48 = vadd.f32 %v772_v34, %v3039_v38  ;;  %v1902_v38 = vld [vmem:[%s2602_s9 + $0x108] sm:$0xff]  ;;  %v1903_v34 = vld [vmem:[%s2602_s9 + $0x110] sm:$0xff]  ;;  %v1909_v0 = vld [vmem:[%s2602_s9 + $0x140] sm:$0xff] }
  0xd7   : > { %v3168_v31 = vadd.f32 %v773_v16, %v3041_v51  ;;  %v3171_v53 = vadd.f32 %v774_v9, %v3046_v54  ;;  %v3174_v56 = vadd.f32 %v775_v57, %v3048_v46  ;;  %v3177_v43 = vadd.f32 %v776_v44, %v3050_v59  ;;  %v1904_v51 = vld [vmem:[%s2602_s9 + $0x118] sm:$0xff]  ;;  %v4143_v59 = vld [vmem:[#allocation18_spill] sm:$0xff]  ;;  %v4153_v26 = vld [vmem:[#allocation25_spill] sm:$0xff] }
  0xd8   : > { %v3180_v39 = vadd.f32 %v777_v50, %v3052_v1  ;;  %v3187_v42 = vadd.f32 %v778_v5, %v3062_v49  ;;  %v3190_v54 = vadd.f32 %v779_v32, %v3064_v45  ;;  %v3193_v46 = vadd.f32 %v780_v41, %v3066_v14  ;;  %v1905_v1 = vld [vmem:[%s2602_s9 + $0x120] sm:$0xff]  ;;  %v1906_v50 = vld [vmem:[%s2602_s9 + $0x128] sm:$0xff]  ;;  %v4149_v45 = vld [vmem:[#allocation22_spill] sm:$0xff] }
  0xd9   : > { %v3196_v52 = vadd.f32 %v781_v63, %v4143_v59  ;;  %v3203_v4 = vadd.f32 %v782_v6, %v4145_v55  ;;  %v4147_v49 = vld [vmem:[#allocation21_spill] sm:$0xff]  ;;  %v3209_v32 = vadd.f32 %v784_v61, %v4149_v45  ;;  %v4151_v14 = vld [vmem:[#allocation23_spill] sm:$0xff]  ;;  %v3218_v13 = vadd.f32 %v786_v27, %v4153_v26  ;;  %v1913_v57 = vld [vmem:[%s2602_s9 + $0x160] sm:$0xff] }
  0xda   : > { %4140 = vst [vmem:[#allocation16_spill] sm:$0xff] %v3187_v42  ;;  %4141 = vst [vmem:[#allocation17_spill] sm:$0xff] %v3190_v54  ;;  %v3206_v5 = vadd.f32 %v783_v33, %v4147_v49  ;;  %v3212_v41 = vadd.f32 %v785_v23, %v4151_v14  ;;  %v3221_v40 = vadd.f32 %v787_v20, %v4155_v24  ;;  %v4157_v33 = vld [vmem:[#allocation27_spill] sm:$0xff]  ;;  %v4159_v61 = vld [vmem:[#allocation29_spill] sm:$0xff] }
  0xdb   : > { %4142 = vst [vmem:[#allocation20_spill] sm:$0xff] %v3193_v46  ;;  %4144 = vst [vmem:[#allocation24_spill] sm:$0xff] %v3196_v52  ;;  %v3224_v16 = vadd.f32 %v788_v58, %v4157_v33  ;;  %v3227_v9 = vadd.f32 %v789_v62, %v4159_v61  ;;  %v1912_v23 = vld [vmem:[%s2602_s9 + $0x158] sm:$0xff]  ;;  %v1914_v44 = vld [vmem:[%s2602_s9 + $0x168] sm:$0xff]  ;;  %v3233_v63 = vadd.f32 %v790_v28, %v4161_v60 }
  0xdc   : > { %4146 = vst [vmem:[#allocation28_spill] sm:$0xff] %v3203_v4  ;;  %4148 = vst [vmem:[#allocation32_spill] sm:$0xff] %v3206_v5  ;;  %v4163_v27 = vld [vmem:[#allocation37_spill] sm:$0xff]  ;;  %v4165_v20 = vld [vmem:[#allocation38_spill] sm:$0xff]  ;;  %v830_v60 = vmul.f32 %v1901_v21, %v1901_v21  ;;  %v838_v21 = vmul.f32 %v1909_v0, %v1909_v0 }
  0xdd   : > { %4150 = vst [vmem:[#allocation36_spill] sm:$0xff] %v3209_v32  ;;  %4152 = vst [vmem:[#allocation42_spill] sm:$0xff] %v3212_v41  ;;  %v3236_v17 = vadd.f32 %v791_v30, %v4163_v27  ;;  %v3239_v25 = vadd.f32 %v792_v19, %v4165_v20  ;;  %v4167_v6 = vld [vmem:[#allocation39_spill] sm:$0xff]  ;;  %v1915_v62 = vld [vmem:[%s2602_s9 + $0x170] sm:$0xff]  ;;  %v831_v27 = vmul.f32 %v1902_v38, %v1902_v38 }
  0xde   : > { %4154 = vst [vmem:[#allocation45_spill] sm:$0xff] %v3218_v13  ;;  %4156 = vst [vmem:[#allocation46_spill] sm:$0xff] %v3221_v40  ;;  %v3242_v58 = vadd.f32 %v793_v7, %v4167_v6  ;;  %v1916_v59 = vld [vmem:[%s2602_s9 + $0x178] sm:$0xff]  ;;  %v1917_v55 = vld [vmem:[%s2602_s9 + $0x180] sm:$0xff]  ;;  %v832_v20 = vmul.f32 %v1903_v34, %v1903_v34  ;;  %v839_v38 = vmul.f32 %v1910_v2, %v1910_v2 }
  0xdf   : > { %4158 = vst [vmem:[#allocation47_spill] sm:$0xff] %v3224_v16  ;;  %4160 = vst [vmem:[#allocation48_spill] sm:$0xff] %v3227_v9  ;;  %v4169_v49 = vld [vmem:[#allocation40_spill] sm:$0xff]  ;;  %v4171_v28 = vld [vmem:[#allocation41_spill] sm:$0xff]  ;;  %v840_v34 = vmul.f32 %v1911_v12, %v1911_v12  ;;  %v863_v46 = vmul.f32 1.5, %v831_v27 }
  0xe0   : > { %4162 = vst [vmem:[#allocation49_spill] sm:$0xff] %v3233_v63  ;;  %4164 = vst [vmem:[#allocation50_spill] sm:$0xff] %v3236_v17  ;;  %v3248_v45 = vadd.f32 %v794_v47, %v4169_v49  ;;  %v3251_v14 = vadd.f32 %v795_v18, %v4171_v28  ;;  %v4173_v30 = vld [vmem:[#allocation43_spill] sm:$0xff]  ;;  %v4175_v19 = vld [vmem:[#allocation44_spill] sm:$0xff]  ;;  %v833_v47 = vmul.f32 %v1904_v51, %v1904_v51  ;;  %v864_v54 = vmul.f32 1.5, %v832_v20 }
  0xe1   : > { %4166 = vst [vmem:[#allocation51_spill] sm:$0xff] %v3239_v25  ;;  %4168 = vst [vmem:[#allocation52_spill] sm:$0xff] %v3242_v58  ;;  %v3254_v26 = vadd.f32 %v796_v11, %v4173_v30  ;;  %v3257_v24 = vadd.f32 %v797_v10, %v4175_v19  ;;  %v1918_v7 = vld [vmem:[%s2602_s9 + $0x188] sm:$0xff]  ;;  %v1919_v33 = vld [vmem:[%s2602_s9 + $0x190] sm:$0xff]  ;;  %v834_v49 = vmul.f32 %v1905_v1, %v1905_v1 }
  0xe2   : > { %4170 = vst [vmem:[#allocation53_spill] sm:$0xff] %v3248_v45  ;;  %4172 = vst [vmem:[#allocation54_spill] sm:$0xff] %v3251_v14  ;;  %v1920_v61 = vld [vmem:[%s2602_s9 + $0x198] sm:$0xff]  ;;  %v1921_v18 = vld [vmem:[%s2602_s9 + $0x1a0] sm:$0xff]  ;;  %v835_v28 = vmul.f32 %v1906_v50, %v1906_v50  ;;  %v836_v30 = vmul.f32 %v1907_v3, %v1907_v3  ;;  %v837_v10 = vmul.f32 %v1908_v8, %v1908_v8  ;;  %v865_v42 = vmul.f32 1.5, %v833_v47 }
  0xe3   : > { %4174 = vst [vmem:[#allocation55_spill] sm:$0xff] %v3254_v26  ;;  %4176 = vst [vmem:[#allocation56_spill] sm:$0xff] %v3257_v24  ;;  %v1922_v6 = vld [vmem:[%s2602_s9 + $0x1a8] sm:$0xff]  ;;  %v1923_v11 = vld [vmem:[%s2602_s9 + $0x1b0] sm:$0xff]  ;;  %v841_v14 = vmul.f32 %v1912_v23, %v1912_v23  ;;  %v842_v25 = vmul.f32 %v1913_v57, %v1913_v57  ;;  %v843_v17 = vmul.f32 %v1914_v44, %v1914_v44 }
  0xe4   : > { %v1924_v19 = vld [vmem:[%s2602_s9 + $0x1b8] sm:$0xff]  ;;  %v1925_v24 = vld [vmem:[%s2602_s9 + $0x1c0] sm:$0xff]  ;;  %v1926_v26 = vld [vmem:[%s2602_s9 + $0x1c8] sm:$0xff]  ;;  %v844_v63 = vmul.f32 %v1915_v62, %v1915_v62  ;;  %v845_v1 = vmul.f32 %v1916_v59, %v1916_v59  ;;  %v846_v8 = vmul.f32 %v1917_v55, %v1917_v55  ;;  %v847_v16 = vmul.f32 %v1918_v7, %v1918_v7 }
  0xe5   : > { %v1927_v51 = vld [vmem:[%s2602_s9 + $0x1d0] sm:$0xff]  ;;  %v1928_v45 = vld [vmem:[%s2602_s9 + $0x1d8] sm:$0xff]  ;;  %v1929_v58 = vld [vmem:[%s2602_s9 + $0x1e0] sm:$0xff]  ;;  %v848_v40 = vmul.f32 %v1919_v33, %v1919_v33  ;;  %v849_v13 = vmul.f32 %v1920_v61, %v1920_v61  ;;  %v850_v41 = vmul.f32 %v1921_v18, %v1921_v18  ;;  %v851_v32 = vmul.f32 %v1922_v6, %v1922_v6 }
  0xe6   : > { %v1930_v50 = vld [vmem:[%s2602_s9 + $0x1e8] sm:$0xff]  ;;  %v1931_v3 = vld [vmem:[%s2602_s9 + $0x1f0] sm:$0xff]  ;;  %v1932_v9 = vld [vmem:[%s2602_s9 + $0x1f8] sm:$0xff]  ;;  %v852_v0 = vmul.f32 %v1923_v11, %v1923_v11  ;;  %v853_v2 = vmul.f32 %v1924_v19, %v1924_v19  ;;  %v854_v12 = vmul.f32 %v1925_v24, %v1925_v24  ;;  %v855_v23 = vmul.f32 %v1926_v26, %v1926_v26 }
  0xe7   : > { %v856_v5 = vmul.f32 %v1927_v51, %v1927_v51  ;;  %v857_v4 = vmul.f32 %v1928_v45, %v1928_v45  ;;  %v858_v52 = vmul.f32 %v1929_v58, %v1929_v58  ;;  %v859_v57 = vmul.f32 %v1930_v50, %v1930_v50 }
  0xe8   : > { %v860_v44 = vmul.f32 %v1931_v3, %v1931_v3  ;;  %v861_v62 = vmul.f32 %v1932_v9, %v1932_v9  ;;  %v862_v59 = vmul.f32 1.5, %v830_v60  ;;  %v866_v55 = vmul.f32 1.5, %v834_v49 }
  0xe9   : > { %v867_v7 = vmul.f32 1.5, %v835_v28  ;;  %v868_v33 = vmul.f32 1.5, %v836_v30  ;;  %v869_v61 = vmul.f32 1.5, %v837_v10  ;;  %v870_v18 = vmul.f32 1.5, %v838_v21 }
  0xea   : > { %v871_v6 = vmul.f32 1.5, %v839_v38  ;;  %v872_v11 = vmul.f32 1.5, %v840_v34  ;;  %v873_v19 = vmul.f32 1.5, %v841_v14  ;;  %v874_v24 = vmul.f32 1.5, %v842_v25 }
  0xeb   : > { %v875_v26 = vmul.f32 1.5, %v843_v17  ;;  %v876_v51 = vmul.f32 1.5, %v844_v63  ;;  %v877_v45 = vmul.f32 1.5, %v845_v1  ;;  %v878_v58 = vmul.f32 1.5, %v846_v8 }
  0xec   : > { %v879_v50 = vmul.f32 1.5, %v847_v16  ;;  %v880_v3 = vmul.f32 1.5, %v848_v40  ;;  %v881_v9 = vmul.f32 1.5, %v849_v13  ;;  %v882_v60 = vmul.f32 1.5, %v850_v41 }
  0xed   : > { %v883_v27 = vmul.f32 1.5, %v851_v32  ;;  %v884_v20 = vmul.f32 1.5, %v852_v0  ;;  %v885_v47 = vmul.f32 1.5, %v853_v2  ;;  %v886_v49 = vmul.f32 1.5, %v854_v12 }
  0xee   : > { %v887_v28 = vmul.f32 1.5, %v855_v23  ;;  %v888_v30 = vmul.f32 1.5, %v856_v5  ;;  %v889_v10 = vmul.f32 1.5, %v857_v4  ;;  %v3274_v21 = vmul.f32 1.5, %v858_v52 }
  0xef   : > { %v3276_v38 = vmul.f32 1.5, %v859_v57  ;;  %v3278_v25 = vmul.f32 1.5, %v860_v44  ;;  %v3280_v63 = vmul.f32 1.5, %v861_v62  ;;  %v894_v17 = vadd.f32 0.5, %v862_v59 }
  0xf0   : > { %v895_v16 = vadd.f32 0.5, %v863_v46  ;;  %v896_v40 = vadd.f32 0.5, %v864_v54  ;;  %v897_v13 = vadd.f32 0.5, %v865_v42  ;;  %v898_v41 = vadd.f32 0.5, %v866_v55 }
  0xf1   : > { %v899_v32 = vadd.f32 0.5, %v867_v7  ;;  %v900_v14 = vadd.f32 0.5, %v868_v33  ;;  %v901_v34 = vadd.f32 0.5, %v869_v61  ;;  %v902_v1 = vadd.f32 0.5, %v870_v18 }
  0xf2   : > { %v903_v8 = vadd.f32 0.5, %v871_v6  ;;  %v904_v5 = vadd.f32 0.5, %v872_v11  ;;  %v905_v4 = vadd.f32 0.5, %v873_v19  ;;  %v906_v52 = vadd.f32 0.5, %v874_v24 }
  0xf3   : > { %v907_v0 = vadd.f32 0.5, %v875_v26  ;;  %v908_v2 = vadd.f32 0.5, %v876_v51  ;;  %v909_v12 = vadd.f32 0.5, %v877_v45  ;;  %v910_v23 = vadd.f32 0.5, %v878_v58  ;;  %v4177_v58 = vld [vmem:[#allocation16_spill] sm:$0xff] }
  0xf4   : > { %v911_v57 = vadd.f32 0.5, %v879_v50  ;;  %v912_v44 = vadd.f32 0.5, %v880_v3  ;;  %v913_v62 = vadd.f32 0.5, %v881_v9  ;;  %v914_v59 = vadd.f32 0.5, %v882_v60  ;;  %v4178_v50 = vld [vmem:[#allocation17_spill] sm:$0xff]  ;;  %v4179_v3 = vld [vmem:[#allocation20_spill] sm:$0xff] }
  0xf5   : > { %v915_v46 = vadd.f32 0.5, %v883_v27  ;;  %v916_v54 = vadd.f32 0.5, %v884_v20  ;;  %v917_v42 = vadd.f32 0.5, %v885_v47  ;;  %v926_v55 = vmul.f32 %v894_v17, %v3147_v15  ;;  %v4180_v9 = vld [vmem:[#allocation24_spill] sm:$0xff] }
  0xf6   : > { %v927_v7 = vmul.f32 %v895_v16, %v3150_v36  ;;  %v928_v33 = vmul.f32 %v896_v40, %v3153_v29  ;;  %v929_v61 = vmul.f32 %v897_v13, %v3156_v35  ;;  %v930_v18 = vmul.f32 %v898_v41, %v3159_v22  ;;  %v4185_v41 = vld [vmem:[#allocation45_spill] sm:$0xff] }
  0xf7   : > { %v931_v6 = vmul.f32 %v899_v32, %v3162_v37  ;;  %v932_v11 = vmul.f32 %v900_v14, %v3165_v48  ;;  %v933_v19 = vmul.f32 %v901_v34, %v3168_v31  ;;  %v918_v24 = vadd.f32 0.5, %v886_v49  ;;  %v4181_v49 = vld [vmem:[#allocation28_spill] sm:$0xff]  ;;  %v4186_v14 = vld [vmem:[#allocation46_spill] sm:$0xff] }
  0xf8   : > { %v919_v26 = vadd.f32 0.5, %v887_v28  ;;  %v920_v51 = vadd.f32 0.5, %v888_v30  ;;  %v921_v45 = vadd.f32 0.5, %v889_v10  ;;  %v934_v15 = vmul.f32 %v902_v1, %v3171_v53  ;;  %v4182_v28 = vld [vmem:[#allocation32_spill] sm:$0xff]  ;;  %v4184_v10 = vld [vmem:[#allocation42_spill] sm:$0xff]  ;;  %v4187_v1 = vld [vmem:[#allocation47_spill] sm:$0xff] }
  0xf9   : > { %v935_v36 = vmul.f32 %v903_v8, %v3174_v56  ;;  %v936_v29 = vmul.f32 %v904_v5, %v3177_v43  ;;  %v937_v35 = vmul.f32 %v905_v4, %v3180_v39  ;;  %v938_v22 = vmul.f32 %v906_v52, %v4177_v58  ;;  %v4183_v30 = vld [vmem:[#allocation36_spill] sm:$0xff] }
  0xfa   : > { %v939_v37 = vmul.f32 %v907_v0, %v4178_v50  ;;  %v940_v48 = vmul.f32 %v908_v2, %v4179_v3  ;;  %v941_v31 = vmul.f32 %v909_v12, %v4180_v9  ;;  %v958_v60 = vadd.f32 %v930_v18, %v926_v55  ;;  %v4188_v5 = vld [vmem:[#allocation48_spill] sm:$0xff]  ;;  %v4193_v3 = vld [vmem:[#allocation53_spill] sm:$0xff] }
  0xfb   : > { %v965_v27 = vadd.f32 %v931_v6, %v927_v7  ;;  %v972_v20 = vadd.f32 %v932_v11, %v928_v33  ;;  %v979_v47 = vadd.f32 %v933_v19, %v929_v61  ;;  %v942_v53 = vmul.f32 %v910_v23, %v4181_v49  ;;  %v1966_v7 = vld [vmem:[%s2594_s28 + $0x208] sm:$0xff]  ;;  %v1967_v33 = vld [vmem:[%s2594_s28 + $0x210] sm:$0xff]  ;;  %v4191_v11 = vld [vmem:[#allocation51_spill] sm:$0xff] }
  0xfc   : > { %v943_v56 = vmul.f32 %v911_v57, %v4182_v28  ;;  %v944_v43 = vmul.f32 %v912_v44, %v4183_v30  ;;  %v945_v39 = vmul.f32 %v913_v62, %v4184_v10  ;;  %v959_v17 = vadd.f32 %v958_v60, %v934_v15  ;;  %v4189_v61 = vld [vmem:[#allocation49_spill] sm:$0xff]  ;;  %v4192_v19 = vld [vmem:[#allocation52_spill] sm:$0xff]  ;;  %v1979_v28 = vld [vmem:[%s2594_s28 + $0x270] sm:$0xff] }
  0xfd   : > { %v966_v16 = vadd.f32 %v965_v27, %v935_v36  ;;  %v973_v40 = vadd.f32 %v972_v20, %v936_v29  ;;  %v980_v13 = vadd.f32 %v979_v47, %v937_v35  ;;  %v946_v32 = vmul.f32 %v914_v59, %v4185_v41  ;;  %v1965_v59 = vld [vmem:[%s2594_s28 + $0x200] sm:$0xff]  ;;  %v1970_v36 = vld [vmem:[%s2594_s28 + $0x228] sm:$0xff]  ;;  %v1971_v29 = vld [vmem:[%s2594_s28 + $0x230] sm:$0xff] }
  0xfe   : > { %v947_v34 = vmul.f32 %v915_v46, %v4186_v14  ;;  %v948_v8 = vmul.f32 %v916_v54, %v4187_v1  ;;  %v949_v4 = vmul.f32 %v917_v42, %v4188_v5  ;;  %v960_v52 = vadd.f32 %v959_v17, %v938_v22  ;;  %v1969_v15 = vld [vmem:[%s2594_s28 + $0x220] sm:$0xff]  ;;  %v1975_v20 = vld [vmem:[%s2594_s28 + $0x250] sm:$0xff]  ;;  %v1976_v47 = vld [vmem:[%s2594_s28 + $0x258] sm:$0xff] }
  0xff   : > { %v967_v0 = vadd.f32 %v966_v16, %v939_v37  ;;  %v974_v2 = vadd.f32 %v973_v40, %v940_v48  ;;  %v981_v12 = vadd.f32 %v980_v13, %v941_v31  ;;  %v922_v23 = vadd.f32 0.5, %v3274_v21  ;;  %v1968_v21 = vld [vmem:[%s2594_s28 + $0x218] sm:$0xff]  ;;  %v1973_v37 = vld [vmem:[%s2594_s28 + $0x240] sm:$0xff]  ;;  %v4194_v48 = vld [vmem:[#allocation54_spill] sm:$0xff] }
 0x100   : > { %v923_v57 = vadd.f32 0.5, %v3276_v38  ;;  %v924_v44 = vadd.f32 0.5, %v3278_v25  ;;  %v925_v62 = vadd.f32 0.5, %v3280_v63  ;;  %v961_v46 = vadd.f32 %v960_v52, %v942_v53  ;;  %v4190_v38 = vld [vmem:[#allocation50_spill] sm:$0xff]  ;;  %v4196_v60 = vld [vmem:[#allocation56_spill] sm:$0xff]  ;;  %v1978_v53 = vld [vmem:[%s2594_s28 + $0x268] sm:$0xff] }
 0x101   : > { %v968_v54 = vadd.f32 %v967_v0, %v943_v56  ;;  %v975_v42 = vadd.f32 %v974_v2, %v944_v43  ;;  %v982_v55 = vadd.f32 %v981_v12, %v945_v39  ;;  %v950_v18 = vmul.f32 %v918_v24, %v4189_v61  ;;  %v1972_v24 = vld [vmem:[%s2594_s28 + $0x238] sm:$0xff]  ;;  %v1977_v49 = vld [vmem:[%s2594_s28 + $0x260] sm:$0xff]  ;;  %v1983_v14 = vld [vmem:[%s2594_s28 + $0x290] sm:$0xff] }
 0x102   : > { %v951_v6 = vmul.f32 %v919_v26, %v4190_v38  ;;  %v952_v25 = vmul.f32 %v920_v51, %v4191_v11  ;;  %v953_v63 = vmul.f32 %v921_v45, %v4192_v19  ;;  %v962_v35 = vadd.f32 %v961_v46, %v946_v32  ;;  %v1974_v26 = vld [vmem:[%s2594_s28 + $0x248] sm:$0xff]  ;;  %v4195_v45 = vld [vmem:[#allocation55_spill] sm:$0xff]  ;;  %v1981_v41 = vld [vmem:[%s2594_s28 + $0x280] sm:$0xff] }
 0x103   : > { %v969_v58 = vadd.f32 %v968_v54, %v947_v34  ;;  %v976_v22 = vadd.f32 %v975_v42, %v948_v8  ;;  %v983_v50 = vadd.f32 %v982_v55, %v949_v4  ;;  %v954_v51 = vmul.f32 %v922_v23, %v4193_v3  ;;  %v1980_v56 = vld [vmem:[%s2594_s28 + $0x278] sm:$0xff]  ;;  %v1982_v32 = vld [vmem:[%s2594_s28 + $0x288] sm:$0xff]  ;;  %v1985_v1 = vld [vmem:[%s2594_s28 + $0x2a0] sm:$0xff] }
 0x104   : > { %v955_v9 = vmul.f32 %v923_v57, %v4194_v48  ;;  %v956_v31 = vmul.f32 %v924_v44, %v4195_v45  ;;  %v957_v27 = vmul.f32 %v925_v62, %v4196_v60  ;;  %v3334_v30 = vmul.f32 %v1965_v59, %v1965_v59  ;;  %v1984_v34 = vld [vmem:[%s2594_s28 + $0x298] sm:$0xff]  ;;  %v1986_v8 = vld [vmem:[%s2594_s28 + $0x2a8] sm:$0xff]  ;;  %v1987_v2 = vld [vmem:[%s2594_s28 + $0x2b0] sm:$0xff] }
 0x105   : > { %v3336_v43 = vmul.f32 %v1966_v7, %v1966_v7  ;;  %v3338_v10 = vmul.f32 %v1967_v33, %v1967_v33  ;;  %v3340_v39 = vmul.f32 %v1968_v21, %v1968_v21  ;;  %v963_v17 = vadd.f32 %v962_v35, %v950_v18  ;;  %v1988_v12 = vld [vmem:[%s2594_s28 + $0x2b8] sm:$0xff]  ;;  %v1989_v23 = vld [vmem:[%s2594_s28 + $0x2c0] sm:$0xff]  ;;  %v1990_v46 = vld [vmem:[%s2594_s28 + $0x2c8] sm:$0xff] }
 0x106   : > { %v970_v16 = vadd.f32 %v969_v58, %v951_v6  ;;  %v977_v40 = vadd.f32 %v976_v22, %v952_v25  ;;  %v984_v13 = vadd.f32 %v983_v50, %v953_v63  ;;  %v3348_v5 = vmul.f32 %v1969_v15, %v1969_v15  ;;  %v1991_v54 = vld [vmem:[%s2594_s28 + $0x2d0] sm:$0xff]  ;;  %v1992_v42 = vld [vmem:[%s2594_s28 + $0x2d8] sm:$0xff]  ;;  %v1993_v11 = vld [vmem:[%s2594_s28 + $0x2e0] sm:$0xff] }
 0x107   : > { %v3350_v4 = vmul.f32 %v1970_v36, %v1970_v36  ;;  %v3352_v52 = vmul.f32 %v1971_v29, %v1971_v29  ;;  %v3354_v0 = vmul.f32 %v1972_v24, %v1972_v24  ;;  %v3359_v57 = vmul.f32 %v1973_v37, %v1973_v37  ;;  %v1994_v25 = vld [vmem:[%s2594_s28 + $0x2e8] sm:$0xff]  ;;  %v1995_v19 = vld [vmem:[%s2594_s28 + $0x2f0] sm:$0xff]  ;;  %v1996_v63 = vld [vmem:[%s2594_s28 + $0x2f8] sm:$0xff] }
 0x108   : > { %v3361_v44 = vmul.f32 %v1974_v26, %v1974_v26  ;;  %v3363_v62 = vmul.f32 %v1975_v20, %v1975_v20  ;;  %v3365_v59 = vmul.f32 %v1976_v47, %v1976_v47  ;;  %v3370_v55 = vmul.f32 %v1977_v49, %v1977_v49  ;;  %v2029_v15 = vld [vmem:[%s2753_s22 + $0x200] sm:$0xff]  ;;  %v2030_v36 = vld [vmem:[%s2753_s22 + $0x208] sm:$0xff]  ;;  %v2031_v29 = vld [vmem:[%s2753_s22 + $0x210] sm:$0xff] }
 0x109   : > { %v3372_v7 = vmul.f32 %v1978_v53, %v1978_v53  ;;  %v3374_v33 = vmul.f32 %v1979_v28, %v1979_v28  ;;  %v3376_v21 = vmul.f32 %v1980_v56, %v1980_v56  ;;  %v964_v61 = vadd.f32 %v963_v17, %v954_v51  ;;  %v2032_v35 = vld [vmem:[%s2753_s22 + $0x218] sm:$0xff]  ;;  %v2033_v37 = vld [vmem:[%s2753_s22 + $0x220] sm:$0xff]  ;;  %v2034_v26 = vld [vmem:[%s2753_s22 + $0x228] sm:$0xff] }
 0x10a   : > { %v971_v18 = vadd.f32 %v970_v16, %v955_v9  ;;  %v978_v38 = vadd.f32 %v977_v40, %v956_v31  ;;  %v985_v6 = vadd.f32 %v984_v13, %v957_v27  ;;  %v3386_v58 = vmul.f32 %v1981_v41, %v1981_v41  ;;  %v2035_v3 = vld [vmem:[%s2753_s22 + $0x230] sm:$0xff]  ;;  %v2036_v51 = vld [vmem:[%s2753_s22 + $0x238] sm:$0xff]  ;;  %v2037_v60 = vld [vmem:[%s2753_s22 + $0x240] sm:$0xff] }
 0x10b   : > { %4197 = vst [vmem:[#allocation57_spill] sm:$0xff] %v3376_v21  ;;  %v3388_v22 = vmul.f32 %v1982_v32, %v1982_v32  ;;  %v3390_v50 = vmul.f32 %v1983_v14, %v1983_v14  ;;  %v3392_v24 = vmul.f32 %v1984_v34, %v1984_v34  ;;  %v3398_v48 = vmul.f32 %v1985_v1, %v1985_v1  ;;  %v2038_v27 = vld [vmem:[%s2753_s22 + $0x248] sm:$0xff]  ;;  %v2039_v20 = vld [vmem:[%s2753_s22 + $0x250] sm:$0xff]  ;;  %v4212_v16 = vld [vmem:[#allocation31_spill] sm:$0xff] }
 0x10c   : > { %4198 = vst [vmem:[#allocation58_spill] sm:$0xff] %v3386_v58  ;;  %v3400_v9 = vmul.f32 %v1986_v8, %v1986_v8  ;;  %v3402_v45 = vmul.f32 %v1987_v2, %v1987_v2  ;;  %v3404_v31 = vmul.f32 %v1988_v12, %v1988_v12  ;;  %v3409_v47 = vmul.f32 %v1989_v23, %v1989_v23  ;;  %v4210_v56 = vld [vmem:[#allocation30_spill] sm:$0xff]  ;;  %v4214_v13 = vld [vmem:[#allocation33_spill] sm:$0xff]  ;;  %v2040_v34 = vld [vmem:[%s2753_s22 + $0x258] sm:$0xff] }
 0x10d   : > { %4199 = vst [vmem:[#allocation59_spill] sm:$0xff] %v3388_v22  ;;  %4200 = vst [vmem:[#allocation60_spill] sm:$0xff] %v3390_v50  ;;  %v3411_v49 = vmul.f32 %v1990_v46, %v1990_v46  ;;  %v3413_v53 = vmul.f32 %v1991_v54, %v1991_v54  ;;  %v3415_v28 = vmul.f32 %v1992_v42, %v1992_v42  ;;  %v4216_v32 = vld [vmem:[#allocation34_spill] sm:$0xff]  ;;  %v2041_v1 = vld [vmem:[%s2753_s22 + $0x260] sm:$0xff] }
 0x10e   : > { %4201 = vst [vmem:[#allocation61_spill] sm:$0xff] %v3392_v24  ;;  %4202 = vst [vmem:[#allocation62_spill] sm:$0xff] %v3398_v48  ;;  %v3418_v17 = vadd.f32 %v964_v61, %v4210_v56  ;;  %v3421_v40 = vadd.f32 %v971_v18, %v4212_v16  ;;  %v3424_v41 = vadd.f32 %v978_v38, %v4214_v13  ;;  %v2042_v8 = vld [vmem:[%s2753_s22 + $0x268] sm:$0xff]  ;;  %v2043_v2 = vld [vmem:[%s2753_s22 + $0x270] sm:$0xff] }
 0x10f   : > { %4203 = vst [vmem:[#allocation63_spill] sm:$0xff] %v3400_v9  ;;  %4204 = vst [vmem:[#allocation12_spill] sm:$0xff] %v3402_v45  ;;  %v3427_v14 = vadd.f32 %v985_v6, %v4216_v32  ;;  %v2044_v12 = vld [vmem:[%s2753_s22 + $0x278] sm:$0xff]  ;;  %v2045_v23 = vld [vmem:[%s2753_s22 + $0x280] sm:$0xff]  ;;  %v3435_v46 = vmul.f32 %v1993_v11, %v1993_v11  ;;  %v3437_v54 = vmul.f32 %v1994_v25, %v1994_v25 }
 0x110   : > { %4205 = vst [vmem:[#allocation13_spill] sm:$0xff] %v3404_v31  ;;  %4206 = vst [vmem:[#allocation14_spill] sm:$0xff] %v3409_v47  ;;  %v3439_v42 = vmul.f32 %v1995_v19, %v1995_v19  ;;  %v3441_v61 = vmul.f32 %v1996_v63, %v1996_v63  ;;  %v2046_v18 = vld [vmem:[%s2753_s22 + $0x288] sm:$0xff]  ;;  %v2047_v38 = vld [vmem:[%s2753_s22 + $0x290] sm:$0xff]  ;;  %v1125_v56 = vmul.f32 %v2029_v15, %v2029_v15 }
 0x111   : > { %4207 = vst [vmem:[#allocation15_spill] sm:$0xff] %v3411_v49  ;;  %4208 = vst [vmem:[#allocation18_spill] sm:$0xff] %v3413_v53  ;;  %v2048_v6 = vld [vmem:[%s2753_s22 + $0x298] sm:$0xff]  ;;  %v1126_v16 = vmul.f32 %v2030_v36, %v2030_v36  ;;  %v1127_v13 = vmul.f32 %v2031_v29, %v2031_v29  ;;  %v1128_v32 = vmul.f32 %v2032_v35, %v2032_v35  ;;  %v2049_v11 = vld [vmem:[%s2753_s22 + $0x2a0] sm:$0xff] }
 0x112   : > { %4209 = vst [vmem:[#allocation19_spill] sm:$0xff] %v3415_v28  ;;  %4211 = vst [vmem:[#allocation21_spill] sm:$0xff] %v3418_v17  ;;  %v2050_v25 = vld [vmem:[%s2753_s22 + $0x2a8] sm:$0xff]  ;;  %v1129_v19 = vmul.f32 %v2033_v37, %v2033_v37  ;;  %v1132_v63 = vmul.f32 %v2036_v51, %v2036_v51  ;;  %v2052_v17 = vld [vmem:[%s2753_s22 + $0x2b8] sm:$0xff]  ;;  %v1133_v15 = vmul.f32 %v2037_v60, %v2037_v60 }
 0x113   : > { %4213 = vst [vmem:[#allocation22_spill] sm:$0xff] %v3421_v40  ;;  %4215 = vst [vmem:[#allocation23_spill] sm:$0xff] %v3424_v41  ;;  %v1130_v41 = vmul.f32 %v2034_v26, %v2034_v26  ;;  %v1131_v40 = vmul.f32 %v2035_v3, %v2035_v3  ;;  %v1134_v36 = vmul.f32 %v2038_v27, %v2038_v27  ;;  %v2055_v35 = vld [vmem:[%s2753_s22 + $0x2d0] sm:$0xff]  ;;  %v2057_v28 = vld [vmem:[%s2753_s22 + $0x2e0] sm:$0xff] }
 0x114   : > { %4217 = vst [vmem:[#allocation25_spill] sm:$0xff] %v3427_v14  ;;  %4218 = vst [vmem:[#allocation26_spill] sm:$0xff] %v3435_v46  ;;  %v2051_v14 = vld [vmem:[%s2753_s22 + $0x2b0] sm:$0xff]  ;;  %v1135_v29 = vmul.f32 %v2039_v20, %v2039_v20  ;;  %v2056_v46 = vld [vmem:[%s2753_s22 + $0x2d8] sm:$0xff]  ;;  %v1137_v53 = vmul.f32 %v2041_v1, %v2041_v1  ;;  %v1138_v49 = vmul.f32 %v2042_v8, %v2042_v8 }
 0x115   : > { %4219 = vst [vmem:[#allocation27_spill] sm:$0xff] %v3437_v54  ;;  %4220 = vst [vmem:[#allocation29_spill] sm:$0xff] %v3439_v42  ;;  %v2054_v42 = vld [vmem:[%s2753_s22 + $0x2c8] sm:$0xff]  ;;  %v1136_v54 = vmul.f32 %v2040_v34, %v2040_v34  ;;  %v1139_v47 = vmul.f32 %v2043_v2, %v2043_v2  ;;  %v1140_v37 = vmul.f32 %v2044_v12, %v2044_v12  ;;  %v2059_v3 = vld [vmem:[%s2753_s22 + $0x2f0] sm:$0xff] }
 0x116   : > { %4221 = vst [vmem:[#allocation35_spill] sm:$0xff] %v3441_v61  ;;  %v2053_v61 = vld [vmem:[%s2753_s22 + $0x2c0] sm:$0xff]  ;;  %v2058_v26 = vld [vmem:[%s2753_s22 + $0x2e8] sm:$0xff]  ;;  %v2060_v31 = vld [vmem:[%s2753_s22 + $0x2f8] sm:$0xff]  ;;  %v1141_v51 = vmul.f32 %v2045_v23, %v2045_v23  ;;  %v1142_v45 = vmul.f32 %v2046_v18, %v2046_v18  ;;  %v1143_v9 = vmul.f32 %v2047_v38, %v2047_v38  ;;  %v1144_v48 = vmul.f32 %v2048_v6, %v2048_v6 }
 0x117   : > { %v1145_v24 = vmul.f32 %v2049_v11, %v2049_v11  ;;  %v1146_v50 = vmul.f32 %v2050_v25, %v2050_v25  ;;  %v1147_v60 = vmul.f32 %v2051_v14, %v2051_v14  ;;  %v1148_v27 = vmul.f32 %v2052_v17, %v2052_v17  ;;  %v2004_v18 = vld [vmem:[%s2602_s9 + $0x238] sm:$0xff]  ;;  %v4227_v38 = vld [vmem:[#allocation58_spill] sm:$0xff] }
 0x118   : > { %v1149_v20 = vmul.f32 %v2053_v61, %v2053_v61  ;;  %v1150_v34 = vmul.f32 %v2054_v42, %v2054_v42  ;;  %v1151_v22 = vmul.f32 %v2055_v35, %v2055_v35  ;;  %v1152_v58 = vmul.f32 %v2056_v46, %v2056_v46  ;;  %v2003_v61 = vld [vmem:[%s2602_s9 + $0x230] sm:$0xff]  ;;  %v4237_v25 = vld [vmem:[#allocation63_spill] sm:$0xff] }
 0x119   : > { %v1153_v21 = vmul.f32 %v2057_v28, %v2057_v28  ;;  %v1154_v1 = vmul.f32 %v2058_v26, %v2058_v26  ;;  %v1155_v8 = vmul.f32 %v2059_v3, %v2059_v3  ;;  %v1156_v2 = vmul.f32 %v2060_v31, %v2060_v31  ;;  %v1997_v31 = vld [vmem:[%s2602_s9 + $0x200] sm:$0xff]  ;;  %v4243_v35 = vld [vmem:[#allocation14_spill] sm:$0xff] }
 0x11a   : > { %v3459_v12 = vadd.f32 %v1125_v56, %v3334_v30  ;;  %v3462_v23 = vadd.f32 %v1126_v16, %v3336_v43  ;;  %v3465_v17 = vadd.f32 %v1127_v13, %v3338_v10  ;;  %v3468_v14 = vadd.f32 %v1128_v32, %v3340_v39  ;;  %v2005_v56 = vld [vmem:[%s2602_s9 + $0x240] sm:$0xff]  ;;  %v2006_v16 = vld [vmem:[%s2602_s9 + $0x248] sm:$0xff]  ;;  %v2007_v13 = vld [vmem:[%s2602_s9 + $0x250] sm:$0xff] }
 0x11b   : > { %v3471_v28 = vadd.f32 %v1129_v19, %v3348_v5  ;;  %v3474_v46 = vadd.f32 %v1130_v41, %v3350_v4  ;;  %v3477_v30 = vadd.f32 %v1131_v40, %v3352_v52  ;;  %v3480_v43 = vadd.f32 %v1132_v63, %v3354_v0  ;;  %v1998_v52 = vld [vmem:[%s2602_s9 + $0x208] sm:$0xff]  ;;  %v1999_v40 = vld [vmem:[%s2602_s9 + $0x210] sm:$0xff]  ;;  %v2000_v0 = vld [vmem:[%s2602_s9 + $0x218] sm:$0xff] }
 0x11c   : > { %v3483_v10 = vadd.f32 %v1133_v15, %v3359_v57  ;;  %v3486_v39 = vadd.f32 %v1134_v36, %v3361_v44  ;;  %v3489_v5 = vadd.f32 %v1135_v29, %v3363_v62  ;;  %v3492_v4 = vadd.f32 %v1136_v54, %v3365_v59  ;;  %v4225_v62 = vld [vmem:[#allocation57_spill] sm:$0xff]  ;;  %v2001_v59 = vld [vmem:[%s2602_s9 + $0x220] sm:$0xff]  ;;  %v4235_v32 = vld [vmem:[#allocation62_spill] sm:$0xff] }
 0x11d   : > { %v3499_v41 = vadd.f32 %v1137_v53, %v3370_v55  ;;  %v3502_v57 = vadd.f32 %v1138_v49, %v3372_v7  ;;  %v3505_v44 = vadd.f32 %v1139_v47, %v3374_v33  ;;  %v3508_v42 = vadd.f32 %v1140_v37, %v4225_v62  ;;  %v2002_v54 = vld [vmem:[%s2602_s9 + $0x228] sm:$0xff]  ;;  %v4229_v55 = vld [vmem:[#allocation59_spill] sm:$0xff]  ;;  %v4231_v7 = vld [vmem:[#allocation60_spill] sm:$0xff] }
 0x11e   : > { %v3515_v6 = vadd.f32 %v1141_v51, %v4227_v38  ;;  %v3518_v53 = vadd.f32 %v1142_v45, %v4229_v55  ;;  %v3521_v49 = vadd.f32 %v1143_v9, %v4231_v7  ;;  %v4233_v33 = vld [vmem:[#allocation61_spill] sm:$0xff]  ;;  %v3530_v11 = vadd.f32 %v1145_v24, %v4235_v32  ;;  %v4239_v45 = vld [vmem:[#allocation12_spill] sm:$0xff]  ;;  %v4245_v24 = vld [vmem:[#allocation15_spill] sm:$0xff] }
 0x11f   : > { %4222 = vst [vmem:[#allocation37_spill] sm:$0xff] %v3499_v41  ;;  %4223 = vst [vmem:[#allocation38_spill] sm:$0xff] %v3502_v57  ;;  %v3524_v47 = vadd.f32 %v1144_v48, %v4233_v33  ;;  %v3533_v19 = vadd.f32 %v1146_v50, %v4237_v25  ;;  %v3536_v63 = vadd.f32 %v1147_v60, %v4239_v45  ;;  %v4241_v9 = vld [vmem:[#allocation13_spill] sm:$0xff]  ;;  %v2008_v48 = vld [vmem:[%s2602_s9 + $0x258] sm:$0xff] }
 0x120   : > { %4224 = vst [vmem:[#allocation39_spill] sm:$0xff] %v3505_v44  ;;  %4226 = vst [vmem:[#allocation40_spill] sm:$0xff] %v3508_v42  ;;  %v3539_v15 = vadd.f32 %v1148_v27, %v4241_v9  ;;  %v2009_v36 = vld [vmem:[%s2602_s9 + $0x260] sm:$0xff]  ;;  %v2010_v29 = vld [vmem:[%s2602_s9 + $0x268] sm:$0xff]  ;;  %v3545_v37 = vadd.f32 %v1149_v20, %v4243_v35  ;;  %v3548_v26 = vadd.f32 %v1150_v34, %v4245_v24 }
 0x121   : > { %4228 = vst [vmem:[#allocation41_spill] sm:$0xff] %v3515_v6  ;;  %4230 = vst [vmem:[#allocation43_spill] sm:$0xff] %v3518_v53  ;;  %v4247_v50 = vld [vmem:[#allocation18_spill] sm:$0xff]  ;;  %v4249_v51 = vld [vmem:[#allocation19_spill] sm:$0xff]  ;;  %v1189_v35 = vmul.f32 %v1997_v31, %v1997_v31  ;;  %v1190_v24 = vmul.f32 %v1998_v52, %v1998_v52  ;;  %v1197_v31 = vmul.f32 %v2005_v56, %v2005_v56 }
 0x122   : > { %4232 = vst [vmem:[#allocation44_spill] sm:$0xff] %v3521_v49  ;;  %4234 = vst [vmem:[#allocation16_spill] sm:$0xff] %v3524_v47  ;;  %v3551_v3 = vadd.f32 %v1151_v22, %v4247_v50  ;;  %v3554_v60 = vadd.f32 %v1152_v58, %v4249_v51  ;;  %v2011_v27 = vld [vmem:[%s2602_s9 + $0x270] sm:$0xff]  ;;  %v2012_v62 = vld [vmem:[%s2602_s9 + $0x278] sm:$0xff]  ;;  %v1191_v50 = vmul.f32 %v1999_v40, %v1999_v40 }
 0x123   : > { %4236 = vst [vmem:[#allocation17_spill] sm:$0xff] %v3530_v11  ;;  %4238 = vst [vmem:[#allocation20_spill] sm:$0xff] %v3533_v19  ;;  %v2013_v38 = vld [vmem:[%s2602_s9 + $0x280] sm:$0xff]  ;;  %v4251_v55 = vld [vmem:[#allocation26_spill] sm:$0xff]  ;;  %v1198_v52 = vmul.f32 %v2006_v16, %v2006_v16  ;;  %v1199_v40 = vmul.f32 %v2007_v13, %v2007_v13  ;;  %v1222_v44 = vmul.f32 1.5, %v1190_v24 }
 0x124   : > { %4240 = vst [vmem:[#allocation24_spill] sm:$0xff] %v3536_v63  ;;  %4242 = vst [vmem:[#allocation28_spill] sm:$0xff] %v3539_v15  ;;  %v3560_v7 = vadd.f32 %v1153_v21, %v4251_v55  ;;  %v4253_v20 = vld [vmem:[#allocation27_spill] sm:$0xff]  ;;  %v4255_v34 = vld [vmem:[#allocation29_spill] sm:$0xff]  ;;  %v1192_v21 = vmul.f32 %v2000_v0, %v2000_v0  ;;  %v1193_v55 = vmul.f32 %v2001_v59, %v2001_v59  ;;  %v1223_v57 = vmul.f32 1.5, %v1191_v50 }
 0x125   : > { %4244 = vst [vmem:[#allocation32_spill] sm:$0xff] %v3545_v37  ;;  %4246 = vst [vmem:[#allocation36_spill] sm:$0xff] %v3548_v26  ;;  %v3563_v33 = vadd.f32 %v1154_v1, %v4253_v20  ;;  %v3566_v32 = vadd.f32 %v1155_v8, %v4255_v34  ;;  %v4257_v22 = vld [vmem:[#allocation35_spill] sm:$0xff]  ;;  %v2014_v58 = vld [vmem:[%s2602_s9 + $0x288] sm:$0xff]  ;;  %v1194_v20 = vmul.f32 %v2002_v54, %v2002_v54 }
 0x126   : > { %4248 = vst [vmem:[#allocation42_spill] sm:$0xff] %v3551_v3  ;;  %4250 = vst [vmem:[#allocation45_spill] sm:$0xff] %v3554_v60  ;;  %v3569_v25 = vadd.f32 %v1156_v2, %v4257_v22  ;;  %v2015_v45 = vld [vmem:[%s2602_s9 + $0x290] sm:$0xff]  ;;  %v2016_v9 = vld [vmem:[%s2602_s9 + $0x298] sm:$0xff]  ;;  %v1195_v34 = vmul.f32 %v2003_v61, %v2003_v61  ;;  %v1196_v2 = vmul.f32 %v2004_v18, %v2004_v18  ;;  %v1224_v41 = vmul.f32 1.5, %v1192_v21 }
 0x127   : > { %4252 = vst [vmem:[#allocation46_spill] sm:$0xff] %v3560_v7  ;;  %4254 = vst [vmem:[#allocation47_spill] sm:$0xff] %v3563_v33  ;;  %v2017_v1 = vld [vmem:[%s2602_s9 + $0x2a0] sm:$0xff]  ;;  %v2018_v51 = vld [vmem:[%s2602_s9 + $0x2a8] sm:$0xff]  ;;  %v1200_v33 = vmul.f32 %v2008_v48, %v2008_v48  ;;  %v1201_v3 = vmul.f32 %v2009_v36, %v2009_v36  ;;  %v1202_v26 = vmul.f32 %v2010_v29, %v2010_v29 }
 0x128   : > { %4256 = vst [vmem:[#allocation48_spill] sm:$0xff] %v3566_v32  ;;  %4258 = vst [vmem:[#allocation49_spill] sm:$0xff] %v3569_v25  ;;  %v2019_v8 = vld [vmem:[%s2602_s9 + $0x2b0] sm:$0xff]  ;;  %v2020_v22 = vld [vmem:[%s2602_s9 + $0x2b8] sm:$0xff]  ;;  %v1203_v37 = vmul.f32 %v2011_v27, %v2011_v27  ;;  %v1204_v59 = vmul.f32 %v2012_v62, %v2012_v62  ;;  %v1205_v18 = vmul.f32 %v2013_v38, %v2013_v38  ;;  %v1221_v62 = vmul.f32 1.5, %v1189_v35 }
 0x129   : > { %v2021_v25 = vld [vmem:[%s2602_s9 + $0x2c0] sm:$0xff]  ;;  %v2022_v32 = vld [vmem:[%s2602_s9 + $0x2c8] sm:$0xff]  ;;  %v2023_v0 = vld [vmem:[%s2602_s9 + $0x2d0] sm:$0xff]  ;;  %v1206_v63 = vmul.f32 %v2014_v58, %v2014_v58  ;;  %v1207_v19 = vmul.f32 %v2015_v45, %v2015_v45  ;;  %v1208_v11 = vmul.f32 %v2016_v9, %v2016_v9  ;;  %v1209_v47 = vmul.f32 %v2017_v1, %v2017_v1 }
 0x12a   : > { %v2024_v7 = vld [vmem:[%s2602_s9 + $0x2d8] sm:$0xff]  ;;  %v2025_v60 = vld [vmem:[%s2602_s9 + $0x2e0] sm:$0xff]  ;;  %v2026_v54 = vld [vmem:[%s2602_s9 + $0x2e8] sm:$0xff]  ;;  %v1210_v49 = vmul.f32 %v2018_v51, %v2018_v51  ;;  %v1211_v56 = vmul.f32 %v2019_v8, %v2019_v8  ;;  %v1212_v16 = vmul.f32 %v2020_v22, %v2020_v22  ;;  %v1213_v13 = vmul.f32 %v2021_v25, %v2021_v25 }
 0x12b   : > { %v2027_v61 = vld [vmem:[%s2602_s9 + $0x2f0] sm:$0xff]  ;;  %v2028_v15 = vld [vmem:[%s2602_s9 + $0x2f8] sm:$0xff]  ;;  %v1214_v48 = vmul.f32 %v2022_v32, %v2022_v32  ;;  %v1215_v53 = vmul.f32 %v2023_v0, %v2023_v0  ;;  %v1216_v6 = vmul.f32 %v2024_v7, %v2024_v7  ;;  %v1217_v42 = vmul.f32 %v2025_v60, %v2025_v60 }
 0x12c   : > { %v1218_v36 = vmul.f32 %v2026_v54, %v2026_v54  ;;  %v1219_v29 = vmul.f32 %v2027_v61, %v2027_v61  ;;  %v1220_v27 = vmul.f32 %v2028_v15, %v2028_v15  ;;  %v1225_v38 = vmul.f32 1.5, %v1193_v55 }
 0x12d   : > { %v1226_v58 = vmul.f32 1.5, %v1194_v20  ;;  %v1227_v45 = vmul.f32 1.5, %v1195_v34  ;;  %v1228_v9 = vmul.f32 1.5, %v1196_v2  ;;  %v1229_v1 = vmul.f32 1.5, %v1197_v31 }
 0x12e   : > { %v1230_v51 = vmul.f32 1.5, %v1198_v52  ;;  %v1231_v8 = vmul.f32 1.5, %v1199_v40  ;;  %v1232_v22 = vmul.f32 1.5, %v1200_v33  ;;  %v1233_v25 = vmul.f32 1.5, %v1201_v3 }
 0x12f   : > { %v1234_v32 = vmul.f32 1.5, %v1202_v26  ;;  %v1235_v0 = vmul.f32 1.5, %v1203_v37  ;;  %v1236_v7 = vmul.f32 1.5, %v1204_v59  ;;  %v1237_v60 = vmul.f32 1.5, %v1205_v18 }
 0x130   : > { %v1238_v54 = vmul.f32 1.5, %v1206_v63  ;;  %v1239_v61 = vmul.f32 1.5, %v1207_v19  ;;  %v1240_v15 = vmul.f32 1.5, %v1208_v11  ;;  %v1241_v35 = vmul.f32 1.5, %v1209_v47 }
 0x131   : > { %v1242_v24 = vmul.f32 1.5, %v1210_v49  ;;  %v1243_v50 = vmul.f32 1.5, %v1211_v56  ;;  %v1244_v21 = vmul.f32 1.5, %v1212_v16  ;;  %v1245_v55 = vmul.f32 1.5, %v1213_v13 }
 0x132   : > { %v1246_v20 = vmul.f32 1.5, %v1214_v48  ;;  %v1247_v34 = vmul.f32 1.5, %v1215_v53  ;;  %v1248_v2 = vmul.f32 1.5, %v1216_v6  ;;  %v1249_v31 = vmul.f32 1.5, %v1217_v42 }
 0x133   : > { %v1250_v52 = vmul.f32 1.5, %v1218_v36  ;;  %v1251_v40 = vmul.f32 1.5, %v1219_v29  ;;  %v1252_v33 = vmul.f32 1.5, %v1220_v27  ;;  %v1253_v3 = vadd.f32 0.5, %v1221_v62 }
 0x134   : > { %v1254_v26 = vadd.f32 0.5, %v1222_v44  ;;  %v1255_v37 = vadd.f32 0.5, %v1223_v57  ;;  %v1256_v59 = vadd.f32 0.5, %v1224_v41  ;;  %v1257_v18 = vadd.f32 0.5, %v1225_v38 }
 0x135   : > { %v1258_v63 = vadd.f32 0.5, %v1226_v58  ;;  %v1259_v19 = vadd.f32 0.5, %v1227_v45  ;;  %v1260_v11 = vadd.f32 0.5, %v1228_v9  ;;  %v1261_v47 = vadd.f32 0.5, %v1229_v1 }
 0x136   : > { %v1262_v49 = vadd.f32 0.5, %v1230_v51  ;;  %v1263_v56 = vadd.f32 0.5, %v1231_v8  ;;  %v1264_v16 = vadd.f32 0.5, %v1232_v22  ;;  %v1265_v13 = vadd.f32 0.5, %v1233_v25 }
 0x137   : > { %v1266_v48 = vadd.f32 0.5, %v1234_v32  ;;  %v1267_v53 = vadd.f32 0.5, %v1235_v0  ;;  %v1268_v6 = vadd.f32 0.5, %v1236_v7  ;;  %v1269_v42 = vadd.f32 0.5, %v1237_v60  ;;  %v4259_v60 = vld [vmem:[#allocation37_spill] sm:$0xff] }
 0x138   : > { %v1270_v36 = vadd.f32 0.5, %v1238_v54  ;;  %v1271_v29 = vadd.f32 0.5, %v1239_v61  ;;  %v1272_v27 = vadd.f32 0.5, %v1240_v15  ;;  %v1273_v62 = vadd.f32 0.5, %v1241_v35  ;;  %v4260_v54 = vld [vmem:[#allocation38_spill] sm:$0xff]  ;;  %v4261_v61 = vld [vmem:[#allocation39_spill] sm:$0xff] }
 0x139   : > { %v1274_v44 = vadd.f32 0.5, %v1242_v24  ;;  %v1275_v57 = vadd.f32 0.5, %v1243_v50  ;;  %v1276_v41 = vadd.f32 0.5, %v1244_v21  ;;  %v1285_v38 = vmul.f32 %v1253_v3, %v3459_v12  ;;  %v4262_v15 = vld [vmem:[#allocation40_spill] sm:$0xff] }
 0x13a   : > { %v1286_v58 = vmul.f32 %v1254_v26, %v3462_v23  ;;  %v1287_v45 = vmul.f32 %v1255_v37, %v3465_v17  ;;  %v1288_v9 = vmul.f32 %v1256_v59, %v3468_v14  ;;  %v1289_v1 = vmul.f32 %v1257_v18, %v3471_v28 }
 0x13b   : > { %v1290_v51 = vmul.f32 %v1258_v63, %v3474_v46  ;;  %v1291_v8 = vmul.f32 %v1259_v19, %v3477_v30  ;;  %v1292_v22 = vmul.f32 %v1260_v11, %v3480_v43  ;;  %v1277_v25 = vadd.f32 0.5, %v1245_v55  ;;  %v4263_v55 = vld [vmem:[#allocation41_spill] sm:$0xff] }
 0x13c   : > { %v1278_v32 = vadd.f32 0.5, %v1246_v20  ;;  %v1279_v0 = vadd.f32 0.5, %v1247_v34  ;;  %v1280_v7 = vadd.f32 0.5, %v1248_v2  ;;  %v1293_v12 = vmul.f32 %v1261_v47, %v3483_v10  ;;  %v4264_v20 = vld [vmem:[#allocation43_spill] sm:$0xff]  ;;  %v4265_v34 = vld [vmem:[#allocation44_spill] sm:$0xff] }
 0x13d   : > { %v1294_v23 = vmul.f32 %v1262_v49, %v3486_v39  ;;  %v1295_v17 = vmul.f32 %v1263_v56, %v3489_v5  ;;  %v1296_v14 = vmul.f32 %v1264_v16, %v3492_v4  ;;  %v1297_v28 = vmul.f32 %v1265_v13, %v4259_v60  ;;  %v4266_v2 = vld [vmem:[#allocation16_spill] sm:$0xff]  ;;  %v4267_v13 = vld [vmem:[#allocation17_spill] sm:$0xff] }
 0x13e   : > { %v1298_v46 = vmul.f32 %v1266_v48, %v4260_v54  ;;  %v1299_v30 = vmul.f32 %v1267_v53, %v4261_v61  ;;  %v1300_v43 = vmul.f32 %v1268_v6, %v4262_v15  ;;  %v1317_v35 = vadd.f32 %v1289_v1, %v1285_v38  ;;  %v4268_v53 = vld [vmem:[#allocation20_spill] sm:$0xff]  ;;  %v2071_v15 = vld [vmem:[%s2594_s28 + $0x350] sm:$0xff] }
 0x13f   : > { %v1324_v24 = vadd.f32 %v1290_v51, %v1286_v58  ;;  %v1331_v50 = vadd.f32 %v1291_v8, %v1287_v45  ;;  %v1338_v21 = vadd.f32 %v1292_v22, %v1288_v9  ;;  %v1301_v10 = vmul.f32 %v1269_v42, %v4263_v55  ;;  %v4269_v42 = vld [vmem:[#allocation24_spill] sm:$0xff]  ;;  %v2064_v9 = vld [vmem:[%s2594_s28 + $0x318] sm:$0xff] }
 0x140   : > { %v1302_v39 = vmul.f32 %v1270_v36, %v4264_v20  ;;  %v1303_v5 = vmul.f32 %v1271_v29, %v4265_v34  ;;  %v1304_v4 = vmul.f32 %v1272_v27, %v4266_v2  ;;  %v1318_v3 = vadd.f32 %v1317_v35, %v1293_v12  ;;  %v4270_v29 = vld [vmem:[#allocation28_spill] sm:$0xff]  ;;  %v4274_v12 = vld [vmem:[#allocation45_spill] sm:$0xff]  ;;  %v2075_v20 = vld [vmem:[%s2594_s28 + $0x370] sm:$0xff] }
 0x141   : > { %v1325_v26 = vadd.f32 %v1324_v24, %v1294_v23  ;;  %v1332_v37 = vadd.f32 %v1331_v50, %v1295_v17  ;;  %v1339_v59 = vadd.f32 %v1338_v21, %v1296_v14  ;;  %v1281_v18 = vadd.f32 0.5, %v1249_v31  ;;  %v2061_v31 = vld [vmem:[%s2594_s28 + $0x300] sm:$0xff]  ;;  %v2067_v17 = vld [vmem:[%s2594_s28 + $0x330] sm:$0xff]  ;;  %v2068_v14 = vld [vmem:[%s2594_s28 + $0x338] sm:$0xff] }
 0x142   : > { %v1282_v63 = vadd.f32 0.5, %v1250_v52  ;;  %v1283_v19 = vadd.f32 0.5, %v1251_v40  ;;  %v1284_v11 = vadd.f32 0.5, %v1252_v33  ;;  %v1319_v47 = vadd.f32 %v1318_v3, %v1297_v28  ;;  %v2062_v52 = vld [vmem:[%s2594_s28 + $0x308] sm:$0xff]  ;;  %v2063_v40 = vld [vmem:[%s2594_s28 + $0x310] sm:$0xff]  ;;  %v4271_v1 = vld [vmem:[#allocation32_spill] sm:$0xff] }
 0x143   : > { %v1326_v49 = vadd.f32 %v1325_v26, %v1298_v46  ;;  %v1333_v56 = vadd.f32 %v1332_v37, %v1299_v30  ;;  %v1340_v16 = vadd.f32 %v1339_v59, %v1300_v43  ;;  %v1305_v48 = vmul.f32 %v1273_v62, %v4267_v13  ;;  %v2065_v62 = vld [vmem:[%s2594_s28 + $0x320] sm:$0xff]  ;;  %v4275_v28 = vld [vmem:[#allocation46_spill] sm:$0xff]  ;;  %v4276_v46 = vld [vmem:[#allocation47_spill] sm:$0xff] }
 0x144   : > { %v1306_v6 = vmul.f32 %v1274_v44, %v4268_v53  ;;  %v1307_v36 = vmul.f32 %v1275_v57, %v4269_v42  ;;  %v1308_v27 = vmul.f32 %v1276_v41, %v4270_v29  ;;  %v1320_v33 = vadd.f32 %v1319_v47, %v1301_v10  ;;  %v2066_v44 = vld [vmem:[%s2594_s28 + $0x328] sm:$0xff]  ;;  %v4272_v51 = vld [vmem:[#allocation36_spill] sm:$0xff]  ;;  %v4273_v41 = vld [vmem:[#allocation42_spill] sm:$0xff] }
 0x145   : > { %v1327_v38 = vadd.f32 %v1326_v49, %v1302_v39  ;;  %v1334_v58 = vadd.f32 %v1333_v56, %v1303_v5  ;;  %v1341_v45 = vadd.f32 %v1340_v16, %v1304_v4  ;;  %v1309_v57 = vmul.f32 %v1277_v25, %v4271_v1  ;;  %v2069_v60 = vld [vmem:[%s2594_s28 + $0x340] sm:$0xff]  ;;  %v2072_v43 = vld [vmem:[%s2594_s28 + $0x358] sm:$0xff]  ;;  %v2074_v10 = vld [vmem:[%s2594_s28 + $0x368] sm:$0xff] }
 0x146   : > { %v1310_v8 = vmul.f32 %v1278_v32, %v4272_v51  ;;  %v1311_v22 = vmul.f32 %v1279_v0, %v4273_v41  ;;  %v1312_v23 = vmul.f32 %v1280_v7, %v4274_v12  ;;  %v3624_v54 = vmul.f32 %v1281_v18, %v4275_v28  ;;  %v4277_v32 = vld [vmem:[#allocation48_spill] sm:$0xff]  ;;  %v4278_v0 = vld [vmem:[#allocation49_spill] sm:$0xff]  ;;  %v2076_v39 = vld [vmem:[%s2594_s28 + $0x378] sm:$0xff] }
 0x147   : > { %v3627_v25 = vmul.f32 %v1282_v63, %v4276_v46  ;;  %v3630_v61 = vmul.f32 %v1283_v19, %v4277_v32  ;;  %v3633_v30 = vmul.f32 %v1284_v11, %v4278_v0  ;;  %v2070_v7 = vld [vmem:[%s2594_s28 + $0x348] sm:$0xff]  ;;  %v1321_v35 = vadd.f32 %v1320_v33, %v1305_v48  ;;  %v2073_v55 = vld [vmem:[%s2594_s28 + $0x360] sm:$0xff]  ;;  %v2079_v37 = vld [vmem:[%s2594_s28 + $0x390] sm:$0xff] }
 0x148   : > { %v1328_v24 = vadd.f32 %v1327_v38, %v1306_v6  ;;  %v1335_v50 = vadd.f32 %v1334_v58, %v1307_v36  ;;  %v1342_v21 = vadd.f32 %v1341_v45, %v1308_v27  ;;  %v2077_v34 = vld [vmem:[%s2594_s28 + $0x380] sm:$0xff]  ;;  %v2078_v5 = vld [vmem:[%s2594_s28 + $0x388] sm:$0xff]  ;;  %v3644_v2 = vmul.f32 %v2061_v31, %v2061_v31  ;;  %v2080_v59 = vld [vmem:[%s2594_s28 + $0x398] sm:$0xff] }
 0x149   : > { %v3646_v4 = vmul.f32 %v2062_v52, %v2062_v52  ;;  %v3648_v3 = vmul.f32 %v2063_v40, %v2063_v40  ;;  %v3650_v26 = vmul.f32 %v2064_v9, %v2064_v9  ;;  %v2081_v18 = vld [vmem:[%s2594_s28 + $0x3a0] sm:$0xff]  ;;  %v3655_v63 = vmul.f32 %v2065_v62, %v2065_v62  ;;  %v2082_v49 = vld [vmem:[%s2594_s28 + $0x3a8] sm:$0xff]  ;;  %v2083_v56 = vld [vmem:[%s2594_s28 + $0x3b0] sm:$0xff] }
 0x14a   : > { %v3657_v19 = vmul.f32 %v2066_v44, %v2066_v44  ;;  %v3659_v11 = vmul.f32 %v2067_v17, %v2067_v17  ;;  %v3661_v47 = vmul.f32 %v2068_v14, %v2068_v14  ;;  %v2084_v16 = vld [vmem:[%s2594_s28 + $0x3b8] sm:$0xff]  ;;  %v3666_v13 = vmul.f32 %v2069_v60, %v2069_v60  ;;  %v2085_v31 = vld [vmem:[%s2594_s28 + $0x3c0] sm:$0xff]  ;;  %v2086_v52 = vld [vmem:[%s2594_s28 + $0x3c8] sm:$0xff] }
 0x14b   : > { %v3668_v48 = vmul.f32 %v2070_v7, %v2070_v7  ;;  %v3670_v53 = vmul.f32 %v2071_v15, %v2071_v15  ;;  %v3672_v6 = vmul.f32 %v2072_v43, %v2072_v43  ;;  %v1322_v42 = vadd.f32 %v1321_v35, %v1309_v57  ;;  %v2087_v40 = vld [vmem:[%s2594_s28 + $0x3d0] sm:$0xff]  ;;  %v2088_v33 = vld [vmem:[%s2594_s28 + $0x3d8] sm:$0xff]  ;;  %v2089_v38 = vld [vmem:[%s2594_s28 + $0x3e0] sm:$0xff] }
 0x14c   : > { %v1329_v36 = vadd.f32 %v1328_v24, %v1310_v8  ;;  %v1336_v29 = vadd.f32 %v1335_v50, %v1311_v22  ;;  %v1343_v27 = vadd.f32 %v1342_v21, %v1312_v23  ;;  %v2090_v58 = vld [vmem:[%s2594_s28 + $0x3e8] sm:$0xff]  ;;  %v2091_v45 = vld [vmem:[%s2594_s28 + $0x3f0] sm:$0xff]  ;;  %v2092_v9 = vld [vmem:[%s2594_s28 + $0x3f8] sm:$0xff]  ;;  %v3682_v62 = vmul.f32 %v2073_v55, %v2073_v55 }
 0x14d   : > { %v3684_v44 = vmul.f32 %v2074_v10, %v2074_v10  ;;  %v3686_v1 = vmul.f32 %v2075_v20, %v2075_v20  ;;  %v3688_v57 = vmul.f32 %v2076_v39, %v2076_v39  ;;  %v2125_v51 = vld [vmem:[%s2753_s22 + $0x300] sm:$0xff]  ;;  %v2126_v8 = vld [vmem:[%s2753_s22 + $0x308] sm:$0xff]  ;;  %v2127_v41 = vld [vmem:[%s2753_s22 + $0x310] sm:$0xff]  ;;  %v3694_v12 = vmul.f32 %v2077_v34, %v2077_v34 }
 0x14e   : > { %v2128_v22 = vld [vmem:[%s2753_s22 + $0x318] sm:$0xff]  ;;  %v3696_v23 = vmul.f32 %v2078_v5, %v2078_v5  ;;  %v3698_v17 = vmul.f32 %v2079_v37, %v2079_v37  ;;  %v3700_v14 = vmul.f32 %v2080_v59, %v2080_v59  ;;  %v2129_v60 = vld [vmem:[%s2753_s22 + $0x320] sm:$0xff]  ;;  %v2130_v28 = vld [vmem:[%s2753_s22 + $0x328] sm:$0xff]  ;;  %v3706_v0 = vmul.f32 %v2081_v18, %v2081_v18 }
 0x14f   : > { %4279 = vst [vmem:[#allocation50_spill] sm:$0xff] %v3688_v57  ;;  %4280 = vst [vmem:[#allocation51_spill] sm:$0xff] %v3694_v12  ;;  %v2131_v46 = vld [vmem:[%s2753_s22 + $0x330] sm:$0xff]  ;;  %v2132_v32 = vld [vmem:[%s2753_s22 + $0x338] sm:$0xff]  ;;  %v3708_v7 = vmul.f32 %v2082_v49, %v2082_v49  ;;  %v3710_v15 = vmul.f32 %v2083_v56, %v2083_v56  ;;  %v3712_v43 = vmul.f32 %v2084_v16, %v2084_v16 }
 0x150   : > { %4281 = vst [vmem:[#allocation52_spill] sm:$0xff] %v3696_v23  ;;  %4282 = vst [vmem:[#allocation53_spill] sm:$0xff] %v3698_v17  ;;  %v3715_v35 = vadd.f32 %v1322_v42, %v3624_v54  ;;  %v3718_v24 = vadd.f32 %v1329_v36, %v3627_v25  ;;  %v3721_v50 = vadd.f32 %v1336_v29, %v3630_v61  ;;  %v2133_v55 = vld [vmem:[%s2753_s22 + $0x340] sm:$0xff]  ;;  %v2134_v10 = vld [vmem:[%s2753_s22 + $0x348] sm:$0xff] }
 0x151   : > { %4283 = vst [vmem:[#allocation54_spill] sm:$0xff] %v3700_v14  ;;  %4284 = vst [vmem:[#allocation55_spill] sm:$0xff] %v3706_v0  ;;  %v3724_v21 = vadd.f32 %v1343_v27, %v3633_v30  ;;  %v2135_v20 = vld [vmem:[%s2753_s22 + $0x350] sm:$0xff]  ;;  %v2136_v39 = vld [vmem:[%s2753_s22 + $0x358] sm:$0xff]  ;;  %v3732_v5 = vmul.f32 %v2085_v31, %v2085_v31  ;;  %v3734_v37 = vmul.f32 %v2086_v52, %v2086_v52 }
 0x152   : > { %4285 = vst [vmem:[#allocation56_spill] sm:$0xff] %v3708_v7  ;;  %4286 = vst [vmem:[#allocation30_spill] sm:$0xff] %v3710_v15  ;;  %v2137_v34 = vld [vmem:[%s2753_s22 + $0x360] sm:$0xff]  ;;  %v2138_v54 = vld [vmem:[%s2753_s22 + $0x368] sm:$0xff]  ;;  %v3736_v25 = vmul.f32 %v2087_v40, %v2087_v40  ;;  %v3738_v61 = vmul.f32 %v2088_v33, %v2088_v33  ;;  %v3743_v49 = vmul.f32 %v2089_v38, %v2089_v38 }
 0x153   : > { %4287 = vst [vmem:[#allocation31_spill] sm:$0xff] %v3712_v43  ;;  %4288 = vst [vmem:[#allocation33_spill] sm:$0xff] %v3715_v35  ;;  %v2139_v30 = vld [vmem:[%s2753_s22 + $0x370] sm:$0xff]  ;;  %v2140_v59 = vld [vmem:[%s2753_s22 + $0x378] sm:$0xff]  ;;  %v3745_v56 = vmul.f32 %v2090_v58, %v2090_v58  ;;  %v3747_v16 = vmul.f32 %v2091_v45, %v2091_v45  ;;  %v3749_v42 = vmul.f32 %v2092_v9, %v2092_v9 }
 0x154   : > { %4289 = vst [vmem:[#allocation34_spill] sm:$0xff] %v3718_v24  ;;  %4290 = vst [vmem:[#allocation57_spill] sm:$0xff] %v3721_v50  ;;  %v2141_v18 = vld [vmem:[%s2753_s22 + $0x380] sm:$0xff]  ;;  %v2142_v36 = vld [vmem:[%s2753_s22 + $0x388] sm:$0xff]  ;;  %v1484_v31 = vmul.f32 %v2125_v51, %v2125_v51  ;;  %v1485_v52 = vmul.f32 %v2126_v8, %v2126_v8  ;;  %v1486_v40 = vmul.f32 %v2127_v41, %v2127_v41 }
 0x155   : > { %4291 = vst [vmem:[#allocation58_spill] sm:$0xff] %v3724_v21  ;;  %4292 = vst [vmem:[#allocation59_spill] sm:$0xff] %v3732_v5  ;;  %v2143_v29 = vld [vmem:[%s2753_s22 + $0x390] sm:$0xff]  ;;  %v2144_v27 = vld [vmem:[%s2753_s22 + $0x398] sm:$0xff]  ;;  %v1487_v33 = vmul.f32 %v2128_v22, %v2128_v22  ;;  %v1488_v45 = vmul.f32 %v2129_v60, %v2129_v60  ;;  %v1489_v50 = vmul.f32 %v2130_v28, %v2130_v28 }
 0x156   : > { %4293 = vst [vmem:[#allocation60_spill] sm:$0xff] %v3734_v37  ;;  %4294 = vst [vmem:[#allocation61_spill] sm:$0xff] %v3736_v25  ;;  %v2145_v38 = vld [vmem:[%s2753_s22 + $0x3a0] sm:$0xff]  ;;  %v2146_v58 = vld [vmem:[%s2753_s22 + $0x3a8] sm:$0xff]  ;;  %v1490_v24 = vmul.f32 %v2131_v46, %v2131_v46  ;;  %v1491_v9 = vmul.f32 %v2132_v32, %v2132_v32  ;;  %v1492_v51 = vmul.f32 %v2133_v55, %v2133_v55 }
 0x157   : > { %4295 = vst [vmem:[#allocation62_spill] sm:$0xff] %v3738_v61  ;;  %4296 = vst [vmem:[#allocation63_spill] sm:$0xff] %v3743_v49  ;;  %v2147_v21 = vld [vmem:[%s2753_s22 + $0x3b0] sm:$0xff]  ;;  %v2148_v35 = vld [vmem:[%s2753_s22 + $0x3b8] sm:$0xff]  ;;  %v1493_v8 = vmul.f32 %v2134_v10, %v2134_v10  ;;  %v1494_v41 = vmul.f32 %v2135_v20, %v2135_v20  ;;  %v1496_v25 = vmul.f32 %v2137_v34, %v2137_v34 }
 0x158   : > { %4297 = vst [vmem:[#allocation12_spill] sm:$0xff] %v3745_v56  ;;  %4298 = vst [vmem:[#allocation13_spill] sm:$0xff] %v3747_v16  ;;  %v2150_v16 = vld [vmem:[%s2753_s22 + $0x3c8] sm:$0xff]  ;;  %v1495_v56 = vmul.f32 %v2136_v39, %v2136_v39  ;;  %v2151_v22 = vld [vmem:[%s2753_s22 + $0x3d0] sm:$0xff]  ;;  %v1497_v37 = vmul.f32 %v2138_v54, %v2138_v54  ;;  %v1498_v5 = vmul.f32 %v2139_v30, %v2139_v30 }
 0x159   : > { %4299 = vst [vmem:[#allocation14_spill] sm:$0xff] %v3749_v42  ;;  %v2149_v42 = vld [vmem:[%s2753_s22 + $0x3c0] sm:$0xff]  ;;  %v2152_v49 = vld [vmem:[%s2753_s22 + $0x3d8] sm:$0xff]  ;;  %v1499_v60 = vmul.f32 %v2140_v59, %v2140_v59  ;;  %v2154_v28 = vld [vmem:[%s2753_s22 + $0x3e8] sm:$0xff]  ;;  %v1500_v32 = vmul.f32 %v2141_v18, %v2141_v18  ;;  %v1501_v15 = vmul.f32 %v2142_v36, %v2142_v36  ;;  %v1502_v7 = vmul.f32 %v2143_v29, %v2143_v29 }
 0x15a   : > { %v2153_v61 = vld [vmem:[%s2753_s22 + $0x3e0] sm:$0xff]  ;;  %v2155_v46 = vld [vmem:[%s2753_s22 + $0x3f0] sm:$0xff]  ;;  %v2156_v43 = vld [vmem:[%s2753_s22 + $0x3f8] sm:$0xff]  ;;  %v1503_v0 = vmul.f32 %v2144_v27, %v2144_v27  ;;  %v1504_v14 = vmul.f32 %v2145_v38, %v2145_v38  ;;  %v1505_v17 = vmul.f32 %v2146_v58, %v2146_v58  ;;  %v1506_v55 = vmul.f32 %v2147_v21, %v2147_v21 }
 0x15b   : > { %v1507_v10 = vmul.f32 %v2148_v35, %v2148_v35  ;;  %v1508_v20 = vmul.f32 %v2149_v42, %v2149_v42  ;;  %v1509_v39 = vmul.f32 %v2150_v16, %v2150_v16  ;;  %v1510_v23 = vmul.f32 %v2151_v22, %v2151_v22  ;;  %v2099_v42 = vld [vmem:[%s2602_s9 + $0x330] sm:$0xff]  ;;  %v2100_v36 = vld [vmem:[%s2602_s9 + $0x338] sm:$0xff]  ;;  %v4315_v58 = vld [vmem:[#allocation56_spill] sm:$0xff] }
 0x15c   : > { %v1511_v12 = vmul.f32 %v2152_v49, %v2152_v49  ;;  %v1512_v57 = vmul.f32 %v2153_v61, %v2153_v61  ;;  %v1513_v34 = vmul.f32 %v2154_v28, %v2154_v28  ;;  %v1514_v54 = vmul.f32 %v2155_v46, %v2155_v46  ;;  %v4305_v29 = vld [vmem:[#allocation51_spill] sm:$0xff] }
 0x15d   : > { %v1515_v30 = vmul.f32 %v2156_v43, %v2156_v43  ;;  %v3767_v59 = vadd.f32 %v1484_v31, %v3644_v2  ;;  %v3770_v18 = vadd.f32 %v1485_v52, %v3646_v4  ;;  %v3773_v35 = vadd.f32 %v1486_v40, %v3648_v3  ;;  %v2093_v43 = vld [vmem:[%s2602_s9 + $0x300] sm:$0xff]  ;;  %v2102_v52 = vld [vmem:[%s2602_s9 + $0x348] sm:$0xff]  ;;  %v2103_v40 = vld [vmem:[%s2602_s9 + $0x350] sm:$0xff] }
 0x15e   : > { %v3776_v21 = vadd.f32 %v1487_v33, %v3650_v26  ;;  %v3779_v61 = vadd.f32 %v1488_v45, %v3655_v63  ;;  %v3782_v49 = vadd.f32 %v1489_v50, %v3657_v19  ;;  %v3785_v2 = vadd.f32 %v1490_v24, %v3659_v11  ;;  %v2094_v11 = vld [vmem:[%s2602_s9 + $0x308] sm:$0xff]  ;;  %v2095_v24 = vld [vmem:[%s2602_s9 + $0x310] sm:$0xff]  ;;  %v2101_v31 = vld [vmem:[%s2602_s9 + $0x340] sm:$0xff] }
 0x15f   : > { %v3788_v4 = vadd.f32 %v1491_v9, %v3661_v47  ;;  %v3791_v3 = vadd.f32 %v1492_v51, %v3666_v13  ;;  %v3794_v26 = vadd.f32 %v1493_v8, %v3668_v48  ;;  %v3797_v63 = vadd.f32 %v1494_v41, %v3670_v53  ;;  %v2096_v47 = vld [vmem:[%s2602_s9 + $0x318] sm:$0xff]  ;;  %v4303_v53 = vld [vmem:[#allocation50_spill] sm:$0xff]  ;;  %v2105_v8 = vld [vmem:[%s2602_s9 + $0x360] sm:$0xff] }
 0x160   : > { %v3800_v19 = vadd.f32 %v1495_v56, %v3672_v6  ;;  %v3807_v50 = vadd.f32 %v1496_v25, %v3682_v62  ;;  %v3810_v13 = vadd.f32 %v1497_v37, %v3684_v44  ;;  %v3813_v48 = vadd.f32 %v1498_v5, %v3686_v1  ;;  %v2097_v6 = vld [vmem:[%s2602_s9 + $0x320] sm:$0xff]  ;;  %v2098_v56 = vld [vmem:[%s2602_s9 + $0x328] sm:$0xff]  ;;  %v4311_v1 = vld [vmem:[#allocation54_spill] sm:$0xff] }
 0x161   : > { %v3816_v16 = vadd.f32 %v1499_v60, %v4303_v53  ;;  %v3823_v27 = vadd.f32 %v1500_v32, %v4305_v29  ;;  %v4307_v62 = vld [vmem:[#allocation52_spill] sm:$0xff]  ;;  %v4309_v44 = vld [vmem:[#allocation53_spill] sm:$0xff]  ;;  %v3832_v5 = vadd.f32 %v1503_v0, %v4311_v1  ;;  %v4313_v33 = vld [vmem:[#allocation55_spill] sm:$0xff]  ;;  %v3841_v45 = vadd.f32 %v1505_v17, %v4315_v58 }
 0x162   : > { %4300 = vst [vmem:[#allocation15_spill] sm:$0xff] %v3807_v50  ;;  %4301 = vst [vmem:[#allocation18_spill] sm:$0xff] %v3810_v13  ;;  %v3826_v25 = vadd.f32 %v1501_v15, %v4307_v62  ;;  %v3829_v37 = vadd.f32 %v1502_v7, %v4309_v44  ;;  %v3838_v38 = vadd.f32 %v1504_v14, %v4313_v33  ;;  %v4317_v15 = vld [vmem:[#allocation30_spill] sm:$0xff]  ;;  %v4319_v7 = vld [vmem:[#allocation31_spill] sm:$0xff] }
 0x163   : > { %4302 = vst [vmem:[#allocation19_spill] sm:$0xff] %v3813_v48  ;;  %4304 = vst [vmem:[#allocation26_spill] sm:$0xff] %v3816_v16  ;;  %v3844_v9 = vadd.f32 %v1506_v55, %v4317_v15  ;;  %v3847_v51 = vadd.f32 %v1507_v10, %v4319_v7  ;;  %v2104_v0 = vld [vmem:[%s2602_s9 + $0x358] sm:$0xff]  ;;  %v2106_v41 = vld [vmem:[%s2602_s9 + $0x368] sm:$0xff] }
 0x164   : > { %4306 = vst [vmem:[#allocation27_spill] sm:$0xff] %v3823_v27  ;;  %4308 = vst [vmem:[#allocation29_spill] sm:$0xff] %v3826_v25  ;;  %v4321_v22 = vld [vmem:[#allocation59_spill] sm:$0xff]  ;;  %v4323_v14 = vld [vmem:[#allocation60_spill] sm:$0xff] }
 0x165   : > { %4310 = vst [vmem:[#allocation35_spill] sm:$0xff] %v3829_v37  ;;  %4312 = vst [vmem:[#allocation37_spill] sm:$0xff] %v3832_v5  ;;  %v3853_v60 = vadd.f32 %v1508_v20, %v4321_v22  ;;  %v3856_v28 = vadd.f32 %v1509_v39, %v4323_v14  ;;  %v4325_v17 = vld [vmem:[#allocation61_spill] sm:$0xff]  ;;  %v4327_v32 = vld [vmem:[#allocation62_spill] sm:$0xff]  ;;  %v1548_v22 = vmul.f32 %v2093_v43, %v2093_v43 }
 0x166   : > { %4314 = vst [vmem:[#allocation38_spill] sm:$0xff] %v3838_v38  ;;  %4316 = vst [vmem:[#allocation39_spill] sm:$0xff] %v3841_v45  ;;  %v3859_v46 = vadd.f32 %v1510_v23, %v4325_v17  ;;  %v3862_v55 = vadd.f32 %v1511_v12, %v4327_v32  ;;  %v2107_v10 = vld [vmem:[%s2602_s9 + $0x370] sm:$0xff]  ;;  %v2108_v53 = vld [vmem:[%s2602_s9 + $0x378] sm:$0xff]  ;;  %v1549_v14 = vmul.f32 %v2094_v11, %v2094_v11 }
 0x167   : > { %4318 = vst [vmem:[#allocation40_spill] sm:$0xff] %v3844_v9  ;;  %4320 = vst [vmem:[#allocation41_spill] sm:$0xff] %v3847_v51  ;;  %v2109_v29 = vld [vmem:[%s2602_s9 + $0x380] sm:$0xff]  ;;  %v4329_v62 = vld [vmem:[#allocation63_spill] sm:$0xff]  ;;  %v1550_v17 = vmul.f32 %v2095_v24, %v2095_v24  ;;  %v1556_v43 = vmul.f32 %v2101_v31, %v2101_v31  ;;  %v1557_v11 = vmul.f32 %v2102_v52, %v2102_v52 }
 0x168   : > { %4322 = vst [vmem:[#allocation43_spill] sm:$0xff] %v3853_v60  ;;  %4324 = vst [vmem:[#allocation44_spill] sm:$0xff] %v3856_v28  ;;  %v3868_v44 = vadd.f32 %v1512_v57, %v4329_v62  ;;  %v4331_v20 = vld [vmem:[#allocation12_spill] sm:$0xff]  ;;  %v4333_v39 = vld [vmem:[#allocation13_spill] sm:$0xff]  ;;  %v1551_v57 = vmul.f32 %v2096_v47, %v2096_v47  ;;  %v1552_v62 = vmul.f32 %v2097_v6, %v2097_v6  ;;  %v1581_v48 = vmul.f32 1.5, %v1549_v14 }
 0x169   : > { %4326 = vst [vmem:[#allocation16_spill] sm:$0xff] %v3859_v46  ;;  %4328 = vst [vmem:[#allocation17_spill] sm:$0xff] %v3862_v55  ;;  %v3871_v1 = vadd.f32 %v1513_v34, %v4331_v20  ;;  %v3874_v33 = vadd.f32 %v1514_v54, %v4333_v39  ;;  %v4335_v23 = vld [vmem:[#allocation14_spill] sm:$0xff]  ;;  %v2110_v12 = vld [vmem:[%s2602_s9 + $0x388] sm:$0xff]  ;;  %v1553_v20 = vmul.f32 %v2098_v56, %v2098_v56  ;;  %v1582_v13 = vmul.f32 1.5, %v1550_v17 }
 0x16a   : > { %4330 = vst [vmem:[#allocation20_spill] sm:$0xff] %v3868_v44  ;;  %v3877_v58 = vadd.f32 %v1515_v30, %v4335_v23  ;;  %v2111_v15 = vld [vmem:[%s2602_s9 + $0x390] sm:$0xff]  ;;  %v2112_v7 = vld [vmem:[%s2602_s9 + $0x398] sm:$0xff]  ;;  %v2113_v34 = vld [vmem:[%s2602_s9 + $0x3a0] sm:$0xff]  ;;  %v1554_v39 = vmul.f32 %v2099_v42, %v2099_v42  ;;  %v1555_v30 = vmul.f32 %v2100_v36, %v2100_v36  ;;  %v1558_v24 = vmul.f32 %v2103_v40, %v2103_v40 }
 0x16b   : > { %4332 = vst [vmem:[#allocation24_spill] sm:$0xff] %v3871_v1  ;;  %4334 = vst [vmem:[#allocation28_spill] sm:$0xff] %v3874_v33  ;;  %v2114_v32 = vld [vmem:[%s2602_s9 + $0x3a8] sm:$0xff]  ;;  %v2115_v54 = vld [vmem:[%s2602_s9 + $0x3b0] sm:$0xff]  ;;  %v1559_v1 = vmul.f32 %v2104_v0, %v2104_v0  ;;  %v1560_v46 = vmul.f32 %v2105_v8, %v2105_v8  ;;  %v1561_v28 = vmul.f32 %v2106_v41, %v2106_v41  ;;  %v1583_v50 = vmul.f32 1.5, %v1551_v57 }
 0x16c   : > { %4336 = vst [vmem:[#allocation32_spill] sm:$0xff] %v3877_v58  ;;  %v2116_v23 = vld [vmem:[%s2602_s9 + $0x3b8] sm:$0xff]  ;;  %v2117_v58 = vld [vmem:[%s2602_s9 + $0x3c0] sm:$0xff]  ;;  %v2118_v33 = vld [vmem:[%s2602_s9 + $0x3c8] sm:$0xff]  ;;  %v1562_v60 = vmul.f32 %v2107_v10, %v2107_v10  ;;  %v1563_v6 = vmul.f32 %v2108_v53, %v2108_v53  ;;  %v1564_v36 = vmul.f32 %v2109_v29, %v2109_v29  ;;  %v1565_v9 = vmul.f32 %v2110_v12, %v2110_v12 }
 0x16d   : > { %v2119_v47 = vld [vmem:[%s2602_s9 + $0x3d0] sm:$0xff]  ;;  %v2120_v44 = vld [vmem:[%s2602_s9 + $0x3d8] sm:$0xff]  ;;  %v2121_v55 = vld [vmem:[%s2602_s9 + $0x3e0] sm:$0xff]  ;;  %v1566_v45 = vmul.f32 %v2111_v15, %v2111_v15  ;;  %v1567_v38 = vmul.f32 %v2112_v7, %v2112_v7  ;;  %v1568_v5 = vmul.f32 %v2113_v34, %v2113_v34  ;;  %v1569_v37 = vmul.f32 %v2114_v32, %v2114_v32 }
 0x16e   : > { %v2122_v56 = vld [vmem:[%s2602_s9 + $0x3e8] sm:$0xff]  ;;  %v2123_v42 = vld [vmem:[%s2602_s9 + $0x3f0] sm:$0xff]  ;;  %v2124_v51 = vld [vmem:[%s2602_s9 + $0x3f8] sm:$0xff]  ;;  %v1570_v31 = vmul.f32 %v2115_v54, %v2115_v54  ;;  %v1571_v52 = vmul.f32 %v2116_v23, %v2116_v23  ;;  %v1572_v40 = vmul.f32 %v2117_v58, %v2117_v58  ;;  %v1573_v0 = vmul.f32 %v2118_v33, %v2118_v33 }
 0x16f   : > { %v1574_v25 = vmul.f32 %v2119_v47, %v2119_v47  ;;  %v1575_v27 = vmul.f32 %v2120_v44, %v2120_v44  ;;  %v1576_v16 = vmul.f32 %v2121_v55, %v2121_v55  ;;  %v1577_v8 = vmul.f32 %v2122_v56, %v2122_v56 }
 0x170   : > { %v1578_v41 = vmul.f32 %v2123_v42, %v2123_v42  ;;  %v1579_v10 = vmul.f32 %v2124_v51, %v2124_v51  ;;  %v1580_v53 = vmul.f32 1.5, %v1548_v22  ;;  %v1584_v29 = vmul.f32 1.5, %v1552_v62 }
 0x171   : > { %v1585_v12 = vmul.f32 1.5, %v1553_v20  ;;  %v1586_v15 = vmul.f32 1.5, %v1554_v39  ;;  %v1587_v7 = vmul.f32 1.5, %v1555_v30  ;;  %v1588_v34 = vmul.f32 1.5, %v1556_v43 }
 0x172   : > { %v1589_v32 = vmul.f32 1.5, %v1557_v11  ;;  %v1590_v54 = vmul.f32 1.5, %v1558_v24  ;;  %v1591_v23 = vmul.f32 1.5, %v1559_v1  ;;  %v1592_v58 = vmul.f32 1.5, %v1560_v46 }
 0x173   : > { %v1593_v33 = vmul.f32 1.5, %v1561_v28  ;;  %v1594_v47 = vmul.f32 1.5, %v1562_v60  ;;  %v1595_v44 = vmul.f32 1.5, %v1563_v6  ;;  %v1596_v55 = vmul.f32 1.5, %v1564_v36 }
 0x174   : > { %v1597_v56 = vmul.f32 1.5, %v1565_v9  ;;  %v1598_v42 = vmul.f32 1.5, %v1566_v45  ;;  %v1599_v51 = vmul.f32 1.5, %v1567_v38  ;;  %v1600_v22 = vmul.f32 1.5, %v1568_v5 }
 0x175   : > { %v1601_v14 = vmul.f32 1.5, %v1569_v37  ;;  %v1602_v17 = vmul.f32 1.5, %v1570_v31  ;;  %v1603_v57 = vmul.f32 1.5, %v1571_v52  ;;  %v1604_v62 = vmul.f32 1.5, %v1572_v40 }
 0x176   : > { %v1605_v20 = vmul.f32 1.5, %v1573_v0  ;;  %v1606_v39 = vmul.f32 1.5, %v1574_v25  ;;  %v1607_v30 = vmul.f32 1.5, %v1575_v27  ;;  %v1608_v43 = vmul.f32 1.5, %v1576_v16 }
 0x177   : > { %v1609_v11 = vmul.f32 1.5, %v1577_v8  ;;  %v1610_v24 = vmul.f32 1.5, %v1578_v41  ;;  %v1611_v1 = vmul.f32 1.5, %v1579_v10  ;;  %v1612_v46 = vadd.f32 0.5, %v1580_v53 }
 0x178   : > { %v1613_v28 = vadd.f32 0.5, %v1581_v48  ;;  %v1614_v60 = vadd.f32 0.5, %v1582_v13  ;;  %v1615_v6 = vadd.f32 0.5, %v1583_v50  ;;  %v1616_v36 = vadd.f32 0.5, %v1584_v29 }
 0x179   : > { %v1617_v9 = vadd.f32 0.5, %v1585_v12  ;;  %v1618_v45 = vadd.f32 0.5, %v1586_v15  ;;  %v1619_v38 = vadd.f32 0.5, %v1587_v7  ;;  %v1620_v5 = vadd.f32 0.5, %v1588_v34 }
 0x17a   : > { %v1621_v37 = vadd.f32 0.5, %v1589_v32  ;;  %v1622_v31 = vadd.f32 0.5, %v1590_v54  ;;  %v1623_v52 = vadd.f32 0.5, %v1591_v23  ;;  %v1624_v40 = vadd.f32 0.5, %v1592_v58 }
 0x17b   : > { %v1625_v0 = vadd.f32 0.5, %v1593_v33  ;;  %v1626_v25 = vadd.f32 0.5, %v1594_v47  ;;  %v1627_v27 = vadd.f32 0.5, %v1595_v44  ;;  %v1628_v16 = vadd.f32 0.5, %v1596_v55 }
 0x17c   : > { %v1629_v8 = vadd.f32 0.5, %v1597_v56  ;;  %v1630_v41 = vadd.f32 0.5, %v1598_v42  ;;  %v1631_v10 = vadd.f32 0.5, %v1599_v51  ;;  %v1632_v53 = vadd.f32 0.5, %v1600_v22  ;;  %v4337_v22 = vld [vmem:[#allocation15_spill] sm:$0xff] }
 0x17d   : > { %v1633_v48 = vadd.f32 0.5, %v1601_v14  ;;  %v1634_v13 = vadd.f32 0.5, %v1602_v17  ;;  %v1635_v50 = vadd.f32 0.5, %v1603_v57  ;;  %v1636_v29 = vadd.f32 0.5, %v1604_v62  ;;  %v4338_v14 = vld [vmem:[#allocation18_spill] sm:$0xff]  ;;  %v4339_v17 = vld [vmem:[#allocation19_spill] sm:$0xff] }
 0x17e   : > { %v1637_v12 = vadd.f32 0.5, %v1605_v20  ;;  %v1638_v15 = vadd.f32 0.5, %v1606_v39  ;;  %v1639_v7 = vadd.f32 0.5, %v1607_v30  ;;  %v1644_v34 = vmul.f32 %v1612_v46, %v3767_v59  ;;  %v4340_v57 = vld [vmem:[#allocation26_spill] sm:$0xff] }
 0x17f   : > { %v1645_v32 = vmul.f32 %v1613_v28, %v3770_v18  ;;  %v1646_v54 = vmul.f32 %v1614_v60, %v3773_v35  ;;  %v1647_v23 = vmul.f32 %v1615_v6, %v3776_v21  ;;  %v1648_v58 = vmul.f32 %v1616_v36, %v3779_v61  ;;  %v4345_v36 = vld [vmem:[#allocation38_spill] sm:$0xff] }
 0x180   : > { %v1649_v33 = vmul.f32 %v1617_v9, %v3782_v49  ;;  %v1650_v47 = vmul.f32 %v1618_v45, %v3785_v2  ;;  %v1651_v44 = vmul.f32 %v1619_v38, %v3788_v4  ;;  %v1640_v55 = vadd.f32 0.5, %v1608_v43  ;;  %v4341_v43 = vld [vmem:[#allocation27_spill] sm:$0xff] }
 0x181   : > { %v1641_v56 = vadd.f32 0.5, %v1609_v11  ;;  %v1642_v42 = vadd.f32 0.5, %v1610_v24  ;;  %v1643_v51 = vadd.f32 0.5, %v1611_v1  ;;  %v1652_v59 = vmul.f32 %v1620_v5, %v3791_v3  ;;  %v4342_v11 = vld [vmem:[#allocation29_spill] sm:$0xff]  ;;  %v4346_v45 = vld [vmem:[#allocation39_spill] sm:$0xff]  ;;  %v4347_v5 = vld [vmem:[#allocation40_spill] sm:$0xff] }
 0x182   : > { %v1653_v18 = vmul.f32 %v1621_v37, %v3794_v26  ;;  %v1654_v35 = vmul.f32 %v1622_v31, %v3797_v63  ;;  %v1655_v21 = vmul.f32 %v1623_v52, %v3800_v19  ;;  %v1656_v61 = vmul.f32 %v1624_v40, %v4337_v22  ;;  %v4343_v63 = vld [vmem:[#allocation35_spill] sm:$0xff]  ;;  %v4344_v19 = vld [vmem:[#allocation37_spill] sm:$0xff] }
 0x183   : > { %v1657_v49 = vmul.f32 %v1625_v0, %v4338_v14  ;;  %v1658_v2 = vmul.f32 %v1626_v25, %v4339_v17  ;;  %v1659_v4 = vmul.f32 %v1627_v27, %v4340_v57  ;;  %v1676_v62 = vadd.f32 %v1648_v58, %v1644_v34  ;;  %v4348_v31 = vld [vmem:[#allocation41_spill] sm:$0xff]  ;;  %v4351_v34 = vld [vmem:[#allocation16_spill] sm:$0xff]  ;;  %v4360_v17 = vld [vmem:[#allocation34_spill] sm:$0xff] }
 0x184   : > { %v1683_v20 = vadd.f32 %v1649_v33, %v1645_v32  ;;  %v1690_v39 = vadd.f32 %v1650_v47, %v1646_v54  ;;  %v1697_v30 = vadd.f32 %v1651_v44, %v1647_v23  ;;  %v1660_v3 = vmul.f32 %v1628_v16, %v4341_v43  ;;  %v4349_v16 = vld [vmem:[#allocation43_spill] sm:$0xff]  ;;  %v4352_v54 = vld [vmem:[#allocation17_spill] sm:$0xff] }
 0x185   : > { %v1661_v26 = vmul.f32 %v1629_v8, %v4342_v11  ;;  %v1662_v24 = vmul.f32 %v1630_v41, %v4343_v63  ;;  %v1663_v1 = vmul.f32 %v1631_v10, %v4344_v19  ;;  %v1677_v46 = vadd.f32 %v1676_v62, %v1652_v59  ;;  %v4350_v41 = vld [vmem:[#allocation44_spill] sm:$0xff]  ;;  %v4358_v14 = vld [vmem:[#allocation33_spill] sm:$0xff]  ;;  %v4361_v57 = vld [vmem:[#allocation23_spill] sm:$0xff] }
 0x186   : > { %v1684_v28 = vadd.f32 %v1683_v20, %v1653_v18  ;;  %v1691_v60 = vadd.f32 %v1690_v39, %v1654_v35  ;;  %v1698_v6 = vadd.f32 %v1697_v30, %v1655_v21  ;;  %v1664_v9 = vmul.f32 %v1632_v53, %v4345_v36  ;;  %v4355_v59 = vld [vmem:[#allocation28_spill] sm:$0xff]  ;;  %v4363_v62 = vld [vmem:[#allocation25_spill] sm:$0xff]  ;;  %v4364_v20 = vld [vmem:[#allocation58_spill] sm:$0xff] }
 0x187   : > { %v1665_v38 = vmul.f32 %v1633_v48, %v4346_v45  ;;  %v1666_v37 = vmul.f32 %v1634_v13, %v4347_v5  ;;  %v1667_v52 = vmul.f32 %v1635_v50, %v4348_v31  ;;  %v1678_v40 = vadd.f32 %v1677_v46, %v1656_v61  ;;  %v4353_v13 = vld [vmem:[#allocation20_spill] sm:$0xff] }
 0x188   : > { %v1685_v0 = vadd.f32 %v1684_v28, %v1657_v49  ;;  %v1692_v25 = vadd.f32 %v1691_v60, %v1658_v2  ;;  %v1699_v27 = vadd.f32 %v1698_v6, %v1659_v4  ;;  %v1668_v8 = vmul.f32 %v1636_v29, %v4349_v16  ;;  %v4354_v50 = vld [vmem:[#allocation24_spill] sm:$0xff]  ;;  %v4359_v49 = vld [vmem:[#allocation22_spill] sm:$0xff]  ;;  %v4362_v4 = vld [vmem:[#allocation57_spill] sm:$0xff] }
 0x189   : > { %v1669_v10 = vmul.f32 %v1637_v12, %v4350_v41  ;;  %v1670_v32 = vmul.f32 %v1638_v15, %v4351_v34  ;;  %v1671_v23 = vmul.f32 %v1639_v7, %v4352_v54  ;;  %v1679_v53 = vadd.f32 %v1678_v40, %v1660_v3  ;;  %v4356_v35 = vld [vmem:[#allocation32_spill] sm:$0xff]  ;;  %v4357_v15 = vld [vmem:[#allocation21_spill] sm:$0xff] }
 0x18a   : > { %v1686_v58 = vadd.f32 %v1685_v0, %v1661_v26  ;;  %v1693_v48 = vadd.f32 %v1692_v25, %v1662_v24  ;;  %v1700_v33 = vadd.f32 %v1699_v27, %v1663_v1  ;;  %v1672_v47 = vmul.f32 %v1640_v55, %v4353_v13 }
 0x18b   : > { %v1673_v44 = vmul.f32 %v1641_v56, %v4354_v50  ;;  %v1674_v18 = vmul.f32 %v1642_v42, %v4355_v59  ;;  %v1675_v21 = vmul.f32 %v1643_v51, %v4356_v35  ;;  %v1680_v29 = vadd.f32 %v1679_v53, %v1664_v9 }
 0x18c   : > { %v1687_v22 = vadd.f32 %v1686_v58, %v1665_v38  ;;  %v1694_v12 = vadd.f32 %v1693_v48, %v1666_v37  ;;  %v1701_v61 = vadd.f32 %v1700_v33, %v1667_v52  ;;  %v1345_v7 = vadd.f32 %v4358_v14, %v4357_v15 }
 0x18d   : > { %v1346_v2 = vadd.f32 %v4360_v17, %v4359_v49  ;;  %v1347_v55 = vadd.f32 %v4362_v4, %v4361_v57  ;;  %v1348_v56 = vadd.f32 %v4364_v20, %v4363_v62  ;;  %v1681_v39 = vadd.f32 %v1680_v29, %v1668_v8 }
 0x18e   : > { %v1688_v42 = vadd.f32 %v1687_v22, %v1669_v10  ;;  %v1695_v30 = vadd.f32 %v1694_v12, %v1670_v32  ;;  %v1702_v51 = vadd.f32 %v1701_v61, %v1671_v23 }
 0x18f   : > { %v1682_v43 = vadd.f32 %v1681_v39, %v1672_v47 }
 0x190   : > { %v1689_v3 = vadd.f32 %v1688_v42, %v1673_v44  ;;  %v1696_v11 = vadd.f32 %v1695_v30, %v1674_v18  ;;  %v1703_v26 = vadd.f32 %v1702_v51, %v1675_v21 }
 0x191   : > { %v1704_v63 = vadd.f32 %v1682_v43, %v1345_v7 }
 0x192   : > { %v1705_v24 = vadd.f32 %v1689_v3, %v1346_v2  ;;  %v1706_v19 = vadd.f32 %v1696_v11, %v1347_v55  ;;  %v1707_v1 = vadd.f32 %v1703_v26, %v1348_v56 }
 0x193   : > { %1708 = vst [vmem:[%s268_s25] sm:$0xff] %v1704_v63 }
 0x194   : > { %1709 = vst [vmem:[%s268_s25 + $0x8] sm:$0xff] %v1705_v24  ;;  %1710 = vst [vmem:[%s268_s25 + $0x10] sm:$0xff] %v1706_v19 }
 0x195   : > { %1711 = vst [vmem:[%s268_s25 + $0x18] sm:$0xff] %v1707_v1 }
 0x196   : > { %2324 = shalt.err (!%p2321_p6)
}
 0x197   : > { %s2325_s20 = scalar_lea.hbm %s3939_s6, 512  ;;  %s2329_s10 = scalar_lea.hbm %s3985_s3, 1024 }
 0x198   : > { %p2326_p12 = scmp.ne.s32.totalorder %s3939_s6, %s2325_s20  ;;  %p2330_p4 = scmp.lt.s32.totalorder %s3939_s6, %s3985_s3 }
 0x199   : > { %p2331_p2 = scmp.lt.s32.totalorder %s2329_s10, %s2325_s20 }
 0x19a   : > { %p2327_p0 = pnand %p2326_p12, %p4365_p7 }
 0x19b   : > { %p2332_p5 = por %p2331_p2, %p2330_p4 }
 0x19c   : > { %p2328_p11 = pneg %p2327_p0 }
 0x19e   : > { %p2333_p13 = pnand %p2332_p5, %p2328_p11 }
 0x1a0   : > { %2336 = shalt.err (!%p2333_p13)
}
 0x1a1   : > { %2175 = dma.vmem_to_hbm [thread:$0]  (%p4365_p7), %s3941_s11, 512, %s3939_s6, %s1713_s16  }
 0x1a2 PF: > { %s1739_s29 = sand.u32 1, %s2367_s12   ;;  %p4366_p8 = scmp.ne.s32.totalorder %s3996_s24, 0 }
 0x1a3   : > { %p4367_p10 = scmp.ge.s32.totalorder %s2379_s15, 2  ;;  %s1740_s9 = scalar_lea.sflag [#allocation4], %s1739_s29 }
 0x1a5   : > { %p2188_p1 = pnand %p4367_p10, %p4366_p8 }
 0x1a7   : > { %p2189_p3 = pneg %p2188_p1 }
 0x1a9   : > { %2362 = dma.done.wait (%p2189_p3), %s1740_s9, 512  }
 0x1aa   : > { %2364 = vsyncadd (%p2189_p3), %s1740_s9, 4294966784  ;;  %p19_p9 = scmp.ge.s32.totalorder %s2432_s18, 4   ;;  %s4368_s12 = smov %s2371_s13 }
 0x1ab   : > { %s4369_s13 = smov %s2375_s14  ;;  %s4370_s14 = smov %s2444_s21 }
 0x1ac   : > { %s4371_s15 = smov %s2432_s18  ;;  %21 = sbr.rel (!%p19_p9) target bundleno = 10 (0xa), region = 113 }
 0x1b1   :  { %1745 = vsyncpa [#allocation3], 1 }
 0x1b2   :  { %1747 = vsyncpa [#allocation3 + $0x1], 1 }
 0x1b3   :  { %1748 = vsyncpa [#allocation6], 1 }
 0x1b4   :  { %1750 = vsyncpa [#allocation6 + $0x1], 1 }
 0x1b5   :  { %1751 = vsyncpa [#allocation4], 1 }
 0x1b6   :  { %1753 = vsyncpa [#allocation4 + $0x1], 1 }

</bundles_post_ra>
